<compile_context>
chip_gen: v6e
topology: v6e:2x2x1
jax: 0.10.0
libtpu: 0.0.40
codegen_flags: <defaults>
</compile_context>

<pallas_src>
import jax
import jax.numpy as jnp
from jax.experimental import pallas as pl
from jax.experimental.pallas import tpu as pltpu

_LANE = 128
_INT8_SUBLANE = 32          # int8 packs 32 rows per sublane tile
_NEG_BIG = -1e30            # "minus infinity" bias for padded logit lanes (exp -> 0)


def _round_up(x, m):
    return ((x + m - 1) // m) * m


def _make_mlp_kernel(num_linear_layers: int, apply_softmax: bool):
    """Fused MLP kernel: chain of (bf16 matmul + f32 bias [+ ReLU]) + softmax."""

    def kernel(x_ref, *refs):
        out_ref = refs[-1]
        wb_refs = refs[:-1]                    # alternating (W bf16, b f32) pairs

        # int8 {0,1} fingerprints widened to bf16 in-kernel (VPU cast).
        h = x_ref[...].astype(jnp.bfloat16)
        for layer in range(num_linear_layers):
            w = wb_refs[2 * layer][...]        # bf16 [in, out]
            b = wb_refs[2 * layer + 1][...]    # f32  [1, out]
            # MXU matmul, f32 accumulate; bias broadcast over the batch rows.
            acc = jnp.dot(h, w, preferred_element_type=jnp.float32) + b
            if layer < num_linear_layers - 1:
                acc = jnp.maximum(acc, 0.0)      # ReLU on hidden layers (f32 VPU)
                h = acc.astype(jnp.bfloat16)     # back to bf16 for the next MXU op
            else:
                h = acc                          # final logits stay f32

        if apply_softmax:
            m = jnp.max(h, axis=-1, keepdims=True)
            e = jnp.exp(h - m)                                   # EUP exp
            denom = jnp.sum(e, axis=-1, keepdims=True)
            h = e * pl.reciprocal(denom, approx=True)            # EUP approx recip

        out_ref[...] = h.astype(out_ref.dtype)                   # bf16 store

    return kernel


def morgan_classifier_forward(x, weights, biases, *, output_activation="softmax",
                              batch_tile=None):
    """Runs the MorganClassifier (MLP) forward pass as a single Pallas kernel.

    x:       [B, input_dim] float (binary Morgan fingerprints)
    weights: list of [in_d, out_d] float32 matrices
    biases:  list of [1, out_d] float32 row-vectors
    returns: [B, num_class] float32 (softmax probabilities if requested)
    """
    assert len(weights) == len(biases)
    num_layers = len(weights)
    B, D = x.shape
    C = weights[-1].shape[1]

    # ---- lane-dense output: pad class dim up to a multiple of 128 lanes ----
    weights = list(weights)
    biases = list(biases)
    C_pad = _round_up(max(C, _LANE), _LANE)
    if C_pad != C:
        weights[-1] = jnp.pad(weights[-1], ((0, 0), (0, C_pad - C)))
        biases[-1] = jnp.pad(biases[-1], ((0, 0), (0, C_pad - C)),
                             constant_values=_NEG_BIG)

    # ---- batch tiling: multiple of 32 (int8 sublane packing), cap 512, ------
    # ---- and an even number of grid steps (>1) for v7x TC balance. ----------
    if batch_tile is None:
        half = _round_up(max(1, (B + 1) // 2), _INT8_SUBLANE)
        batch_tile = max(_INT8_SUBLANE, min(512, half))
    batch_tile = _round_up(batch_tile, _INT8_SUBLANE)
    B_pad = _round_up(B, batch_tile)
    n_tiles = B_pad // batch_tile
    if n_tiles > 1 and n_tiles % 2 == 1:
        n_tiles += 1
        B_pad = n_tiles * batch_tile

    # ---- dtypes: int8 input stream, bf16 MXU weights, f32 biases ------------
    x_i8 = x.astype(jnp.int8)                  # {0,1} fingerprints: exact
    if B_pad != B:
        x_i8 = jnp.pad(x_i8, ((0, B_pad - B), (0, 0)))   # zero rows (discarded later)
    w_lo = [w.astype(jnp.bfloat16) for w in weights]
    b_f32 = [b.astype(jnp.float32) for b in biases]

    kernel = _make_mlp_kernel(num_layers, output_activation == "softmax")

    # x / out are tiled over batch; every weight / bias is a full-array block
    # with a constant index map (resident in VMEM for the whole grid) and is
    # single-buffered (pl.Buffered(1)) so it isn't double-buffered for nothing.
    in_specs = [pl.BlockSpec((batch_tile, D), lambda i: (i, 0))]
    operands = [x_i8]
    for w, b in zip(w_lo, b_f32):
        in_specs.append(pl.BlockSpec(w.shape, lambda i: (0, 0),
                                     pipeline_mode=pl.Buffered(1)))
        in_specs.append(pl.BlockSpec(b.shape, lambda i: (0, 0),
                                     pipeline_mode=pl.Buffered(1)))
        operands.append(w)
        operands.append(b)
    out_spec = pl.BlockSpec((batch_tile, C_pad), lambda i: (i, 0))

    # ---- advisory cost estimate for the XLA scheduler ----------------------
    flops = 2 * B_pad * sum(int(w.shape[0]) * int(w.shape[1]) for w in w_lo)
    transcendentals = B_pad * C_pad if output_activation == "softmax" else 0
    bytes_accessed = (x_i8.size * 1
                      + sum(w.size * 2 for w in w_lo)
                      + sum(b.size * 4 for b in b_f32)
                      + B_pad * C_pad * 2)
    cost = pl.CostEstimate(flops=flops, transcendentals=transcendentals,
                           bytes_accessed=bytes_accessed)

    out = pl.pallas_call(
        kernel,
        out_shape=jax.ShapeDtypeStruct((B_pad, C_pad), jnp.bfloat16),
        grid_spec=pltpu.PrefetchScalarGridSpec(
            num_scalar_prefetch=0,
            grid=(n_tiles,),
            in_specs=in_specs,
            out_specs=out_spec,
        ),
        compiler_params=pltpu.CompilerParams(
            dimension_semantics=("parallel",),
            vmem_limit_bytes=48 * 1024 * 1024,
        ),
        cost_estimate=cost,
    )(*operands)

    # Slice away batch/class padding; upcast for callers expecting f32 probs.
    return out[:B, :C].astype(jnp.float32)


def init_mlp_params(key, input_dim, hidden_dim, num_hidden_layers, num_class):
    """Deterministic PyTorch-Linear-style (uniform +-1/sqrt(fan_in)) init."""
    dims = [input_dim] + [hidden_dim] * num_hidden_layers + [num_class]
    weights, biases = [], []
    for i in range(len(dims) - 1):
        key, kw, kb = jax.random.split(key, 3)
        bound = 1.0 / jnp.sqrt(dims[i])
        w = jax.random.uniform(kw, (dims[i], dims[i + 1]), jnp.float32,
                               minval=-bound, maxval=bound)
        b = jax.random.uniform(kb, (1, dims[i + 1]), jnp.float32,
                               minval=-bound, maxval=bound)
        weights.append(w)
        biases.append(b)
    return weights, biases


def reference_forward_f32(x, weights, biases, output_activation="softmax"):
    """Exact f32 reference (what the PyTorch module computes)."""
    h = x.astype(jnp.float32)
    n = len(weights)
    for i, (w, b) in enumerate(zip(weights, biases)):
        h = h @ w + b
        if i < n - 1:
            h = jnp.maximum(h, 0.0)
    if output_activation == "softmax":
        h = jax.nn.softmax(h, axis=-1)
    return h


def reference_forward_matched(x, weights, biases, output_activation="softmax"):
    """Reference matching the kernel matmul numerics (bf16 operands, f32 acc).

    Note: the kernel additionally quantizes the final probabilities to bf16 on
    store and uses an approximate reciprocal; both stay within the 1e-2
    tolerances used below.
    """
    h = x.astype(jnp.bfloat16)
    n = len(weights)
    for i, (w, b) in enumerate(zip(weights, biases)):
        acc = jnp.dot(h, w.astype(jnp.bfloat16),
                      preferred_element_type=jnp.float32) + b
        if i < n - 1:
            acc = jnp.maximum(acc, 0.0)
            h = acc.astype(jnp.bfloat16)
        else:
            h = acc
    if output_activation == "softmax":
        h = jax.nn.softmax(h, axis=-1)
    return h


if __name__ == "__main__":
    # Modest, module-consistent shapes: fingerprint vector -> class probs.
    # batch_tile defaults to 512 here, giving an even 2-step parallel grid.
    batch = 1024
    input_dim = 512          # fingerprint length (kept small)
    num_class = 10
    mlp_params = {
        "hidden_dim": 256,
        "num_hidden_layers": 2,
        "output_activation": "softmax",
    }

    key = jax.random.PRNGKey(0)
    key, kx = jax.random.split(key)
    # Morgan fingerprints are binary; use {0,1} floats (exact in int8/bf16).
    x = (jax.random.uniform(kx, (batch, input_dim)) > 0.5).astype(jnp.float32)

    weights, biases = init_mlp_params(
        key, input_dim, mlp_params["hidden_dim"],
        mlp_params["num_hidden_layers"], num_class)

    out = morgan_classifier_forward(
        x, weights, biases,
        output_activation=mlp_params["output_activation"])
    out = jax.block_until_ready(out)

    ref_matched = reference_forward_matched(
        x, weights, biases, mlp_params["output_activation"])
    ref_f32 = reference_forward_f32(
        x, weights, biases, mlp_params["output_activation"])

    assert out.shape == (batch, num_class)
    assert bool(jnp.all(jnp.isfinite(out)))
    # Rows are valid probability distributions (approx-recip + bf16 store
    # error is well below 1e-2).
    assert jnp.allclose(jnp.sum(out, axis=-1), 1.0, atol=1e-2)
    # Tight check against a numerics-matched (bf16 matmul) reference.
    assert jnp.allclose(out, ref_matched, atol=1e-2, rtol=1e-2)
    # Loose sanity check against the exact f32 (PyTorch-equivalent) forward.
    assert jnp.allclose(out, ref_f32, atol=5e-2, rtol=5e-2)

    print("KERNEL_OK")
</pallas_src>

<mosaic_0001>
module attributes {stable_mosaic.version = 11 : i64} {
  func.func @kernel(%arg0: i32, %arg1: memref<512x512xi8, #tpu.memory_space<vmem>>, %arg2: memref<512x256xbf16, #tpu.memory_space<vmem>>, %arg3: memref<1x256xf32, #tpu.memory_space<vmem>>, %arg4: memref<256x256xbf16, #tpu.memory_space<vmem>>, %arg5: memref<1x256xf32, #tpu.memory_space<vmem>>, %arg6: memref<256x128xbf16, #tpu.memory_space<vmem>>, %arg7: memref<1x128xf32, #tpu.memory_space<vmem>>, %arg8: memref<512x128xbf16, #tpu.memory_space<vmem>>) attributes {dimension_semantics = [#tpu.dimension_semantics<parallel>], iteration_bounds = array<i64: 2>, scalar_prefetch = 0 : i64, scratch_operands = 0 : i64, tpu.core_type = #tpu.core_type<tc>, window_params = [{transform_indices = @transform_0, window_bounds = array<i64: 512, 512>}, {pipeline_mode = #tpu.pipeline_mode<synchronous>, transform_indices = @transform_1, window_bounds = array<i64: 512, 256>}, {pipeline_mode = #tpu.pipeline_mode<synchronous>, transform_indices = @transform_2, window_bounds = array<i64: 1, 256>}, {pipeline_mode = #tpu.pipeline_mode<synchronous>, transform_indices = @transform_3, window_bounds = array<i64: 256, 256>}, {pipeline_mode = #tpu.pipeline_mode<synchronous>, transform_indices = @transform_4, window_bounds = array<i64: 1, 256>}, {pipeline_mode = #tpu.pipeline_mode<synchronous>, transform_indices = @transform_5, window_bounds = array<i64: 256, 128>}, {pipeline_mode = #tpu.pipeline_mode<synchronous>, transform_indices = @transform_6, window_bounds = array<i64: 1, 128>}, {transform_indices = @transform_7, window_bounds = array<i64: 512, 128>}]} {
    %c0 = arith.constant 0 : index
    %c0_0 = arith.constant 0 : index
    %0 = vector.load %arg1[%c0, %c0_0] : memref<512x512xi8, #tpu.memory_space<vmem>>, vector<512x512xi8>
    %1 = arith.sitofp %0 : vector<512x512xi8> to vector<512x512xbf16>
    %c0_1 = arith.constant 0 : index
    %c0_2 = arith.constant 0 : index
    %2 = vector.load %arg2[%c0_1, %c0_2] : memref<512x256xbf16, #tpu.memory_space<vmem>>, vector<512x256xbf16>
    %c0_3 = arith.constant 0 : index
    %c0_4 = arith.constant 0 : index
    %3 = vector.load %arg3[%c0_3, %c0_4] : memref<1x256xf32, #tpu.memory_space<vmem>>, vector<1x256xf32>
    %cst = arith.constant dense<0.000000e+00> : vector<512x256xf32>
    %4 = tpu.matmul %1, %2, %cst {dimension_numbers = #tpu.dot_dimension_numbers<[1], [0], [0], [1], [0, 0, 1, 1], [], []>} : vector<512x512xbf16>, vector<512x256xbf16>, vector<512x256xf32> -> vector<512x256xf32>
    %5 = vector.broadcast %3 : vector<1x256xf32> to vector<512x256xf32>
    %6 = arith.addf %4, %5 : vector<512x256xf32>
    %cst_5 = arith.constant 0.000000e+00 : f32
    %7 = vector.broadcast %cst_5 : f32 to vector<512x256xf32>
    %8 = arith.maximumf %6, %7 : vector<512x256xf32>
    %9 = arith.truncf %8 : vector<512x256xf32> to vector<512x256xbf16>
    %c0_6 = arith.constant 0 : index
    %c0_7 = arith.constant 0 : index
    %10 = vector.load %arg4[%c0_6, %c0_7] : memref<256x256xbf16, #tpu.memory_space<vmem>>, vector<256x256xbf16>
    %c0_8 = arith.constant 0 : index
    %c0_9 = arith.constant 0 : index
    %11 = vector.load %arg5[%c0_8, %c0_9] : memref<1x256xf32, #tpu.memory_space<vmem>>, vector<1x256xf32>
    %cst_10 = arith.constant dense<0.000000e+00> : vector<512x256xf32>
    %12 = tpu.matmul %9, %10, %cst_10 {dimension_numbers = #tpu.dot_dimension_numbers<[1], [0], [0], [1], [0, 0, 1, 1], [], []>} : vector<512x256xbf16>, vector<256x256xbf16>, vector<512x256xf32> -> vector<512x256xf32>
    %13 = vector.broadcast %11 : vector<1x256xf32> to vector<512x256xf32>
    %14 = arith.addf %12, %13 : vector<512x256xf32>
    %cst_11 = arith.constant 0.000000e+00 : f32
    %15 = vector.broadcast %cst_11 : f32 to vector<512x256xf32>
    %16 = arith.maximumf %14, %15 : vector<512x256xf32>
    %17 = arith.truncf %16 : vector<512x256xf32> to vector<512x256xbf16>
    %c0_12 = arith.constant 0 : index
    %c0_13 = arith.constant 0 : index
    %18 = vector.load %arg6[%c0_12, %c0_13] : memref<256x128xbf16, #tpu.memory_space<vmem>>, vector<256x128xbf16>
    %c0_14 = arith.constant 0 : index
    %c0_15 = arith.constant 0 : index
    %19 = vector.load %arg7[%c0_14, %c0_15] : memref<1x128xf32, #tpu.memory_space<vmem>>, vector<1x128xf32>
    %cst_16 = arith.constant dense<0.000000e+00> : vector<512x128xf32>
    %20 = tpu.matmul %17, %18, %cst_16 {dimension_numbers = #tpu.dot_dimension_numbers<[1], [0], [0], [1], [0, 0, 1, 1], [], []>} : vector<512x256xbf16>, vector<256x128xbf16>, vector<512x128xf32> -> vector<512x128xf32>
    %21 = vector.broadcast %19 : vector<1x128xf32> to vector<512x128xf32>
    %22 = arith.addf %20, %21 : vector<512x128xf32>
    %cst_17 = arith.constant dense<0xFF800000> : vector<512xf32>
    %23 = vector.multi_reduction <maximumf>, %22, %cst_17 [1] : vector<512x128xf32> to vector<512xf32>
    %24 = vector.shape_cast %23 : vector<512xf32> to vector<512x1xf32>
    %25 = vector.broadcast %24 : vector<512x1xf32> to vector<512x128xf32>
    %26 = arith.subf %22, %25 : vector<512x128xf32>
    %27 = math.exp %26 : vector<512x128xf32>
    %cst_18 = arith.constant dense<0.000000e+00> : vector<512xf32>
    %28 = vector.multi_reduction <add>, %27, %cst_18 [1] : vector<512x128xf32> to vector<512xf32>
    %29 = vector.shape_cast %28 : vector<512xf32> to vector<512x1xf32>
    %30 = tpu.reciprocal %29 {approx = true} : vector<512x1xf32> -> vector<512x1xf32>
    %31 = vector.broadcast %30 : vector<512x1xf32> to vector<512x128xf32>
    %32 = arith.mulf %27, %31 : vector<512x128xf32>
    %33 = arith.truncf %32 : vector<512x128xf32> to vector<512x128xbf16>
    %c0_19 = arith.constant 0 : index
    %c0_20 = arith.constant 0 : index
    %34 = vector.load %arg8[%c0_19, %c0_20] : memref<512x128xbf16, #tpu.memory_space<vmem>>, vector<512x128xbf16>
    tpu.vector_store %arg8[%c0_19, %c0_20], %33 {strides = array<i32>} : memref<512x128xbf16, #tpu.memory_space<vmem>>, vector<512x128xbf16>,
    return
  }
  func.func @transform_0(%arg0: i32) -> (i32, i32) {
    %c0_i32 = arith.constant 0 : i32
    %c0_i32_0 = arith.constant 0 : i32
    return %arg0, %c0_i32 : i32, i32
  }
  func.func @transform_1(%arg0: i32) -> (i32, i32) {
    %c0_i32 = arith.constant 0 : i32
    %c0_i32_0 = arith.constant 0 : i32
    %c0_i32_1 = arith.constant 0 : i32
    return %c0_i32, %c0_i32_0 : i32, i32
  }
  func.func @transform_2(%arg0: i32) -> (i32, i32) {
    %c0_i32 = arith.constant 0 : i32
    %c0_i32_0 = arith.constant 0 : i32
    %c0_i32_1 = arith.constant 0 : i32
    return %c0_i32, %c0_i32_0 : i32, i32
  }
  func.func @transform_3(%arg0: i32) -> (i32, i32) {
    %c0_i32 = arith.constant 0 : i32
    %c0_i32_0 = arith.constant 0 : i32
    %c0_i32_1 = arith.constant 0 : i32
    return %c0_i32, %c0_i32_0 : i32, i32
  }
  func.func @transform_4(%arg0: i32) -> (i32, i32) {
    %c0_i32 = arith.constant 0 : i32
    %c0_i32_0 = arith.constant 0 : i32
    %c0_i32_1 = arith.constant 0 : i32
    return %c0_i32, %c0_i32_0 : i32, i32
  }
  func.func @transform_5(%arg0: i32) -> (i32, i32) {
    %c0_i32 = arith.constant 0 : i32
    %c0_i32_0 = arith.constant 0 : i32
    %c0_i32_1 = arith.constant 0 : i32
    return %c0_i32, %c0_i32_0 : i32, i32
  }
  func.func @transform_6(%arg0: i32) -> (i32, i32) {
    %c0_i32 = arith.constant 0 : i32
    %c0_i32_0 = arith.constant 0 : i32
    %c0_i32_1 = arith.constant 0 : i32
    return %c0_i32, %c0_i32_0 : i32, i32
  }
  func.func @transform_7(%arg0: i32) -> (i32, i32) {
    %c0_i32 = arith.constant 0 : i32
    %c0_i32_0 = arith.constant 0 : i32
    return %arg0, %c0_i32 : i32, i32
  }
}

</mosaic_0001>

<bundles_post_ra>
// kernel: tpu_custom_call.1
= control target key start
LH: loop header
LB: loop body
LE: loop exit
PB: predicated region body
PF: predicated region fallthrough
CT: control target
= control target key end

     0   :  { %s7148_s0 = inlined_call_operand.hbm [shape: s8[1024,512], index: 0, kind: input, shape index: {}]   ;;  %s7149_s1 = inlined_call_operand.hbm [shape: bf16[512,256], index: 1, kind: input, shape index: {}]   ;;  %s7150_s2 = inlined_call_operand.vmem [shape: f32[1,256], index: 2, kind: input, shape index: {}]   ;;  %s7151_s3 = inlined_call_operand.hbm [shape: bf16[256,256], index: 3, kind: input, shape index: {}]   ;;  %s7152_s4 = inlined_call_operand.vmem [shape: f32[1,256], index: 4, kind: input, shape index: {}]   ;;  %s7153_s5 = inlined_call_operand.hbm [shape: bf16[256,128], index: 5, kind: input, shape index: {}]   ;;  %s7154_s6 = inlined_call_operand.vmem [shape: f32[1,128], index: 6, kind: input, shape index: {}]   ;;  %s7155_s7 = inlined_call_operand.hbm [shape: bf16[1024,128], index: 7, kind: output, shape index: {}]  }
   0x1   :  { %7176 = sst [smem:[#allocation25_spill]] %s7149_s1 }
   0x2   :  { %12 = vsyncpa [#allocation3], 0 }
   0x3   :  { %14 = vsyncpa [#allocation3 + $0x1], 0 }
   0x4   :  { %15 = vsyncpa [#allocation6], 0 }
   0x5   :  { %16 = vsyncpa [#allocation9], 0 }
   0x6   :  { %17 = vsyncpa [#allocation4], 0 }
   0x7   :  { %19 = vsyncpa [#allocation4 + $0x1], 0  ;;  %s5209_s24 = smov 0   ;;  %s5211_s25 = smov 0  }
   0x8   :  { %s5213_s26 = smov 0   ;;  %s5215_s27 = smov 0  }
   0x9 LB: > { %s5230_s28 = sadd.s32 4294967295, %s5153_s27   ;;  %s4016_s29 = sadd.s32 4294967294, %s5153_s27   ;;  %s5153_s27 = sphi %s5215_s27, %s7242_s27   ;;  %s5149_s26 = sphi %s5213_s26, %s7241_s26   ;;  %s5145_s25 = sphi %s5211_s25, %s7240_s25   ;;  %s5141_s24 = sphi %s5209_s24, %s7239_s24  }
   0xa   : > { %p45_p0 = scmp.ne.s32.totalorder %s5145_s25, %s5141_s24  ;;  %p7156_p1 = scmp.eq.s32.totalorder %s5230_s28, 0 }
   0xb   : > { %p201_p3 = scmp.eq.s32.totalorder %s4016_s29, 1  ;;  %p4017_p5 = scmp.ge.s32.totalorder %s5153_s27, 1 }
   0xc   : > { %p5239_p4 = por %p7156_p1, %p45_p0  ;;  %p208_p7 = scmp.lt.s32.totalorder %s5153_s27, 3 }
   0xd   : > { %p5244_p6 = por %p201_p3, %p45_p0  ;;  %s5155_s10 = smov [#allocation5]  }
   0xe   : > { %s7177_s30 = scalar_select %p5239_p4, 1, 0 }
   0xf   : > { %s7178_s8 = scalar_select %p5244_p6, 1, 0 }
  0x10   : > { %p5249_p8 = pnand %p4017_p5, %p208_p7  ;;  %s220_s11 = sshll.u32 %s5155_s10, 4  ;;  %s221_s11 = int_to_ptr.vmem [resolvable:$true] %s220_s11 }
  0x11   : > { %s5156_s13 = smov [#allocation7]   ;;  %s5157_s15 = smov [#allocation8]  }
  0x12   : > { %s7179_s9 = scalar_select %p5249_p8, 1, 0 }
  0x13   : > { %p4488_p9 = pneg %p5249_p8  ;;  %s236_s14 = sshll.u32 %s5156_s13, 4  ;;  %s237_s14 = int_to_ptr.vmem [resolvable:$true] %s236_s14 }
  0x14   : > { %s252_s16 = sshll.u32 %s5157_s15, 4  ;;  %s4986_s17 = scalar_lea.vmem %s221_s11, 8192  ;;  %s253_s16 = int_to_ptr.vmem [resolvable:$true] %s252_s16 }
  0x15   : > { %p5258_p11 = pnand %p4488_p9, %p7156_p1  ;;  %p4987_p13 = scmp.ne.s32.totalorder %s221_s11, %s4986_s17 }
  0x16   : > { %p4994_p5 = scmp.lt.s32.totalorder %s221_s11, %s221_s11  ;;  %p4995_p7 = scmp.lt.s32.totalorder %s4986_s17, %s4986_s17 }
  0x17   : > { %p4977_p12 = pneg %p5258_p11 }
  0x18   : > { %p4996_p9 = por %p4995_p7, %p4994_p5 }
  0x19   : > { %p4989_p0 = pnand %p4987_p13, %p4977_p12 }
  0x1b   : > { %p4990_p3 = pneg %p4989_p0 }
  0x1d   : > { %p4997_p10 = pnand %p4996_p9, %p4990_p3 }
  0x1f   : > { %5000 = shalt.err (!%p4997_p10)
}
  0x20   : > { %s5158_s18 = smov 128   ;;  %s5159_s19 = smov 8  }
  0x21   : > { %s7181_s1 = sld [smem:[#allocation25_spill]]  ;;  %s5012_s22 = scalar_lea.vmem %s237_s14, 4096 }
  0x22   : > { %p5013_p1 = scmp.ne.s32.totalorder %s237_s14, %s5012_s22  ;;  %p5020_p2 = scmp.lt.s32.totalorder %s237_s14, %s237_s14 }
  0x23   : > { %p5021_p6 = scmp.lt.s32.totalorder %s5012_s22, %s5012_s22 }
  0x24   : > { %p5015_p13 = pnand %p5013_p1, %p4977_p12 }
  0x25   : > { %p5022_p5 = por %p5021_p6, %p5020_p2 }
  0x26   : > { %p5016_p0 = pneg %p5015_p13 }
  0x27   : > { %4491 = dma.hbm_to_vmem [thread:$0]  (!%p5258_p11), %s7181_s1, 8192, %s221_s11, [#allocation6], %s5158_s18, %s5158_s18, %s5159_s19  }
  0x28   : > { %p5023_p3 = pnand %p5022_p5, %p5016_p0 }
  0x2a   : > { %5026 = shalt.err (!%p5023_p3)
}
  0x2b   : > { %4494 = dma.hbm_to_vmem [thread:$0]  (!%p5258_p11), %s7151_s3, 4096, %s237_s14, [#allocation6], %s5158_s18, %s5158_s18, %s5159_s19  }
  0x2c   : > { %s5038_s10 = scalar_lea.vmem %s253_s16, 2048  ;;  %p5046_p9 = scmp.lt.s32.totalorder %s253_s16, %s253_s16 }
  0x2d   : > { %p5039_p10 = scmp.ne.s32.totalorder %s253_s16, %s5038_s10  ;;  %p5047_p13 = scmp.lt.s32.totalorder %s5038_s10, %s5038_s10 }
  0x2f   : > { %p5041_p7 = pnand %p5039_p10, %p4977_p12  ;;  %p5048_p4 = por %p5047_p13, %p5046_p9 }
  0x31   : > { %p5042_p1 = pneg %p5041_p7 }
  0x33   : > { %p5049_p2 = pnand %p5048_p4, %p5042_p1 }
  0x35   : > { %5052 = shalt.err (!%p5049_p2)
}
  0x36   : > { %s5160_s11 = smov 64   ;;  %s5161_s13 = smov 4  }
  0x37   : > { %4497 = dma.hbm_to_vmem [thread:$0]  (!%p5258_p11), %s7153_s5, 2048, %s253_s16, [#allocation9], %s5160_s11, %s5160_s11, %s5161_s13  }
  0x38   : > { %s5289_s17 = sadd.s32 1, %s5153_s27   ;;  %s32_s19 = sadd.s32 1, %s5149_s26 }
  0x39   : > { %s29_s18 = ssub.s32 %s5153_s27, %s5289_s17  ;;  %p39_p6 = scmp.ne.s32.totalorder %s5149_s26, %s5145_s25 }
  0x3a   : > { %p30_p4 = scmp.eq.s32.totalorder %s29_s18, 0  ;;  %p40_p12 = scmp.eq.s32.totalorder %s5153_s27, 0 }
  0x3b   : > { %p4509_p0 = scmp.lt.s32.totalorder %s5153_s27, 2  ;;  %p7182_p3 = scmp.eq.s32.totalorder %s5230_s28, 1 }
  0x3c   : > { %s5299_s20 = scalar_select %p30_p4, %s5149_s26, %s32_s19  }
  0x3d   : > { %p41_p5 = por %p40_p12, %p39_p6  ;;  %p5303_p10 = por %p7182_p3, %p39_p6 }
  0x3e   : > { %s269_s12 = sand.u32 1, %s5149_s26   ;;  %s4215_s22 = sshll.u32 %s5153_s27, 13 }
  0x3f   : > { %s7183_s21 = scalar_select %p5303_p10, 1, 0 }
  0x40   : > { %s4022_s16 = sshll.u32 %s269_s12, 9  ;;  %s5312_s10 = scalar_lea.hbm %s7148_s0, %s4215_s22 }
  0x41   : > { %s273_s11 = scalar_lea.vmem [#allocation2], %s4022_s16  ;;  %p5314_p11 = pnand %p4509_p0, %p41_p5 }
  0x42   : > { %s281_s13 = sshll.u32 %s273_s11, 4  ;;  %s5320_s15 = scalar_lea.sflag [#allocation3], %s269_s12  ;;  %s5318_s13 = int_to_ptr.vmem [resolvable:$true] %s281_s13 }
  0x43   : > { %s5053_s18 = scalar_lea.hbm %s5312_s10, 8192  ;;  %p5055_p1 = pneg %p5314_p11 }
  0x44   : > { %p5054_p7 = scmp.ne.s32.totalorder %s5312_s10, %s5053_s18  ;;  %s5058_s16 = scalar_lea.hbm %s7148_s0, 16384 }
  0x45   : > { %p5059_p2 = scmp.lt.s32.totalorder %s5312_s10, %s7148_s0  ;;  %p5060_p4 = scmp.lt.s32.totalorder %s5058_s16, %s5053_s18 }
  0x46   : > { %p5056_p9 = pnand %p5055_p1, %p5054_p7 }
  0x47   : > { %p5061_p6 = por %p5060_p4, %p5059_p2 }
  0x48   : > { %p5057_p13 = pneg %p5056_p9 }
  0x4a   : > { %p5062_p12 = pnand %p5061_p6, %p5057_p13 }
  0x4c   : > { %5065 = shalt.err (!%p5062_p12)
}
  0x4d   : > { %s5066_s12 = scalar_lea.vmem %s5318_s13, 8192  ;;  %s5162_s11 = smov [#allocation2]  }
  0x4e   : > { %p5067_p0 = scmp.ne.s32.totalorder %s5318_s13, %s5066_s12  ;;  %s5071_s1 = sshll.u32 %s5162_s11, 4  ;;  %s5072_s1 = int_to_ptr.vmem [resolvable:$false] %s5071_s1 }
  0x4f   : > { %s5073_s19 = scalar_lea.vmem %s5072_s1, 16384  ;;  %p5074_p7 = scmp.lt.s32.totalorder %s5318_s13, %s5072_s1 }
  0x50   : > { %p5069_p5 = pnand %p5067_p0, %p5055_p1  ;;  %p5075_p9 = scmp.lt.s32.totalorder %s5073_s19, %s5066_s12 }
  0x52   : > { %p5070_p3 = pneg %p5069_p5  ;;  %p5076_p10 = por %p5075_p9, %p5074_p7 }
  0x54   : > { %p5077_p8 = pnand %p5076_p10, %p5070_p3 }
  0x56   : > { %5080 = shalt.err (!%p5077_p8)
}
  0x57   : > { %s5163_s18 = smov 512   ;;  %s5164_s22 = smov 32  }
  0x58   : > { %4501 = dma.hbm_to_vmem [thread:$0]  (!%p5314_p11), %s5312_s10, 8192, %s5318_s13, %s5320_s15, %s5163_s18, %s5163_s18, %s5164_s22  }
  0x59   : > { %p7185_p1 = scmp.ne.s32.totalorder %s7179_s9, 0 }
  0x5b   : > { %293 = sbr.rel (%p7185_p1) target bundleno = 1406 (0x57e), region = 48 }
  0x60   : > { %s5344_s16 = sand.u32 1, %s5145_s25   ;;  %p7186_p8 = scmp.ne.s32.totalorder %s7177_s30, 0 }
  0x61   : > { %s4027_s1 = sshll.u32 %s5344_s16, 9  ;;  %s296_s23 = scalar_lea.sflag [#allocation3], %s5344_s16 }
  0x62   : > { %s5348_s29 = scalar_lea.vmem [#allocation2], %s4027_s1 }
  0x63   : > { %5124 = dma.done.wait (%p7186_p8), %s296_s23, 8192  }
  0x64   : > { %5126 = vsyncadd (%p7186_p8), %s296_s23, 4294959104  ;;  %p7187_p10 = scmp.eq.s32.totalorder %s5230_s28, 0 }
  0x66   : > { %5128 = dma.done.wait (%p7187_p10), [#allocation6], 12288   ;;  %p7188_p11 = pmov %p7187_p10 }
  0x67   : > { %p7189_p13 = pmov %p7187_p10 }
  0x68   : > { %5130 = vsyncadd (%p7188_p11), [#allocation6], 4294955008 }
  0x69   : > { %5132 = dma.done.wait (%p7189_p13), [#allocation9], 2048   ;;  %p7190_p2 = pmov %p7187_p10 }
  0x6a   : > { %v4558_v0 = vld [vmem:[#allocation5 + $0x74] ss:$8 sps:$4 sm:$0xff]   ;;  %v4560_v1 = vld [vmem:[#allocation5 + $0x70] ss:$8 sps:$4 sm:$0xff]   ;;  %v4564_v4 = vld [vmem:[#allocation5 + $0x64] ss:$8 sps:$4 sm:$0xff]  }
  0x6b   : > { %5134 = vsyncadd (%p7190_p2), [#allocation9], 4294965248  ;;  %933 = vmatprep.subr.bf16.mxu0 %v4558_v0  ;;  %v4561_v2 = vld [vmem:[#allocation5 + $0x174] ss:$8 sps:$4 sm:$0xff]   ;;  %v4563_v3 = vld [vmem:[#allocation5 + $0x170] ss:$8 sps:$4 sm:$0xff]  }
  0x6c   : > { %934 = vmatpush1.bf16.msra.mxu0 %v4560_v1  ;;  %v4566_v5 = vld [vmem:[#allocation5 + $0x60] ss:$8 sps:$4 sm:$0xff]   ;;  %1286 = vmatprep.subr.bf16.mxu1 %v4561_v2  ;;  %v4567_v6 = vld [vmem:[#allocation5 + $0x164] ss:$8 sps:$4 sm:$0xff]   ;;  %v4570_v8 = vld [vmem:[#allocation5 + $0x54] ss:$8 sps:$4 sm:$0xff]  }
  0x6d   : > { %1287 = vmatpush1.bf16.msra.mxu1 %v4563_v3  ;;  %935 = vmatprep.subr.bf16.mxu0 %v4564_v4  ;;  %v4569_v7 = vld [vmem:[#allocation5 + $0x160] ss:$8 sps:$4 sm:$0xff]   ;;  %v4572_v9 = vld [vmem:[#allocation5 + $0x50] ss:$8 sps:$4 sm:$0xff]   ;;  %v4573_v10 = vld [vmem:[#allocation5 + $0x154] ss:$8 sps:$4 sm:$0xff]  }
  0x6e   : > { %1288 = vmatprep.subr.bf16.mxu1 %v4567_v6  ;;  %v4576_v11 = vld [vmem:[#allocation5 + $0x44] ss:$8 sps:$4 sm:$0xff]   ;;  %v4575_v12 = vld [vmem:[#allocation5 + $0x150] ss:$8 sps:$4 sm:$0xff]   ;;  %v4578_v14 = vld [vmem:[#allocation5 + $0x40] ss:$8 sps:$4 sm:$0xff]  }
  0x6f   : > { %v4579_v13 = vld [vmem:[#allocation5 + $0x144] ss:$8 sps:$4 sm:$0xff]   ;;  %v4582_v15 = vld [vmem:[#allocation5 + $0x34] ss:$8 sps:$4 sm:$0xff]   ;;  %v4581_v16 = vld [vmem:[#allocation5 + $0x140] ss:$8 sps:$4 sm:$0xff]  }
  0x70   : > { %936 = vmatpush1.bf16.msra.mxu0 %v4566_v5  ;;  %v4585_v17 = vld [vmem:[#allocation5 + $0x134] ss:$8 sps:$4 sm:$0xff]   ;;  %v4584_v18 = vld [vmem:[#allocation5 + $0x30] ss:$8 sps:$4 sm:$0xff]   ;;  %v4588_v19 = vld [vmem:[#allocation5 + $0x24] ss:$8 sps:$4 sm:$0xff]  }
  0x71   : > { %937 = vmatprep.subr.bf16.mxu0 %v4570_v8  ;;  %1289 = vmatpush1.bf16.msra.mxu1 %v4569_v7  ;;  %v4587_v20 = vld [vmem:[#allocation5 + $0x130] ss:$8 sps:$4 sm:$0xff]   ;;  %v4591_v21 = vld [vmem:[#allocation5 + $0x124] ss:$8 sps:$4 sm:$0xff]   ;;  %v4590_v22 = vld [vmem:[#allocation5 + $0x20] ss:$8 sps:$4 sm:$0xff]  }
  0x72   : > { %1290 = vmatprep.subr.bf16.mxu1 %v4573_v10  ;;  %v4594_v23 = vld [vmem:[#allocation5 + $0x14] ss:$8 sps:$4 sm:$0xff]   ;;  %v4593_v24 = vld [vmem:[#allocation5 + $0x120] ss:$8 sps:$4 sm:$0xff]   ;;  %v4596_v26 = vld [vmem:[#allocation5 + $0x10] ss:$8 sps:$4 sm:$0xff]  }
  0x73   : > { %v4597_v25 = vld [vmem:[#allocation5 + $0x114] ss:$8 sps:$4 sm:$0xff]   ;;  %v4600_v27 = vld [vmem:[#allocation5 + $0x4] ss:$8 sps:$4 sm:$0xff]   ;;  %v4599_v28 = vld [vmem:[#allocation5 + $0x110] ss:$8 sps:$4 sm:$0xff]  }
  0x74   : > { %938 = vmatpush1.bf16.msra.mxu0 %v4572_v9  ;;  %v4603_v29 = vld [vmem:[#allocation5 + $0x104] ss:$8 sps:$4 sm:$0xff]   ;;  %v4602_v30 = vld [vmem:[#allocation5] ss:$8 sps:$4 sm:$0xff]   ;;  %v4606_v31 = vld [vmem:[#allocation5 + $0xf4] ss:$8 sps:$4 sm:$0xff]  }
  0x75   : > { %939 = vmatprep.subr.bf16.mxu0 %v4576_v11  ;;  %1291 = vmatpush1.bf16.msra.mxu1 %v4575_v12  ;;  %v4605_v32 = vld [vmem:[#allocation5 + $0x100] ss:$8 sps:$4 sm:$0xff]   ;;  %v4609_v33 = vld [vmem:[#allocation5 + $0x1f4] ss:$8 sps:$4 sm:$0xff]   ;;  %v4608_v34 = vld [vmem:[#allocation5 + $0xf0] ss:$8 sps:$4 sm:$0xff]  }
  0x76   : > { %1292 = vmatprep.subr.bf16.mxu1 %v4579_v13  ;;  %v4612_v35 = vld [vmem:[#allocation5 + $0xe4] ss:$8 sps:$4 sm:$0xff]   ;;  %v4611_v36 = vld [vmem:[#allocation5 + $0x1f0] ss:$8 sps:$4 sm:$0xff]   ;;  %v4614_v38 = vld [vmem:[#allocation5 + $0xe0] ss:$8 sps:$4 sm:$0xff]  }
  0x77   : > { %v4615_v37 = vld [vmem:[#allocation5 + $0x1e4] ss:$8 sps:$4 sm:$0xff]   ;;  %v4618_v39 = vld [vmem:[#allocation5 + $0xd4] ss:$8 sps:$4 sm:$0xff]   ;;  %v4617_v40 = vld [vmem:[#allocation5 + $0x1e0] ss:$8 sps:$4 sm:$0xff]  }
  0x78   : > { %940 = vmatpush1.bf16.msra.mxu0 %v4578_v14  ;;  %v4621_v41 = vld [vmem:[#allocation5 + $0x1d4] ss:$8 sps:$4 sm:$0xff]   ;;  %v4620_v42 = vld [vmem:[#allocation5 + $0xd0] ss:$8 sps:$4 sm:$0xff]   ;;  %v4624_v43 = vld [vmem:[#allocation5 + $0xc4] ss:$8 sps:$4 sm:$0xff]  }
  0x79   : > { %941 = vmatprep.subr.bf16.mxu0 %v4582_v15  ;;  %1293 = vmatpush1.bf16.msra.mxu1 %v4581_v16  ;;  %v4623_v44 = vld [vmem:[#allocation5 + $0x1d0] ss:$8 sps:$4 sm:$0xff]   ;;  %v4627_v45 = vld [vmem:[#allocation5 + $0x1c4] ss:$8 sps:$4 sm:$0xff]   ;;  %v4626_v47 = vld [vmem:[#allocation5 + $0xc0] ss:$8 sps:$4 sm:$0xff]  }
  0x7a   : > { %1294 = vmatprep.subr.bf16.mxu1 %v4585_v17  ;;  %v346_v46 = vld [vmem:[%s5348_s29 + $0x8] sm:$0xff]  ;;  %v4630_v49 = vld [vmem:[#allocation5 + $0xb4] ss:$8 sps:$4 sm:$0xff]   ;;  %v4632_v54 = vld [vmem:[#allocation5 + $0xb0] ss:$8 sps:$4 sm:$0xff]   ;;  %s4031_s19 = sshll.u32 %s5344_s16, 8 }
  0x7b   : > { %v410_v48 = vunpack.c.l.s8.bf16 %v346_v46  ;;  %v348_v50 = vld [vmem:[%s5348_s29 + $0x18] sm:$0xff]  ;;  %v4629_v51 = vld [vmem:[#allocation5 + $0x1c0] ss:$8 sps:$4 sm:$0xff]   ;;  %v4636_v55 = vld [vmem:[#allocation5 + $0xa4] ss:$8 sps:$4 sm:$0xff]   ;;  %v414_v8 = vunpack.c.h.s8.bf16 %v346_v46  ;;  %s6914_s18 = scalar_lea.vmem [#allocation10], %s4031_s19 }
  0x7c   : > { %942 = vmatpush1.bf16.msra.mxu0 %v4584_v18  ;;  %v412_v52 = vunpack.c.l.s8.bf16 %v348_v50  ;;  %v4633_v53 = vld [vmem:[#allocation5 + $0x1b4] ss:$8 sps:$4 sm:$0xff]   ;;  %v4635_v56 = vld [vmem:[#allocation5 + $0x1b0] ss:$8 sps:$4 sm:$0xff]   ;;  %v4639_v57 = vld [vmem:[#allocation5 + $0x1a4] ss:$8 sps:$4 sm:$0xff]   ;;  %v416_v12 = vunpack.c.h.s8.bf16 %v348_v50 }
  0x7d   : > { %943 = vmatprep.subr.bf16.mxu0 %v4588_v19  ;;  %1295 = vmatpush1.bf16.msra.mxu1 %v4587_v20  ;;  %v4638_v58 = vld [vmem:[#allocation5 + $0xa0] ss:$8 sps:$4 sm:$0xff]   ;;  %v4642_v59 = vld [vmem:[#allocation5 + $0x94] ss:$8 sps:$4 sm:$0xff]   ;;  %v4644_v62 = vld [vmem:[#allocation5 + $0x90] ss:$8 sps:$4 sm:$0xff]  }
  0x7e   : > { %1296 = vmatprep.subr.bf16.mxu1 %v4591_v21  ;;  %965 = vmatprep.mubr.bf16.mxu0 %v410_v48  ;;  %v4641_v60 = vld [vmem:[#allocation5 + $0x1a0] ss:$8 sps:$4 sm:$0xff]   ;;  %v4645_v61 = vld [vmem:[#allocation5 + $0x194] ss:$8 sps:$4 sm:$0xff]   ;;  %v4648_v63 = vld [vmem:[#allocation5 + $0x84] ss:$8 sps:$4 sm:$0xff]  }
  0x7f   : > { %1318 = vmatprep.mubr.bf16.mxu1 %v412_v52  ;;  %v4647_v0 = vld [vmem:[#allocation5 + $0x190] ss:$8 sps:$4 sm:$0xff]   ;;  %v4650_v1 = vld [vmem:[#allocation5 + $0x80] ss:$8 sps:$4 sm:$0xff]   ;;  %v4651_v2 = vld [vmem:[#allocation5 + $0x184] ss:$8 sps:$4 sm:$0xff]  }
  0x80   : > { %944 = vmatpush1.bf16.msra.mxu0 %v4590_v22  ;;  %v345_v3 = vld [vmem:[%s5348_s29] sm:$0xff]  ;;  %v4656_v4 = vld [vmem:[#allocation7 + $0x74] ss:$8 sps:$4 sm:$0xff]   ;;  %v4654_v9 = vld [vmem:[#allocation7 + $0x70] ss:$8 sps:$4 sm:$0xff]   ;;  %s4280_s22 = sshll.u32 %s5230_s28, 12 }
  0x81   : > { %945 = vmatprep.subr.bf16.mxu0 %v4594_v23  ;;  %1297 = vmatpush1.bf16.msra.mxu1 %v4593_v24  ;;  %v4653_v5 = vld [vmem:[#allocation5 + $0x180] ss:$8 sps:$4 sm:$0xff]   ;;  %v347_v6 = vld [vmem:[%s5348_s29 + $0x10] sm:$0xff]  ;;  %v409_v7 = vunpack.c.l.s8.bf16 %v345_v3  ;;  %v4659_v11 = vld [vmem:[#allocation7 + $0x64] ss:$8 sps:$4 sm:$0xff]   ;;  %v413_v18 = vunpack.c.h.s8.bf16 %v345_v3  ;;  %s3914_s1 = sshll.u32 %s6914_s18, 4  ;;  %s7102_s30 = scalar_lea.hbm %s7155_s7, %s4280_s22  ;;  %s7104_s1 = int_to_ptr.vmem [resolvable:$true] %s3914_s1 }
  0x82   : > { %1298 = vmatprep.subr.bf16.mxu1 %v4597_v25  ;;  %v411_v10 = vunpack.c.l.s8.bf16 %v347_v6  ;;  %v350_v13 = vld [vmem:[%s5348_s29 + $0x28] sm:$0xff]  ;;  %v4662_v15 = vld [vmem:[#allocation7 + $0x54] ss:$8 sps:$4 sm:$0xff]   ;;  %v4660_v17 = vld [vmem:[#allocation7 + $0x50] ss:$8 sps:$4 sm:$0xff]   ;;  %v415_v21 = vunpack.c.h.s8.bf16 %v347_v6  ;;  %s3901_s9 = scalar_lea.sflag [#allocation4], %s5344_s16 }
  0x83   : > { %v4657_v14 = vld [vmem:[#allocation7 + $0x60] ss:$8 sps:$4 sm:$0xff]   ;;  %v352_v16 = vld [vmem:[%s5348_s29 + $0x38] sm:$0xff]  ;;  %v4665_v19 = vld [vmem:[#allocation7 + $0x44] ss:$8 sps:$4 sm:$0xff]   ;;  %v418_v20 = vunpack.c.l.s8.bf16 %v350_v13  ;;  %s5081_s28 = scalar_lea.vmem %s7104_s1, 4096 }
  0x84   : > { %946 = vmatpush1.bf16.msra.mxu0 %v4596_v26  ;;  %v349_v22 = vld [vmem:[%s5348_s29 + $0x20] sm:$0xff]  ;;  %v420_v23 = vunpack.c.l.s8.bf16 %v352_v16  ;;  %v351_v25 = vld [vmem:[%s5348_s29 + $0x30] sm:$0xff]  ;;  %v362_v6 = vld [vmem:[%s5348_s29 + $0x88] sm:$0xff]  ;;  %p5082_p4 = scmp.ne.s32.totalorder %s7104_s1, %s5081_s28  ;;  %p7236_p6 = scmp.ne.s32.totalorder %s7183_s21, 0 }
  0x85   : > { %947 = vmatprep.subr.bf16.mxu0 %v4600_v27  ;;  %1299 = vmatpush1.bf16.msra.mxu1 %v4599_v28  ;;  %v4663_v24 = vld [vmem:[#allocation7 + $0x40] ss:$8 sps:$4 sm:$0xff]   ;;  %v4668_v26 = vld [vmem:[#allocation7 + $0x34] ss:$8 sps:$4 sm:$0xff]   ;;  %v4666_v27 = vld [vmem:[#allocation7 + $0x30] ss:$8 sps:$4 sm:$0xff]   ;;  %v417_v28 = vunpack.c.l.s8.bf16 %v349_v22 }
  0x86   : > { %1300 = vmatprep.subr.bf16.mxu1 %v4603_v29  ;;  %v422_v29 = vunpack.c.h.s8.bf16 %v350_v13  ;;  %v355_v46 = vld [vmem:[%s5348_s29 + $0x50] sm:$0xff]  ;;  %p5083_p12 = pnand %p5082_p4, %p7236_p6  ;;  %s5166_s10 = smov [#allocation10]  }
  0x87   : > { %v427_v50 = vunpack.c.l.s8.bf16 %v355_v46  ;;  %v363_v13 = vld [vmem:[%s5348_s29 + $0x90] sm:$0xff]  ;;  %s5085_s13 = sshll.u32 %s5166_s10, 4  ;;  %s5086_s13 = int_to_ptr.vmem [resolvable:$false] %s5085_s13 }
  0x88   : > { %948 = vmatpush1.bf16.msra.mxu0 %v4602_v30  ;;  %v419_v30 = vunpack.c.l.s8.bf16 %v351_v25  ;;  %p5084_p0 = pneg %p5083_p12  ;;  %s5087_s14 = scalar_lea.vmem %s5086_s13, 8192 }
  0x89   : > { %949 = vmatprep.subr.bf16.mxu0 %v4606_v31  ;;  %1301 = vmatpush1.bf16.msra.mxu1 %v4605_v32  ;;  %v4671_v31 = vld [vmem:[#allocation7 + $0x24] ss:$8 sps:$4 sm:$0xff]   ;;  %v424_v32 = vunpack.c.h.s8.bf16 %v352_v16  ;;  %v443_v16 = vunpack.c.l.s8.bf16 %v363_v13  ;;  %p5088_p5 = scmp.lt.s32.totalorder %s7104_s1, %s5086_s13  ;;  %p5089_p3 = scmp.lt.s32.totalorder %s5087_s14, %s5081_s28 }
  0x8a   : > { %1302 = vmatprep.subr.bf16.mxu1 %v4609_v33  ;;  %v4669_v33 = vld [vmem:[#allocation7 + $0x20] ss:$8 sps:$4 sm:$0xff]  }
  0x8b   : > { %p5090_p7 = por %p5089_p3, %p5088_p5 }
  0x8c   : > { %950 = vmatpush2.bf16.msra.mxu0 %v4608_v34  ;;  %v354_v34 = vld [vmem:[%s5348_s29 + $0x48] sm:$0xff] }
  0x8d   : > { %951 = vmatprep.subr.bf16.mxu0 %v4612_v35  ;;  %1303 = vmatpush2.bf16.msra.mxu1 %v4611_v36  ;;  %v4674_v35 = vld [vmem:[#allocation7 + $0x14] ss:$8 sps:$4 sm:$0xff]   ;;  %v421_v36 = vunpack.c.h.s8.bf16 %v349_v22  ;;  %v430_v48 = vunpack.c.h.s8.bf16 %v354_v34  ;;  %p5091_p9 = pnand %p5090_p7, %p5084_p0 }
  0x8e   : > { %1304 = vmatprep.subr.bf16.mxu1 %v4615_v37  ;;  %v356_v37 = vld [vmem:[%s5348_s29 + $0x58] sm:$0xff] }
  0x8f   : > { %v432_v52 = vunpack.c.h.s8.bf16 %v356_v37  ;;  %v368_v22 = vld [vmem:[%s5348_s29 + $0xb8] sm:$0xff] }
  0x90   : > { %952 = vmatpush2.bf16.msra.mxu0 %v4614_v38  ;;  %v426_v38 = vunpack.c.l.s8.bf16 %v354_v34  ;;  %v4694_v34 = vld [vmem:[#allocation7 + $0xa0] ss:$8 sps:$4 sm:$0xff]  }
  0x91   : > { %953 = vmatprep.subr.bf16.mxu0 %v4618_v39  ;;  %1305 = vmatpush2.bf16.msra.mxu1 %v4617_v40  ;;  %v4672_v39 = vld [vmem:[#allocation7 + $0x10] ss:$8 sps:$4 sm:$0xff]   ;;  %v423_v40 = vunpack.c.h.s8.bf16 %v351_v25  ;;  %v452_v25 = vunpack.c.l.s8.bf16 %v368_v22 }
  0x92   : > { %1306 = vmatprep.subr.bf16.mxu1 %v4621_v41  ;;  %v4677_v41 = vld [vmem:[#allocation7 + $0x4] ss:$8 sps:$4 sm:$0xff]  }
  0x94   : > { %954 = vmatpush2.bf16.msra.mxu0 %v4620_v42  ;;  %v428_v42 = vunpack.c.l.s8.bf16 %v356_v37  ;;  %v372_v37 = vld [vmem:[%s5348_s29 + $0xd8] sm:$0xff] }
  0x95   : > { %955 = vmatprep.subr.bf16.mxu0 %v4624_v43  ;;  %1307 = vmatpush2.bf16.msra.mxu1 %v4623_v44  ;;  %v353_v43 = vld [vmem:[%s5348_s29 + $0x40] sm:$0xff] }
  0x96   : > { %1308 = vmatprep.subr.bf16.mxu1 %v4627_v45  ;;  %v4675_v44 = vld [vmem:[#allocation7] ss:$8 sps:$4 sm:$0xff]   ;;  %v4680_v45 = vld [vmem:[#allocation7 + $0xf4] ss:$8 sps:$4 sm:$0xff]  }
  0x98   : > { %956 = vmatpush2.bf16.msra.mxu0 %v4626_v47  ;;  %v425_v47 = vunpack.c.l.s8.bf16 %v353_v43 }
  0x99   : > { %957 = vmatprep.subr.bf16.mxu0 %v4630_v49  ;;  %1309 = vmatpush2.bf16.msra.mxu1 %v4629_v51  ;;  %v4678_v49 = vld [vmem:[#allocation7 + $0xf0] ss:$8 sps:$4 sm:$0xff]   ;;  %v4683_v51 = vld [vmem:[#allocation7 + $0xe4] ss:$8 sps:$4 sm:$0xff]  }
  0x9a   : > { %1310 = vmatprep.subr.bf16.mxu1 %v4633_v53  ;;  %v4681_v53 = vld [vmem:[#allocation7 + $0xe0] ss:$8 sps:$4 sm:$0xff]  }
  0x9c   : > { %958 = vmatpush2.bf16.msra.mxu0 %v4632_v54  ;;  %v358_v54 = vld [vmem:[%s5348_s29 + $0x68] sm:$0xff] }
  0x9d   : > { %959 = vmatprep.subr.bf16.mxu0 %v4636_v55  ;;  %1311 = vmatpush2.bf16.msra.mxu1 %v4635_v56  ;;  %v4686_v55 = vld [vmem:[#allocation7 + $0xd4] ss:$8 sps:$4 sm:$0xff]   ;;  %v429_v56 = vunpack.c.h.s8.bf16 %v353_v43 }
  0x9e   : > { %1312 = vmatprep.subr.bf16.mxu1 %v4639_v57  ;;  %v360_v57 = vld [vmem:[%s5348_s29 + $0x78] sm:$0xff]  ;;  %v371_v43 = vld [vmem:[%s5348_s29 + $0xd0] sm:$0xff] }
  0x9f   : > { %v440_v3 = vunpack.c.h.s8.bf16 %v360_v57 }
  0xa0   : > { %960 = vmatpush2.bf16.msra.mxu0 %v4638_v58  ;;  %v434_v58 = vunpack.c.l.s8.bf16 %v358_v54 }
  0xa1   : > { %961 = vmatprep.subr.bf16.mxu0 %v4642_v59  ;;  %1313 = vmatpush2.bf16.msra.mxu1 %v4641_v60  ;;  %v4684_v59 = vld [vmem:[#allocation7 + $0xd0] ss:$8 sps:$4 sm:$0xff]   ;;  %v431_v60 = vunpack.c.h.s8.bf16 %v355_v46  ;;  %v459_v46 = vunpack.c.l.s8.bf16 %v371_v43 }
  0xa2   : > { %1314 = vmatprep.subr.bf16.mxu1 %v4645_v61  ;;  %v436_v61 = vunpack.c.l.s8.bf16 %v360_v57  ;;  %v373_v57 = vld [vmem:[%s5348_s29 + $0xe0] sm:$0xff] }
  0xa4   : > { %962 = vmatpush2.bf16.msra.mxu0 %v4644_v62  ;;  %v357_v62 = vld [vmem:[%s5348_s29 + $0x60] sm:$0xff] }
  0xa5   : > { %963 = vmatprep.subr.bf16.mxu0 %v4648_v63  ;;  %1315 = vmatpush2.bf16.msra.mxu1 %v4647_v0  ;;  %v359_v63 = vld [vmem:[%s5348_s29 + $0x70] sm:$0xff]  ;;  %v433_v0 = vunpack.c.l.s8.bf16 %v357_v62 }
  0xa6   : > { %1316 = vmatprep.subr.bf16.mxu1 %v4651_v2  ;;  %v435_v2 = vunpack.c.l.s8.bf16 %v359_v63 }
  0xa8   : > { %964 = vmatpush2.bf16.msra.mxu0 %v4650_v1  ;;  %v438_v1 = vunpack.c.h.s8.bf16 %v358_v54 }
  0xa9   : > { %2035 = vmatprep.subr.bf16.mxu0 %v4656_v4  ;;  %1317 = vmatpush2.bf16.msra.mxu1 %v4653_v5  ;;  %v4687_v4 = vld [vmem:[#allocation7 + $0xc0] ss:$8 sps:$4 sm:$0xff]   ;;  %v4689_v5 = vld [vmem:[#allocation7 + $0xc4] ss:$8 sps:$4 sm:$0xff]  }
  0xab   : > { %966 = vmatmul.mubr.bf16.vlgmr.msra.gmra.mxu0 %v409_v7  ;;  %v437_v7 = vunpack.c.h.s8.bf16 %v357_v62 }
  0xac   : > { %2036 = vmatpush1.bf16.msra.mxu0 %v4654_v9  ;;  %975 = vmatprep.mubr.bf16.mxu0 %v414_v8  ;;  %v364_v8 = vld [vmem:[%s5348_s29 + $0x98] sm:$0xff]  ;;  %v442_v9 = vunpack.c.l.s8.bf16 %v362_v6 }
  0xad   : > { %1319 = vmatmul.mubr.bf16.vlgmr.msra.gmra.mxu1 %v411_v10  ;;  %2037 = vmatprep.subr.bf16.mxu0 %v4659_v11  ;;  %v439_v10 = vunpack.c.h.s8.bf16 %v359_v63  ;;  %v444_v11 = vunpack.c.l.s8.bf16 %v364_v8  ;;  %v378_v63 = vld [vmem:[%s5348_s29 + $0x108] sm:$0xff] }
  0xae   : > { %1328 = vmatprep.mubr.bf16.mxu1 %v416_v12  ;;  %v361_v12 = vld [vmem:[%s5348_s29 + $0x80] sm:$0xff] }
  0xb0   : > { %2038 = vmatpush1.bf16.msra.mxu0 %v4657_v14  ;;  %v441_v14 = vunpack.c.l.s8.bf16 %v361_v12 }
  0xb1   : > { %2039 = vmatprep.subr.bf16.mxu0 %v4662_v15  ;;  %v446_v15 = vunpack.c.h.s8.bf16 %v362_v6 }
  0xb3   : > { %976 = vmatmul.mubr.bf16.gmra.mxu0 %v413_v18  ;;  %v4690_v18 = vld [vmem:[#allocation7 + $0xb0] ss:$8 sps:$4 sm:$0xff]  }
  0xb4   : > { %985 = vmatprep.mubr.bf16.mxu0 %v418_v20  ;;  %2040 = vmatpush1.bf16.msra.mxu0 %v4660_v17  ;;  %v448_v17 = vunpack.c.h.s8.bf16 %v364_v8  ;;  %v366_v20 = vld [vmem:[%s5348_s29 + $0xa8] sm:$0xff]  ;;  %v377_v8 = vld [vmem:[%s5348_s29 + $0x100] sm:$0xff] }
  0xb5   : > { %1329 = vmatmul.mubr.bf16.gmra.mxu1 %v415_v21  ;;  %2041 = vmatprep.subr.bf16.mxu0 %v4665_v19  ;;  %v4692_v19 = vld [vmem:[#allocation7 + $0xb4] ss:$8 sps:$4 sm:$0xff]   ;;  %v445_v21 = vunpack.c.h.s8.bf16 %v361_v12 }
  0xb6   : > { %1338 = vmatprep.mubr.bf16.mxu1 %v420_v23  ;;  %v450_v23 = vunpack.c.l.s8.bf16 %v366_v20 }
  0xb8   : > { %2042 = vmatpush1.bf16.msra.mxu0 %v4663_v24  ;;  %v447_v24 = vunpack.c.h.s8.bf16 %v363_v13 }
  0xb9   : > { %2043 = vmatprep.subr.bf16.mxu0 %v4668_v26  ;;  %v365_v26 = vld [vmem:[%s5348_s29 + $0xa0] sm:$0xff] }
  0xbb   : > { %986 = vmatmul.mubr.bf16.gmra.mxu0 %v417_v28  ;;  %v449_v28 = vunpack.c.l.s8.bf16 %v365_v26 }
  0xbc   : > { %995 = vmatprep.mubr.bf16.mxu0 %v422_v29  ;;  %2044 = vmatpush1.bf16.msra.mxu0 %v4666_v27  ;;  %v367_v27 = vld [vmem:[%s5348_s29 + $0xb0] sm:$0xff]  ;;  %v454_v29 = vunpack.c.h.s8.bf16 %v366_v20 }
  0xbd   : > { %1339 = vmatmul.mubr.bf16.gmra.mxu1 %v419_v30  ;;  %2045 = vmatprep.subr.bf16.mxu0 %v4671_v31  ;;  %v451_v30 = vunpack.c.l.s8.bf16 %v367_v27  ;;  %v456_v31 = vunpack.c.h.s8.bf16 %v368_v22  ;;  %v383_v22 = vld [vmem:[%s5348_s29 + $0x130] sm:$0xff] }
  0xbe   : > { %1348 = vmatprep.mubr.bf16.mxu1 %v424_v32  ;;  %v370_v32 = vld [vmem:[%s5348_s29 + $0xc8] sm:$0xff] }
  0xc0   : > { %2046 = vmatpush1.bf16.msra.mxu0 %v4669_v33  ;;  %v4693_v33 = vld [vmem:[#allocation8 + $0x38] sm:$0xff]  }
  0xc1   : > { %2047 = vmatprep.subr.bf16.mxu0 %v4674_v35  ;;  %v4696_v35 = vld [vmem:[#allocation7 + $0xa4] ss:$8 sps:$4 sm:$0xff]  }
  0xc3   : > { %996 = vmatmul.mubr.bf16.gmra.mxu0 %v421_v36  ;;  %v453_v36 = vunpack.c.h.s8.bf16 %v365_v26 }
  0xc4   : > { %1005 = vmatprep.mubr.bf16.mxu0 %v426_v38  ;;  %2048 = vmatpush1.bf16.msra.mxu0 %v4672_v39  ;;  %v7161_v38 = vmov 0   ;;  %v458_v39 = vunpack.c.l.s8.bf16 %v370_v32 }
  0xc5   : > { %1349 = vmatmul.mubr.bf16.gmra.mxu1 %v423_v40  ;;  %2049 = vmatprep.subr.bf16.mxu0 %v4677_v41  ;;  %v455_v40 = vunpack.c.h.s8.bf16 %v367_v27  ;;  %v460_v41 = vunpack.c.l.s8.bf16 %v372_v37  ;;  %v386_v27 = vld [vmem:[%s5348_s29 + $0x148] sm:$0xff] }
  0xc6   : > { %1358 = vmatprep.mubr.bf16.mxu1 %v428_v42  ;;  %2715 = vmatprep.subr.bf16.mxu1 %v7161_v38  ;;  %v369_v42 = vld [vmem:[%s5348_s29 + $0xc0] sm:$0xff] }
  0xc7   : > { %2716 = vmatpush1.bf16.msra.mxu1 %v4693_v33 }
  0xc8   : > { %2050 = vmatpush1.bf16.msra.mxu0 %v4675_v44  ;;  %2717 = vmatprep.subr.bf16.mxu1 %v7161_v38  ;;  %v457_v44 = vunpack.c.l.s8.bf16 %v369_v42 }
  0xc9   : > { %2051 = vmatprep.subr.bf16.mxu0 %v4680_v45  ;;  %v462_v45 = vunpack.c.h.s8.bf16 %v370_v32  ;;  %v487_v32 = vunpack.c.h.s8.bf16 %v383_v22 }
  0xcb   : > { %1006 = vmatmul.mubr.bf16.gmra.mxu0 %v425_v47  ;;  %v464_v47 = vunpack.c.h.s8.bf16 %v372_v37  ;;  %v494_v37 = vunpack.c.h.s8.bf16 %v386_v27 }
  0xcc   : > { %1015 = vmatprep.mubr.bf16.mxu0 %v430_v48  ;;  %2052 = vmatpush2.bf16.msra.mxu0 %v4678_v49  ;;  %v374_v48 = vld [vmem:[%s5348_s29 + $0xe8] sm:$0xff]  ;;  %v4697_v49 = vld [vmem:[#allocation8 + $0x30] sm:$0xff]  }
  0xcd   : > { %1359 = vmatmul.mubr.bf16.gmra.mxu1 %v427_v50  ;;  %2053 = vmatprep.subr.bf16.mxu0 %v4683_v51  ;;  %v4698_v50 = vld [vmem:[#allocation7 + $0x90] ss:$8 sps:$4 sm:$0xff]   ;;  %v4700_v51 = vld [vmem:[#allocation7 + $0x94] ss:$8 sps:$4 sm:$0xff]   ;;  %v466_v54 = vunpack.c.l.s8.bf16 %v374_v48 }
  0xce   : > { %1368 = vmatprep.mubr.bf16.mxu1 %v432_v52  ;;  %v461_v52 = vunpack.c.h.s8.bf16 %v369_v42  ;;  %2718 = vmatpush1.bf16.msra.mxu1 %v4697_v49  ;;  %v4707_v42 = vld [vmem:[#allocation8 + $0x10] sm:$0xff]  }
  0xcf   : > { %2719 = vmatprep.subr.bf16.mxu1 %v7161_v38  ;;  %v391_v49 = vld [vmem:[%s5348_s29 + $0x170] sm:$0xff] }
  0xd0   : > { %2054 = vmatpush2.bf16.msra.mxu0 %v4681_v53  ;;  %v376_v53 = vld [vmem:[%s5348_s29 + $0xf8] sm:$0xff] }
  0xd1   : > { %2055 = vmatprep.subr.bf16.mxu0 %v4686_v55  ;;  %v463_v55 = vunpack.c.h.s8.bf16 %v371_v43  ;;  %v472_v62 = vunpack.c.h.s8.bf16 %v376_v53 }
  0xd3   : > { %1016 = vmatmul.mubr.bf16.gmra.mxu0 %v429_v56  ;;  %v468_v56 = vunpack.c.l.s8.bf16 %v376_v53 }
  0xd4   : > { %1025 = vmatprep.mubr.bf16.mxu0 %v434_v58  ;;  %2056 = vmatpush2.bf16.msra.mxu0 %v4684_v59  ;;  %v375_v58 = vld [vmem:[%s5348_s29 + $0xf0] sm:$0xff]  ;;  %v465_v59 = vunpack.c.l.s8.bf16 %v373_v57 }
  0xd5   : > { %1369 = vmatmul.mubr.bf16.gmra.mxu1 %v431_v60  ;;  %2057 = vmatprep.subr.bf16.mxu0 %v4689_v5  ;;  %v470_v60 = vunpack.c.h.s8.bf16 %v374_v48  ;;  %v474_v5 = vunpack.c.l.s8.bf16 %v378_v63  ;;  %v471_v6 = vunpack.c.h.s8.bf16 %v375_v58  ;;  %v389_v48 = vld [vmem:[%s5348_s29 + $0x160] sm:$0xff] }
  0xd6   : > { %1378 = vmatprep.mubr.bf16.mxu1 %v436_v61  ;;  %v467_v61 = vunpack.c.l.s8.bf16 %v375_v58 }
  0xd8   : > { %2058 = vmatpush2.bf16.msra.mxu0 %v4687_v4  ;;  %v380_v4 = vld [vmem:[%s5348_s29 + $0x118] sm:$0xff] }
  0xd9   : > { %2059 = vmatprep.subr.bf16.mxu0 %v4692_v19  ;;  %v480_v13 = vunpack.c.h.s8.bf16 %v380_v4 }
  0xdb   : > { %1026 = vmatmul.mubr.bf16.gmra.mxu0 %v433_v0  ;;  %v4701_v0 = vld [vmem:[#allocation8 + $0x28] sm:$0xff]  }
  0xdc   : > { %1035 = vmatprep.mubr.bf16.mxu0 %v438_v1  ;;  %2060 = vmatpush2.bf16.msra.mxu0 %v4690_v18  ;;  %v4702_v1 = vld [vmem:[#allocation7 + $0x80] ss:$8 sps:$4 sm:$0xff]  }
  0xdd   : > { %1379 = vmatmul.mubr.bf16.gmra.mxu1 %v435_v2  ;;  %2061 = vmatprep.subr.bf16.mxu0 %v4696_v35  ;;  %v4704_v2 = vld [vmem:[#allocation7 + $0x84] ss:$8 sps:$4 sm:$0xff]   ;;  %v387_v35 = vld [vmem:[%s5348_s29 + $0x150] sm:$0xff] }
  0xde   : > { %1388 = vmatprep.mubr.bf16.mxu1 %v440_v3  ;;  %v469_v3 = vunpack.c.h.s8.bf16 %v373_v57  ;;  %2720 = vmatpush1.bf16.msra.mxu1 %v4701_v0  ;;  %v396_v57 = vld [vmem:[%s5348_s29 + $0x198] sm:$0xff] }
  0xdf   : > { %2721 = vmatprep.subr.bf16.mxu1 %v7161_v38 }
  0xe0   : > { %2062 = vmatpush2.bf16.msra.mxu0 %v4694_v34  ;;  %v385_v34 = vld [vmem:[%s5348_s29 + $0x140] sm:$0xff] }
  0xe1   : > { %2063 = vmatprep.subr.bf16.mxu0 %v4700_v51  ;;  %v493_v43 = vunpack.c.h.s8.bf16 %v385_v34 }
  0xe3   : > { %1036 = vmatmul.mubr.bf16.gmra.mxu0 %v437_v7  ;;  %v476_v7 = vunpack.c.l.s8.bf16 %v380_v4 }
  0xe4   : > { %1045 = vmatprep.mubr.bf16.mxu0 %v442_v9  ;;  %2064 = vmatpush2.bf16.msra.mxu0 %v4698_v50  ;;  %v379_v9 = vld [vmem:[%s5348_s29 + $0x110] sm:$0xff]  ;;  %v497_v50 = vunpack.c.l.s8.bf16 %v389_v48 }
  0xe5   : > { %1389 = vmatmul.mubr.bf16.gmra.mxu1 %v439_v10  ;;  %2065 = vmatprep.subr.bf16.mxu0 %v4704_v2  ;;  %v473_v10 = vunpack.c.l.s8.bf16 %v377_v8  ;;  %v475_v12 = vunpack.c.l.s8.bf16 %v379_v9  ;;  %v479_v19 = vunpack.c.h.s8.bf16 %v379_v9  ;;  %v512_v2 = vunpack.c.h.s8.bf16 %v396_v57 }
  0xe6   : > { %1398 = vmatprep.mubr.bf16.mxu1 %v444_v11  ;;  %v478_v11 = vunpack.c.h.s8.bf16 %v378_v63 }
  0xe8   : > { %2066 = vmatpush2.bf16.msra.mxu0 %v4702_v1 }
  0xeb   : > { %1046 = vmatmul.mubr.bf16.gmra.mxu0 %v441_v14  ;;  %v382_v14 = vld [vmem:[%s5348_s29 + $0x128] sm:$0xff] }
  0xec   : > { %1055 = vmatprep.mubr.bf16.mxu0 %v446_v15  ;;  %v4705_v15 = vld [vmem:[#allocation8 + $0x20] sm:$0xff]   ;;  %v482_v18 = vunpack.c.l.s8.bf16 %v382_v14 }
  0xed   : > { %1399 = vmatmul.mubr.bf16.gmra.mxu1 %v443_v16  ;;  %v477_v16 = vunpack.c.h.s8.bf16 %v377_v8 }
  0xee   : > { %1408 = vmatprep.mubr.bf16.mxu1 %v448_v17  ;;  %v384_v17 = vld [vmem:[%s5348_s29 + $0x138] sm:$0xff]  ;;  %2722 = vmatpush1.bf16.msra.mxu1 %v4705_v15 }
  0xef   : > { %2723 = vmatprep.subr.bf16.mxu1 %v7161_v38  ;;  %v484_v20 = vunpack.c.l.s8.bf16 %v384_v17  ;;  %v488_v26 = vunpack.c.h.s8.bf16 %v384_v17 }
  0xf3   : > { %1056 = vmatmul.mubr.bf16.gmra.mxu0 %v445_v21  ;;  %v381_v21 = vld [vmem:[%s5348_s29 + $0x120] sm:$0xff] }
  0xf4   : > { %1065 = vmatprep.mubr.bf16.mxu0 %v450_v23  ;;  %v481_v23 = vunpack.c.l.s8.bf16 %v381_v21 }
  0xf5   : > { %1409 = vmatmul.mubr.bf16.gmra.mxu1 %v447_v24  ;;  %v486_v24 = vunpack.c.h.s8.bf16 %v382_v14 }
  0xf6   : > { %1418 = vmatprep.mubr.bf16.mxu1 %v452_v25  ;;  %v483_v25 = vunpack.c.l.s8.bf16 %v383_v22  ;;  %v399_v22 = vld [vmem:[%s5348_s29 + $0x1b0] sm:$0xff] }
  0xfb   : > { %1066 = vmatmul.mubr.bf16.gmra.mxu0 %v449_v28  ;;  %v4706_v28 = vld [vmem:[#allocation8 + $0x18] sm:$0xff]  }
  0xfc   : > { %1075 = vmatprep.mubr.bf16.mxu0 %v454_v29  ;;  %v485_v29 = vunpack.c.h.s8.bf16 %v381_v21  ;;  %2724 = vmatpush1.bf16.msra.mxu1 %v4706_v28 }
  0xfd   : > { %1419 = vmatmul.mubr.bf16.gmra.mxu1 %v451_v30  ;;  %v388_v30 = vld [vmem:[%s5348_s29 + $0x158] sm:$0xff]  ;;  %2725 = vmatprep.subr.bf16.mxu1 %v7161_v38 }
  0xfe   : > { %1428 = vmatprep.mubr.bf16.mxu1 %v456_v31  ;;  %v490_v31 = vunpack.c.l.s8.bf16 %v386_v27  ;;  %v492_v33 = vunpack.c.l.s8.bf16 %v388_v30 }
 0x100   : > { %2726 = vmatpush1.bf16.msra.mxu1 %v4707_v42 }
 0x101   : > { %2727 = vmatprep.subr.bf16.mxu1 %v7161_v38 }
 0x103   : > { %1076 = vmatmul.mubr.bf16.gmra.mxu0 %v453_v36  ;;  %v489_v36 = vunpack.c.l.s8.bf16 %v385_v34 }
 0x104   : > { %1085 = vmatprep.mubr.bf16.mxu0 %v458_v39  ;;  %v491_v39 = vunpack.c.l.s8.bf16 %v387_v35 }
 0x105   : > { %1429 = vmatmul.mubr.bf16.gmra.mxu1 %v455_v40  ;;  %v496_v40 = vunpack.c.h.s8.bf16 %v388_v30 }
 0x106   : > { %1438 = vmatprep.mubr.bf16.mxu1 %v460_v41  ;;  %v390_v41 = vld [vmem:[%s5348_s29 + $0x168] sm:$0xff] }
 0x107   : > { %v502_v51 = vunpack.c.h.s8.bf16 %v390_v41 }
 0x10b   : > { %1086 = vmatmul.mubr.bf16.gmra.mxu0 %v457_v44  ;;  %v392_v44 = vld [vmem:[%s5348_s29 + $0x178] sm:$0xff] }
 0x10c   : > { %1095 = vmatprep.mubr.bf16.mxu0 %v462_v45  ;;  %v498_v45 = vunpack.c.l.s8.bf16 %v390_v41  ;;  %v504_v53 = vunpack.c.h.s8.bf16 %v392_v44  ;;  %v404_v41 = vld [vmem:[%s5348_s29 + $0x1d8] sm:$0xff] }
 0x10d   : > { %1439 = vmatmul.mubr.bf16.gmra.mxu1 %v459_v46  ;;  %v495_v46 = vunpack.c.h.s8.bf16 %v387_v35  ;;  %v402_v35 = vld [vmem:[%s5348_s29 + $0x1c8] sm:$0xff] }
 0x10e   : > { %1448 = vmatprep.mubr.bf16.mxu1 %v464_v47  ;;  %v500_v47 = vunpack.c.l.s8.bf16 %v392_v44  ;;  %v522_v42 = vunpack.c.l.s8.bf16 %v402_v35 }
 0x113   : > { %1096 = vmatmul.mubr.bf16.gmra.mxu0 %v461_v52  ;;  %v499_v52 = vunpack.c.l.s8.bf16 %v391_v49 }
 0x114   : > { %1105 = vmatprep.mubr.bf16.mxu0 %v466_v54  ;;  %v394_v54 = vld [vmem:[%s5348_s29 + $0x188] sm:$0xff] }
 0x115   : > { %1449 = vmatmul.mubr.bf16.gmra.mxu1 %v463_v55  ;;  %v4708_v55 = vld [vmem:[#allocation8 + $0x8] sm:$0xff]   ;;  %v506_v58 = vunpack.c.l.s8.bf16 %v394_v54  ;;  %v510_v0 = vunpack.c.h.s8.bf16 %v394_v54 }
 0x116   : > { %1458 = vmatprep.mubr.bf16.mxu1 %v468_v56  ;;  %v501_v56 = vunpack.c.h.s8.bf16 %v389_v48  ;;  %2728 = vmatpush1.bf16.msra.mxu1 %v4708_v55 }
 0x117   : > { %2729 = vmatprep.subr.bf16.mxu1 %v7161_v38 }
 0x11b   : > { %1106 = vmatmul.mubr.bf16.gmra.mxu0 %v465_v59  ;;  %v503_v59 = vunpack.c.h.s8.bf16 %v391_v49  ;;  %v401_v49 = vld [vmem:[%s5348_s29 + $0x1c0] sm:$0xff] }
 0x11c   : > { %1115 = vmatprep.mubr.bf16.mxu0 %v470_v60  ;;  %v508_v60 = vunpack.c.l.s8.bf16 %v396_v57  ;;  %v521_v55 = vunpack.c.l.s8.bf16 %v401_v49 }
 0x11d   : > { %1459 = vmatmul.mubr.bf16.gmra.mxu1 %v467_v61  ;;  %v393_v61 = vld [vmem:[%s5348_s29 + $0x180] sm:$0xff] }
 0x11e   : > { %1468 = vmatprep.mubr.bf16.mxu1 %v472_v62  ;;  %v395_v62 = vld [vmem:[%s5348_s29 + $0x190] sm:$0xff]  ;;  %v505_v63 = vunpack.c.l.s8.bf16 %v393_v61 }
 0x11f   : > { %v507_v1 = vunpack.c.l.s8.bf16 %v395_v62  ;;  %v511_v15 = vunpack.c.h.s8.bf16 %v395_v62 }
 0x123   : > { %1116 = vmatmul.mubr.bf16.gmra.mxu0 %v469_v3 }
 0x124   : > { %1125 = vmatprep.mubr.bf16.mxu0 %v474_v5 }
 0x125   : > { %1469 = vmatmul.mubr.bf16.gmra.mxu1 %v471_v6  ;;  %v398_v6 = vld [vmem:[%s5348_s29 + $0x1a8] sm:$0xff] }
 0x126   : > { %1478 = vmatprep.mubr.bf16.mxu1 %v476_v7  ;;  %v4709_v7 = vld [vmem:[#allocation8] sm:$0xff]  }
 0x127   : > { %2730 = vmatpush1.bf16.msra.mxu1 %v4709_v7  ;;  %v4711_v7 = vld [vmem:[#allocation8 + $0x70] sm:$0xff]  }
 0x128   : > { %2731 = vmatprep.subr.bf16.mxu1 %v7161_v38 }
 0x12b   : > { %1126 = vmatmul.mubr.bf16.gmra.mxu0 %v473_v10  ;;  %v509_v10 = vunpack.c.h.s8.bf16 %v393_v61  ;;  %v528_v61 = vunpack.c.h.s8.bf16 %v404_v41 }
 0x12c   : > { %1135 = vmatprep.mubr.bf16.mxu0 %v478_v11  ;;  %v400_v11 = vld [vmem:[%s5348_s29 + $0x1b8] sm:$0xff] }
 0x12d   : > { %1479 = vmatmul.mubr.bf16.gmra.mxu1 %v475_v12  ;;  %v514_v12 = vunpack.c.l.s8.bf16 %v398_v6  ;;  %v520_v30 = vunpack.c.h.s8.bf16 %v400_v11 }
 0x12e   : > { %1488 = vmatprep.mubr.bf16.mxu1 %v480_v13 }
 0x133   : > { %1136 = vmatmul.mubr.bf16.gmra.mxu0 %v477_v16  ;;  %v516_v16 = vunpack.c.l.s8.bf16 %v400_v11 }
 0x134   : > { %1145 = vmatprep.mubr.bf16.mxu0 %v482_v18 }
 0x135   : > { %1489 = vmatmul.mubr.bf16.gmra.mxu1 %v479_v19  ;;  %v397_v19 = vld [vmem:[%s5348_s29 + $0x1a0] sm:$0xff] }
 0x136   : > { %1498 = vmatprep.mubr.bf16.mxu1 %v484_v20 }
 0x13b   : > { %1146 = vmatmul.mubr.bf16.gmra.mxu0 %v481_v23 }
 0x13c   : > { %1155 = vmatprep.mubr.bf16.mxu0 %v486_v24 }
 0x13d   : > { %1499 = vmatmul.mubr.bf16.gmra.mxu1 %v483_v25  ;;  %v513_v25 = vunpack.c.l.s8.bf16 %v397_v19 }
 0x13e   : > { %1508 = vmatprep.mubr.bf16.mxu1 %v488_v26  ;;  %v518_v26 = vunpack.c.h.s8.bf16 %v398_v6 }
 0x143   : > { %1156 = vmatmul.mubr.bf16.gmra.mxu0 %v485_v29  ;;  %v515_v29 = vunpack.c.l.s8.bf16 %v399_v22 }
 0x144   : > { %1165 = vmatprep.mubr.bf16.mxu0 %v490_v31 }
 0x145   : > { %1509 = vmatmul.mubr.bf16.gmra.mxu1 %v487_v32 }
 0x146   : > { %1518 = vmatprep.mubr.bf16.mxu1 %v492_v33 }
 0x14b   : > { %1166 = vmatmul.mubr.bf16.gmra.mxu0 %v489_v36  ;;  %v4710_v36 = vld [vmem:[#allocation8 + $0x78] sm:$0xff]  }
 0x14c   : > { %1175 = vmatprep.mubr.bf16.mxu0 %v494_v37  ;;  %2732 = vmatpush2.bf16.msra.mxu1 %v4710_v36 }
 0x14d   : > { %1519 = vmatmul.mubr.bf16.gmra.mxu1 %v491_v39  ;;  %2733 = vmatprep.subr.bf16.mxu1 %v7161_v38 }
 0x14e   : > { %1528 = vmatprep.mubr.bf16.mxu1 %v496_v40  ;;  %v517_v40 = vunpack.c.h.s8.bf16 %v397_v19 }
 0x150   : > { %2734 = vmatpush2.bf16.msra.mxu1 %v4711_v7 }
 0x151   : > { %2735 = vmatprep.subr.bf16.mxu1 %v7161_v38 }
 0x153   : > { %1176 = vmatmul.mubr.bf16.gmra.mxu0 %v493_v43 }
 0x154   : > { %1185 = vmatprep.mubr.bf16.mxu0 %v498_v45  ;;  %v519_v45 = vunpack.c.h.s8.bf16 %v399_v22 }
 0x155   : > { %1529 = vmatmul.mubr.bf16.gmra.mxu1 %v495_v46  ;;  %v524_v46 = vunpack.c.l.s8.bf16 %v404_v41  ;;  %v405_v41 = vld [vmem:[%s5348_s29 + $0x1e0] sm:$0xff] }
 0x156   : > { %1538 = vmatprep.mubr.bf16.mxu1 %v500_v47 }
 0x15b   : > { %1186 = vmatmul.mubr.bf16.gmra.mxu0 %v497_v50 }
 0x15c   : > { %1195 = vmatprep.mubr.bf16.mxu0 %v502_v51 }
 0x15d   : > { %1539 = vmatmul.mubr.bf16.gmra.mxu1 %v499_v52  ;;  %v403_v52 = vld [vmem:[%s5348_s29 + $0x1d0] sm:$0xff] }
 0x15e   : > { %1548 = vmatprep.mubr.bf16.mxu1 %v504_v53 }
 0x163   : > { %1196 = vmatmul.mubr.bf16.gmra.mxu0 %v501_v56  ;;  %v526_v56 = vunpack.c.h.s8.bf16 %v402_v35 }
 0x164   : > { %1205 = vmatprep.mubr.bf16.mxu0 %v506_v58 }
 0x165   : > { %1549 = vmatmul.mubr.bf16.gmra.mxu1 %v503_v59  ;;  %v523_v59 = vunpack.c.l.s8.bf16 %v403_v52 }
 0x166   : > { %1558 = vmatprep.mubr.bf16.mxu1 %v508_v60  ;;  %v603_v60 = vlaneseq }
 0x168   : > { %v5503_v6 = vshrl.u32 %v603_v60, 7 }
 0x16a   : > { %7191 = vst [vmem:[#allocation15_spill] sm:$0xff] %v5503_v6 }
 0x16b   : > { %v5422_v3 = vpop.f32.mrf.mxu0  ;;  %1206 = vmatmul.mubr.bf16.gmra.mxu0 %v505_v63 }
 0x16c   : > { %1215 = vmatprep.mubr.bf16.mxu0 %v510_v0 }
 0x16d   : > { %v5424_v4 = vpop.f32.mrf.mxu0  ;;  %v5426_v5 = vpop.f32.mrf.mxu1  ;;  %1559 = vmatmul.mubr.bf16.gmra.mxu1 %v507_v1 }
 0x16e   : > { %1568 = vmatprep.mubr.bf16.mxu1 %v512_v2  ;;  %v406_v2 = vld [vmem:[%s5348_s29 + $0x1e8] sm:$0xff] }
 0x16f   : > { %v5429_v8 = vpop.f32.mrf.mxu0  ;;  %v5431_v9 = vpop.f32.mrf.mxu1  ;;  %v530_v19 = vunpack.c.l.s8.bf16 %v406_v2 }
 0x171   : > { %v5434_v13 = vpop.f32.mrf.mxu0  ;;  %v5436_v14 = vpop.f32.mrf.mxu1 }
 0x173   : > { %v5439_v17 = vpop.f32.mrf.mxu0  ;;  %1216 = vmatmul.mubr.bf16.gmra.mxu0 %v509_v10  ;;  %v5441_v18 = vpop.f32.mrf.mxu1 }
 0x174   : > { %1225 = vmatprep.mubr.bf16.mxu0 %v514_v12  ;;  %v525_v12 = vunpack.c.h.s8.bf16 %v401_v49  ;;  %v407_v49 = vld [vmem:[%s5348_s29 + $0x1f0] sm:$0xff] }
 0x175   : > { %v5444_v20 = vpop.f32.mrf.mxu0  ;;  %v5446_v21 = vpop.f32.mrf.mxu1  ;;  %1569 = vmatmul.mubr.bf16.gmra.mxu1 %v511_v15  ;;  %v408_v15 = vld [vmem:[%s5348_s29 + $0x1f8] sm:$0xff] }
 0x176   : > { %1578 = vmatprep.mubr.bf16.mxu1 %v516_v16  ;;  %v7160_v16 = vsub.s32 1, %v5503_v6 }
 0x177   : > { %v5449_v23 = vpop.f32.mrf.mxu0  ;;  %v5451_v24 = vpop.f32.mrf.mxu1 }
 0x179   : > { %v5453_v27 = vpop.f32.mrf.mxu0  ;;  %v5455_v28 = vpop.f32.mrf.mxu1 }
 0x17b   : > { %v5457_v31 = vpop.f32.mrf.mxu0  ;;  %1226 = vmatmul.mubr.bf16.gmra.mxu0 %v513_v25  ;;  %v5459_v32 = vpop.f32.mrf.mxu1 }
 0x17c   : > { %1235 = vmatprep.mubr.bf16.mxu0 %v518_v26  ;;  %v527_v26 = vunpack.c.h.s8.bf16 %v403_v52  ;;  %v7163_v52 = vsub.s32 0, %v5503_v6 }
 0x17d   : > { %v5461_v33 = vpop.f32.mrf.mxu0  ;;  %v5463_v34 = vpop.f32.mrf.mxu1  ;;  %1579 = vmatmul.mubr.bf16.gmra.mxu1 %v515_v29  ;;  %v532_v29 = vunpack.c.l.s8.bf16 %v408_v15 }
 0x17e   : > { %1588 = vmatprep.mubr.bf16.mxu1 %v520_v30  ;;  %v601_v30 = vld [vmem:[%s7150_s2] sm:$0x3] }
 0x17f   : > { %v5466_v37 = vpop.f32.mrf.mxu0  ;;  %v5468_v39 = vpop.f32.mrf.mxu1 }
 0x181   : > { %v5471_v43 = vpop.f32.mrf.mxu0  ;;  %v5473_v44 = vpop.f32.mrf.mxu1 }
 0x183   : > { %v5476_v47 = vpop.f32.mrf.mxu0  ;;  %1236 = vmatmul.mubr.bf16.gmra.mxu0 %v517_v40  ;;  %v5478_v48 = vpop.f32.mrf.mxu1  ;;  %v5525_v40 = vrot.slane %v601_v30, %v7160_v16 }
 0x184   : > { %1245 = vmatprep.mubr.bf16.mxu0 %v522_v42 }
 0x185   : > { %v5481_v50 = vpop.f32.mrf.mxu0  ;;  %v5483_v51 = vpop.f32.mrf.mxu1  ;;  %1589 = vmatmul.mubr.bf16.gmra.mxu1 %v519_v45  ;;  %v970_v60 = vadd.f32 %v5424_v4, %v5525_v40 }
 0x186   : > { %1598 = vmatprep.mubr.bf16.mxu1 %v524_v46  ;;  %v974_v46 = vadd.f32 %v5434_v13, %v5525_v40 }
 0x187   : > { %v5486_v53 = vpop.f32.mrf.mxu0  ;;  %v5488_v54 = vpop.f32.mrf.mxu1  ;;  %v1323_v4 = vadd.f32 %v5431_v9, %v970_v60  ;;  %v533_v60 = vunpack.c.h.s8.bf16 %v405_v41 }
 0x188   : > { %v1327_v13 = vadd.f32 %v5441_v18, %v974_v46 }
 0x189   : > { %v5490_v57 = vpop.f32.mrf.mxu0  ;;  %v5492_v58 = vpop.f32.mrf.mxu1 }
 0x18a   : > { %v1642_v18 = vmax.f32 %v1327_v13, 0.0 }
 0x18b   : > { %v5494_v62 = vpop.f32.mrf.mxu0  ;;  %1246 = vmatmul.mubr.bf16.gmra.mxu0 %v521_v55  ;;  %v5496_v63 = vpop.f32.mrf.mxu1 }
 0x18c   : > { %1255 = vmatprep.mubr.bf16.mxu0 %v526_v56 }
 0x18d   : > { %v5498_v0 = vpop.f32.mrf.mxu0  ;;  %v5500_v1 = vpop.f32.mrf.mxu1  ;;  %1599 = vmatmul.mubr.bf16.gmra.mxu1 %v523_v59  ;;  %v529_v59 = vunpack.c.l.s8.bf16 %v405_v41 }
 0x18e   : > { %1608 = vmatprep.mubr.bf16.mxu1 %v528_v61  ;;  %v534_v61 = vunpack.c.h.s8.bf16 %v406_v2 }
 0x18f   : > { %v5505_v10 = vpop.f32.mrf.mxu0  ;;  %v5507_v11 = vpop.f32.mrf.mxu1 }
 0x191   : > { %v5511_v22 = vpop.f32.mrf.mxu0  ;;  %v5513_v25 = vpop.f32.mrf.mxu1 }
 0x193   : > { %v5519_v35 = vpop.f32.mrf.mxu0  ;;  %1256 = vmatmul.mubr.bf16.gmra.mxu0 %v525_v12  ;;  %v5521_v36 = vpop.f32.mrf.mxu1 }
 0x194   : > { %1265 = vmatprep.mubr.bf16.mxu0 %v530_v19  ;;  %v531_v19 = vunpack.c.l.s8.bf16 %v407_v49 }
 0x195   : > { %v5528_v42 = vpop.f32.mrf.mxu0  ;;  %v5530_v45 = vpop.f32.mrf.mxu1  ;;  %1609 = vmatmul.mubr.bf16.gmra.mxu1 %v527_v26  ;;  %v536_v26 = vunpack.c.h.s8.bf16 %v408_v15  ;;  %v984_v15 = vadd.f32 %v5453_v27, %v5525_v40 }
 0x196   : > { %7192 = vst [vmem:[#allocation16_spill] sm:$0xff] %v5530_v45  ;;  %1618 = vmatprep.mubr.bf16.mxu1 %v532_v29  ;;  %v5549_v29 = vrot.slane %v601_v30, %v7163_v52  ;;  %v4712_v30 = vld [vmem:[#allocation8 + $0x68] sm:$0xff]   ;;  %v7195_v52 = vmov 0  }
 0x197   : > { %v5536_v55 = vpop.f32.mrf.mxu0  ;;  %v5538_v56 = vpop.f32.mrf.mxu1  ;;  %2736 = vmatpush2.bf16.msra.mxu1 %v4712_v30 }
 0x198   : > { %v972_v2 = vadd.f32 %v5429_v8, %v5549_v29  ;;  %v968_v46 = vadd.f32 %v5422_v3, %v5549_v29  ;;  %v1640_v8 = vmax.f32 %v1323_v4, 0.0  ;;  %2737 = vmatprep.subr.bf16.mxu1 %v7195_v52  ;;  %v1337_v3 = vadd.f32 %v5459_v32, %v984_v15 }
 0x199   : > { %v5542_v7 = vpop.f32.mrf.mxu0  ;;  %v5544_v12 = vpop.f32.mrf.mxu1  ;;  %v978_v15 = vadd.f32 %v5439_v17, %v5549_v29 }
 0x19a   : > { %7193 = vst [vmem:[#allocation17_spill] sm:$0xff] %v5544_v12  ;;  %v1768_v6 = vpack.c.bf16 %v1642_v18, %v1640_v8  ;;  %v1646_v32 = vmax.f32 %v1337_v3, 0.0 }
 0x19b   : > { %v5551_v16 = vpop.f32.mrf.mxu0  ;;  %1266 = vmatmul.mubr.bf16.gmra.mxu0 %v529_v59  ;;  %v5553_v38 = vpop.f32.mrf.mxu1  ;;  %v1331_v17 = vadd.f32 %v5446_v21, %v978_v15  ;;  %v1004_v21 = vadd.f32 %v5490_v57, %v5525_v40 }
 0x19c   : > { %1275 = vmatprep.mubr.bf16.mxu0 %v534_v61  ;;  %v980_v61 = vadd.f32 %v5444_v20, %v5525_v40 }
 0x19d   : > { %v5558_v45 = vpop.f32.mrf.mxu0  ;;  %v5560_v12 = vpop.f32.mrf.mxu1  ;;  %1619 = vmatmul.mubr.bf16.gmra.mxu1 %v531_v19  ;;  %v1325_v19 = vadd.f32 %v5436_v14, %v972_v2  ;;  %v982_v2 = vadd.f32 %v5449_v23, %v5549_v29  ;;  %v990_v23 = vadd.f32 %v5461_v33, %v5525_v40 }
 0x19e   : > { %7194 = vst [vmem:[#allocation18_spill] sm:$0xff] %v5560_v12  ;;  %1628 = vmatprep.mubr.bf16.mxu1 %v536_v26  ;;  %v535_v26 = vunpack.c.h.s8.bf16 %v407_v49  ;;  %v1321_v12 = vadd.f32 %v5426_v5, %v968_v46  ;;  %v1333_v20 = vadd.f32 %v5451_v24, %v980_v61  ;;  %v994_v5 = vadd.f32 %v5471_v43, %v5525_v40 }
 0x19f   : > { %v5566_v59 = vpop.f32.mrf.mxu0  ;;  %v5568_v9 = vpop.f32.mrf.mxu1  ;;  %v1641_v14 = vmax.f32 %v1325_v19, 0.0  ;;  %v1335_v8 = vadd.f32 %v5455_v28, %v982_v2  ;;  %v992_v28 = vadd.f32 %v5466_v37, %v5549_v29  ;;  %v1000_v37 = vadd.f32 %v5481_v50, %v5525_v40 }
 0x1a0   : > { %v1639_v18 = vmax.f32 %v1321_v12, 0.0  ;;  %v1347_v43 = vadd.f32 %v5478_v48, %v994_v5  ;;  %v1643_v5 = vmax.f32 %v1331_v17, 0.0 }
 0x1a1   : > { %v5573_v13 = vpop.f32.mrf.mxu0  ;;  %v5575_v27 = vpop.f32.mrf.mxu1  ;;  %v1645_v33 = vmax.f32 %v1335_v8, 0.0  ;;  %v1353_v50 = vadd.f32 %v5488_v54, %v1000_v37 }
 0x1a2   : > { %v1650_v48 = vmax.f32 %v1347_v43, 0.0 }
 0x1a3   : > { %v5580_v41 = vpop.f32.mrf.mxu0  ;;  %1276 = vmatmul.mubr.bf16.gmra.mxu0 %v533_v60  ;;  %v5582_v4 = vpop.f32.mrf.mxu1  ;;  %v1767_v60 = vpack.c.bf16 %v1641_v14, %v1639_v18  ;;  %v988_v18 = vadd.f32 %v5457_v31, %v5549_v29  ;;  %v1357_v31 = vadd.f32 %v5496_v63, %v1004_v21  ;;  %v998_v21 = vadd.f32 %v5476_v47, %v5549_v29 }
 0x1a4   : > { %2067 = vmatprep.mubr.bf16.mxu0 %v1768_v6  ;;  %v1644_v6 = vmax.f32 %v1333_v20, 0.0  ;;  %v1343_v20 = vadd.f32 %v5468_v39, %v990_v23  ;;  %v1769_v23 = vpack.c.bf16 %v1645_v33, %v1643_v5  ;;  %v1002_v33 = vadd.f32 %v5486_v53, %v5549_v29 }
 0x1a5   : > { %v5587_v49 = vpop.f32.mrf.mxu0  ;;  %v5589_v30 = vpop.f32.mrf.mxu1  ;;  %1629 = vmatmul.mubr.bf16.gmra.mxu1 %v535_v26  ;;  %v1654_v63 = vmax.f32 %v1357_v31, 0.0  ;;  %v1010_v53 = vadd.f32 %v5498_v0, %v5525_v40  ;;  %v1351_v47 = vadd.f32 %v5483_v51, %v998_v21  ;;  %v1024_v51 = vadd.f32 %v5542_v7, %v5525_v40 }
 0x1a6   : > { %v1770_v12 = vpack.c.bf16 %v1646_v32, %v1644_v6  ;;  %v4713_v32 = vld [vmem:[#allocation8 + $0x60] sm:$0xff]   ;;  %v1648_v6 = vmax.f32 %v1343_v20, 0.0  ;;  %v1355_v37 = vadd.f32 %v5492_v58, %v1002_v33  ;;  %v1012_v58 = vadd.f32 %v5505_v10, %v5549_v29 }
 0x1a7   : > { %v5595_v46 = vpop.f32.mrf.mxu0  ;;  %v5597_v24 = vpop.f32.mrf.mxu1  ;;  %2738 = vmatpush2.bf16.msra.mxu1 %v4713_v32  ;;  %v1020_v10 = vadd.f32 %v5528_v42, %v5525_v40 }
 0x1a8   : > { %2739 = vmatprep.subr.bf16.mxu1 %v7195_v52  ;;  %v1772_v43 = vpack.c.bf16 %v1650_v48, %v1648_v6  ;;  %v1653_v0 = vmax.f32 %v1355_v37, 0.0 }
 0x1a9   : > { %v5602_v61 = vpop.f32.mrf.mxu0  ;;  %v5604_v19 = vpop.f32.mrf.mxu1  ;;  %v1373_v42 = vadd.f32 %v5538_v56, %v1020_v10  ;;  %v7198_v10 = vld [vmem:[#allocation17_spill] sm:$0xff] }
 0x1ab   : > { %v5608_v26 = vpop.f32.mrf.mxu0  ;;  %v5610_v3 = vpop.f32.mrf.mxu1  ;;  %2068 = vmatmul.mubr.bf16.vlgmr.msra.gmra.mxu0 %v1767_v60  ;;  %v1345_v60 = vadd.f32 %v5473_v44, %v992_v28 }
 0x1ac   : > { %2077 = vmatprep.mubr.bf16.mxu0 %v1770_v12  ;;  %v1341_v12 = vadd.f32 %v5463_v34, %v988_v18  ;;  %v1014_v34 = vadd.f32 %v5511_v22, %v5525_v40  ;;  %v1652_v18 = vmax.f32 %v1353_v50, 0.0  ;;  %v1363_v50 = vadd.f32 %v5507_v11, %v1010_v53 }
 0x1ad   : > { %v5615_v14 = vpop.f32.mrf.mxu0  ;;  %v5617_v2 = vpop.f32.mrf.mxu1  ;;  %v1649_v44 = vmax.f32 %v1345_v60, 0.0 }
 0x1ae   : > { %v1647_v48 = vmax.f32 %v1341_v12, 0.0  ;;  %v1367_v22 = vadd.f32 %v5521_v36, %v1014_v34  ;;  %v1774_v31 = vpack.c.bf16 %v1654_v63, %v1652_v18  ;;  %v4714_v63 = vld [vmem:[#allocation8 + $0x58] sm:$0xff]   ;;  %v1651_v34 = vmax.f32 %v1351_v47, 0.0 }
 0x1af   : > { %v5623_v15 = vpop.f32.mrf.mxu0  ;;  %v5625_v39 = vpop.f32.mrf.mxu1  ;;  %v1656_v18 = vmax.f32 %v1363_v50, 0.0  ;;  %2740 = vmatpush2.bf16.msra.mxu1 %v4714_v63 }
 0x1b0   : > { %v1771_v6 = vpack.c.bf16 %v1649_v44, %v1647_v48  ;;  %v1658_v36 = vmax.f32 %v1367_v22, 0.0  ;;  %v1008_v48 = vadd.f32 %v5494_v62, %v5549_v29  ;;  %v1773_v53 = vpack.c.bf16 %v1653_v0, %v1651_v34  ;;  %2741 = vmatprep.subr.bf16.mxu1 %v7195_v52 }
 0x1b1   : > { %v5630_v8 = vpop.f32.mrf.mxu0  ;;  %v5632_v57 = vpop.f32.mrf.mxu1  ;;  %v1377_v62 = vadd.f32 %v5553_v38, %v1024_v51  ;;  %v1022_v0 = vadd.f32 %v5536_v55, %v5549_v29  ;;  %v1018_v51 = vadd.f32 %v5519_v35, %v5549_v29  ;;  %v1030_v55 = vadd.f32 %v5558_v45, %v5525_v40 }
 0x1b2   : > { %v1776_v22 = vpack.c.bf16 %v1658_v36, %v1656_v18 }
 0x1b3   : > { %v5637_v17 = vpop.f32.mrf.mxu0  ;;  %v5639_v20 = vpop.f32.mrf.mxu1  ;;  %2078 = vmatmul.mubr.bf16.gmra.mxu0 %v1769_v23  ;;  %v1662_v38 = vmax.f32 %v1377_v62, 0.0 }
 0x1b4   : > { %2087 = vmatprep.mubr.bf16.mxu0 %v1772_v43 }
 0x1b5   : > { %v5644_v28 = vpop.f32.mrf.mxu0  ;;  %v5646_v32 = vpop.f32.mrf.mxu1 }
 0x1b7   : > { %v5652_v5 = vpop.f32.mrf.mxu0  ;;  %v5654_v54 = vpop.f32.mrf.mxu1 }
 0x1b9   : > { %v5659_v23 = vpop.f32.mrf.mxu0  ;;  %v5661_v60 = vpop.f32.mrf.mxu1 }
 0x1bb   : > { %v5665_v43 = vpop.f32.mrf.mxu0  ;;  %v5667_v12 = vpop.f32.mrf.mxu1  ;;  %2088 = vmatmul.mubr.bf16.gmra.mxu0 %v1771_v6  ;;  %v1365_v6 = vadd.f32 %v5513_v25, %v1012_v58 }
 0x1bc   : > { %2097 = vmatprep.mubr.bf16.mxu0 %v1774_v31  ;;  %v1361_v31 = vadd.f32 %v5500_v1, %v1008_v48  ;;  %v1034_v1 = vadd.f32 %v5573_v13, %v5525_v40  ;;  %v1660_v48 = vmax.f32 %v1373_v42, 0.0  ;;  %v1383_v42 = vadd.f32 %v5568_v9, %v1030_v55 }
 0x1bd   : > { %v5672_v44 = vpop.f32.mrf.mxu0  ;;  %v5674_v33 = vpop.f32.mrf.mxu1  ;;  %v1657_v25 = vmax.f32 %v1365_v6, 0.0 }
 0x1be   : > { %v1655_v36 = vmax.f32 %v1361_v31, 0.0  ;;  %v1387_v13 = vadd.f32 %v5582_v4, %v1034_v1  ;;  %v7199_v31 = vld [vmem:[#allocation16_spill] sm:$0xff]  ;;  %v4715_v1 = vld [vmem:[#allocation8 + $0x50] sm:$0xff]   ;;  %v1664_v55 = vmax.f32 %v1383_v42, 0.0 }
 0x1bf   : > { %v5680_v21 = vpop.f32.mrf.mxu0  ;;  %v5682_v11 = vpop.f32.mrf.mxu1  ;;  %v1371_v35 = vadd.f32 %v7199_v31, %v1018_v51  ;;  %2742 = vmatpush2.bf16.msra.mxu1 %v4715_v1  ;;  %v7201_v31 = vld [vmem:[#allocation18_spill] sm:$0xff] }
 0x1c0   : > { %v1775_v18 = vpack.c.bf16 %v1657_v25, %v1655_v36  ;;  %v1032_v25 = vadd.f32 %v5566_v59, %v5549_v29  ;;  %v1666_v4 = vmax.f32 %v1387_v13, 0.0  ;;  %v1040_v59 = vadd.f32 %v5587_v49, %v5525_v40  ;;  %2743 = vmatprep.subr.bf16.mxu1 %v7195_v52 }
 0x1c1   : > { %v5687_v37 = vpop.f32.mrf.mxu0  ;;  %v5689_v7 = vpop.f32.mrf.mxu1  ;;  %v1659_v51 = vmax.f32 %v1371_v35, 0.0 }
 0x1c2   : > { %v1393_v49 = vadd.f32 %v5597_v24, %v1040_v59 }
 0x1c3   : > { %v5694_v47 = vpop.f32.mrf.mxu0  ;;  %v5696_v50 = vpop.f32.mrf.mxu1  ;;  %2098 = vmatmul.mubr.bf16.gmra.mxu0 %v1773_v53  ;;  %v1375_v53 = vadd.f32 %v7198_v10, %v1022_v0 }
 0x1c4   : > { %7196 = vst [vmem:[#allocation19_spill] sm:$0xff] %v5694_v47  ;;  %2107 = vmatprep.mubr.bf16.mxu0 %v1776_v22  ;;  %v1778_v22 = vpack.c.bf16 %v1662_v38, %v1660_v48  ;;  %v1044_v38 = vadd.f32 %v5602_v61, %v5525_v40  ;;  %v1028_v48 = vadd.f32 %v5551_v16, %v5549_v29 }
 0x1c5   : > { %v5701_v58 = vpop.f32.mrf.mxu0  ;;  %v5703_v63 = vpop.f32.mrf.mxu1  ;;  %v1661_v45 = vmax.f32 %v1375_v53, 0.0  ;;  %v1385_v53 = vadd.f32 %v5575_v27, %v1032_v25 }
 0x1c6   : > { %7197 = vst [vmem:[#allocation20_spill] sm:$0xff] %v5703_v63  ;;  %v1397_v16 = vadd.f32 %v5610_v3, %v1044_v38  ;;  %v1381_v35 = vadd.f32 %v7201_v31, %v1028_v48 }
 0x1c7   : > { %v5709_v34 = vpop.f32.mrf.mxu0  ;;  %v5711_v56 = vpop.f32.mrf.mxu1  ;;  %v1777_v10 = vpack.c.bf16 %v1661_v45, %v1659_v51  ;;  %v1665_v27 = vmax.f32 %v1385_v53, 0.0  ;;  %v1042_v45 = vadd.f32 %v5595_v46, %v5549_v29  ;;  %v1038_v51 = vadd.f32 %v5580_v41, %v5549_v29 }
 0x1c8   : > { %v1670_v3 = vmax.f32 %v1397_v16, 0.0  ;;  %v1663_v38 = vmax.f32 %v1381_v35, 0.0  ;;  %v1050_v46 = vadd.f32 %v5615_v14, %v5525_v40 }
 0x1c9   : > { %v5716_v6 = vpop.f32.mrf.mxu0  ;;  %v5718_v62 = vpop.f32.mrf.mxu1  ;;  %v1391_v41 = vadd.f32 %v5589_v30, %v1038_v51  ;;  %v1064_v30 = vadd.f32 %v5659_v23, %v5525_v40 }
 0x1ca   : > { %v1779_v59 = vpack.c.bf16 %v1665_v27, %v1663_v38  ;;  %v1048_v38 = vadd.f32 %v5608_v26, %v5549_v29 }
 0x1cb   : > { %v5722_v63 = vpop.f32.mrf.mxu0  ;;  %v5724_v47 = vpop.f32.mrf.mxu1  ;;  %2108 = vmatmul.mubr.bf16.gmra.mxu0 %v1775_v18  ;;  %v1417_v26 = vadd.f32 %v5667_v12, %v1064_v30  ;;  %v1058_v30 = vadd.f32 %v5637_v17, %v5549_v29 }
 0x1cc   : > { %2117 = vmatprep.mubr.bf16.mxu0 %v1778_v22  ;;  %v1780_v22 = vpack.c.bf16 %v1666_v4, %v1664_v55  ;;  %v1054_v4 = vadd.f32 %v5630_v8, %v5525_v40  ;;  %v1668_v55 = vmax.f32 %v1393_v49, 0.0  ;;  %v1403_v49 = vadd.f32 %v5625_v39, %v1050_v46 }
 0x1cd   : > { %v5729_v0 = vpop.f32.mrf.mxu0  ;;  %v5731_v36 = vpop.f32.mrf.mxu1  ;;  %v1678_v12 = vmax.f32 %v1417_v26, 0.0  ;;  %v1411_v17 = vadd.f32 %v5646_v32, %v1058_v30  ;;  %v1084_v32 = vadd.f32 %v5716_v6, %v5525_v40 }
 0x1ce   : > { %7200 = vst [vmem:[#allocation17_spill] sm:$0xff] %v5731_v36  ;;  %v1407_v8 = vadd.f32 %v5639_v20, %v1054_v4  ;;  %v1667_v4 = vmax.f32 %v1391_v41, 0.0 }
 0x1cf   : > { %v5737_v18 = vpop.f32.mrf.mxu0  ;;  %v5739_v9 = vpop.f32.mrf.mxu1 }
 0x1d0   : > { %v1674_v20 = vmax.f32 %v1407_v8, 0.0 }
 0x1d1   : > { %v5744_v13 = vpop.f32.mrf.mxu0  ;;  %v5746_v61 = vpop.f32.mrf.mxu1 }
 0x1d3   : > { %v5751_v36 = vpop.f32.mrf.mxu0  ;;  %v5753_v42 = vpop.f32.mrf.mxu1  ;;  %2118 = vmatmul.mubr.bf16.gmra.mxu0 %v1777_v10  ;;  %v1395_v10 = vadd.f32 %v5604_v19, %v1042_v45  ;;  %v1052_v19 = vadd.f32 %v5623_v15, %v5549_v29  ;;  %v1060_v15 = vadd.f32 %v5644_v28, %v5525_v40 }
 0x1d4   : > { %2127 = vmatprep.mubr.bf16.mxu0 %v1780_v22  ;;  %v1782_v22 = vpack.c.bf16 %v1670_v3, %v1668_v55  ;;  %v4716_v3 = vld [vmem:[#allocation8 + $0x48] sm:$0xff]   ;;  %v1672_v55 = vmax.f32 %v1403_v49, 0.0 }
 0x1d5   : > { %v5758_v25 = vpop.f32.mrf.mxu0  ;;  %v5760_v1 = vpop.f32.mrf.mxu1  ;;  %v1669_v14 = vmax.f32 %v1395_v10, 0.0  ;;  %2744 = vmatpush2.bf16.msra.mxu1 %v4716_v3  ;;  %v1413_v28 = vadd.f32 %v5654_v54, %v1060_v15 }
 0x1d6   : > { %2745 = vmatprep.subr.bf16.mxu1 %v7195_v52  ;;  %v1784_v8 = vpack.c.bf16 %v1674_v20, %v1672_v55 }
 0x1d7   : > { %v5766_v48 = vpop.f32.mrf.mxu0  ;;  %v5768_v24 = vpop.f32.mrf.mxu1  ;;  %v1781_v46 = vpack.c.bf16 %v1669_v14, %v1667_v4  ;;  %v1062_v14 = vadd.f32 %v5652_v5, %v5549_v29  ;;  %v1676_v4 = vmax.f32 %v1413_v28, 0.0  ;;  %v1070_v5 = vadd.f32 %v5672_v44, %v5525_v40 }
 0x1d9   : > { %v5773_v53 = vpop.f32.mrf.mxu0  ;;  %v5775_v16 = vpop.f32.mrf.mxu1  ;;  %v1415_v55 = vadd.f32 %v5661_v60, %v1062_v14  ;;  %v1072_v60 = vadd.f32 %v5680_v21, %v5549_v29  ;;  %v4717_v14 = vld [vmem:[#allocation8 + $0x40] sm:$0xff]   ;;  %v1080_v21 = vadd.f32 %v5701_v58, %v5525_v40 }
 0x1da   : > { %2746 = vmatpush2.bf16.msra.mxu1 %v4717_v14 }
 0x1db   : > { %v5779_v31 = vpop.f32.mrf.mxu0  ;;  %v5781_v35 = vpop.f32.mrf.mxu1  ;;  %2128 = vmatmul.mubr.bf16.gmra.mxu0 %v1779_v59  ;;  %v1405_v59 = vadd.f32 %v5632_v57, %v1052_v19  ;;  %v1677_v44 = vmax.f32 %v1415_v55, 0.0  ;;  %v1437_v55 = vadd.f32 %v5724_v47, %v1084_v32  ;;  %v1433_v58 = vadd.f32 %v5711_v56, %v1080_v21  ;;  %v7203_v32 = vld [vmem:[#allocation19_spill] sm:$0xff] }
 0x1dc   : > { %2137 = vmatprep.mubr.bf16.mxu0 %v1782_v22  ;;  %v1401_v22 = vadd.f32 %v5617_v2, %v1048_v38  ;;  %v1074_v2 = vadd.f32 %v5687_v37, %v5525_v40  ;;  %v1078_v14 = vadd.f32 %v7203_v32, %v5549_v29 }
 0x1dd   : > { %v5786_v27 = vpop.f32.mrf.mxu0  ;;  %v5788_v45 = vpop.f32.mrf.mxu1  ;;  %v1673_v57 = vmax.f32 %v1405_v59, 0.0  ;;  %v1786_v59 = vpack.c.bf16 %v1678_v12, %v1676_v4  ;;  %v1675_v12 = vmax.f32 %v1411_v17, 0.0  ;;  %v1686_v47 = vmax.f32 %v1437_v55, 0.0 }
 0x1de   : > { %v1671_v20 = vmax.f32 %v1401_v22, 0.0  ;;  %v1427_v37 = vadd.f32 %v5696_v50, %v1074_v2  ;;  %v1423_v22 = vadd.f32 %v5682_v11, %v1070_v5  ;;  %v1068_v2 = vadd.f32 %v5665_v43, %v5549_v29 }
 0x1df   : > { %v5794_v51 = vpop.f32.mrf.mxu0  ;;  %v5796_v39 = vpop.f32.mrf.mxu1  ;;  %v1785_v4 = vpack.c.bf16 %v1677_v44, %v1675_v12  ;;  %v1425_v5 = vadd.f32 %v5689_v7, %v1072_v60  ;;  %v1082_v7 = vadd.f32 %v5709_v34, %v5549_v29  ;;  %v1090_v34 = vadd.f32 %v5729_v0, %v5525_v40 }
 0x1e0   : > { %v1783_v38 = vpack.c.bf16 %v1673_v57, %v1671_v20  ;;  %v1682_v50 = vmax.f32 %v1427_v37, 0.0  ;;  %v1680_v30 = vmax.f32 %v1423_v22, 0.0  ;;  %v1421_v43 = vadd.f32 %v5674_v33, %v1068_v2 }
 0x1e1   : > { %v5801_v10 = vpop.f32.mrf.mxu0  ;;  %v5803_v23 = vpop.f32.mrf.mxu1  ;;  %v1681_v22 = vmax.f32 %v1425_v5, 0.0  ;;  %v1094_v33 = vadd.f32 %v5744_v13, %v5525_v40  ;;  %v1684_v2 = vmax.f32 %v1433_v58, 0.0  ;;  %v1435_v21 = vadd.f32 %v5718_v62, %v1082_v7 }
 0x1e2   : > { %v1788_v37 = vpack.c.bf16 %v1682_v50, %v1680_v30  ;;  %v1679_v50 = vmax.f32 %v1421_v43, 0.0  ;;  %v1443_v58 = vadd.f32 %v5739_v9, %v1090_v34  ;;  %v1092_v62 = vadd.f32 %v5737_v18, %v5549_v29 }
 0x1e3   : > { %v5808_v41 = vpop.f32.mrf.mxu0  ;;  %v5810_v49 = vpop.f32.mrf.mxu1  ;;  %2138 = vmatmul.mubr.bf16.gmra.mxu0 %v1781_v46  ;;  %v1447_v13 = vadd.f32 %v5753_v42, %v1094_v33  ;;  %v1790_v55 = vpack.c.bf16 %v1686_v47, %v1684_v2  ;;  %v1685_v0 = vmax.f32 %v1435_v21, 0.0  ;;  %v1104_v47 = vadd.f32 %v5773_v53, %v5525_v40 }
 0x1e4   : > { %2147 = vmatprep.mubr.bf16.mxu0 %v1784_v8  ;;  %v1787_v30 = vpack.c.bf16 %v1681_v22, %v1679_v50  ;;  %v1088_v50 = vadd.f32 %v5722_v63, %v5549_v29  ;;  %v1688_v2 = vmax.f32 %v1443_v58, 0.0  ;;  %v1100_v18 = vadd.f32 %v5758_v25, %v5525_v40 }
 0x1e5   : > { %v5815_v19 = vpop.f32.mrf.mxu0  ;;  %v5817_v52 = vpop.f32.mrf.mxu1  ;;  %v1690_v42 = vmax.f32 %v1447_v13, 0.0  ;;  %v1457_v53 = vadd.f32 %v5781_v35, %v1104_v47 }
 0x1e6   : > { %v1453_v58 = vadd.f32 %v5768_v24, %v1100_v18 }
 0x1e7   : > { %v5823_v3 = vpop.f32.mrf.mxu0  ;;  %v5825_v54 = vpop.f32.mrf.mxu1  ;;  %v1694_v35 = vmax.f32 %v1457_v53, 0.0 }
 0x1e9   : > { %v5830_v15 = vpop.f32.mrf.mxu0  ;;  %v5832_v46 = vpop.f32.mrf.mxu1 }
 0x1eb   : > { %v5836_v26 = vpop.f32.mrf.mxu0  ;;  %v5838_v8 = vpop.f32.mrf.mxu1  ;;  %2148 = vmatmul.mubr.bf16.gmra.mxu0 %v1783_v38 }
 0x1ec   : > { %2157 = vmatprep.mubr.bf16.mxu0 %v1786_v59 }
 0x1ed   : > { %v5843_v28 = vpop.f32.mrf.mxu0  ;;  %v5845_v57 = vpop.f32.mrf.mxu1 }
 0x1ef   : > { %v5851_v20 = vpop.f32.mrf.mxu0  ;;  %v5853_v11 = vpop.f32.mrf.mxu1 }
 0x1f1   : > { %v5858_v38 = vpop.f32.mrf.mxu0  ;;  %v5860_v6 = vpop.f32.mrf.mxu1 }
 0x1f3   : > { %v5864_v59 = vpop.f32.mrf.mxu0  ;;  %v5866_v17 = vpop.f32.mrf.mxu1  ;;  %2158 = vmatmul.mubr.bf16.gmra.mxu0 %v1785_v4 }
 0x1f4   : > { %2167 = vmatprep.mubr.bf16.mxu0 %v1788_v37  ;;  %v7204_v37 = vld [vmem:[#allocation20_spill] sm:$0xff] }
 0x1f5   : > { %v5871_v44 = vpop.f32.mrf.mxu0  ;;  %v5873_v60 = vpop.f32.mrf.mxu1  ;;  %v1431_v43 = vadd.f32 %v7204_v37, %v1078_v14  ;;  %v7206_v37 = vld [vmem:[#allocation17_spill] sm:$0xff] }
 0x1f6   : > { %7202 = vst [vmem:[#allocation16_spill] sm:$0xff] %v5873_v60  ;;  %v1441_v63 = vadd.f32 %v7206_v37, %v1088_v50 }
 0x1f7   : > { %v5879_v12 = vpop.f32.mrf.mxu0  ;;  %v5881_v56 = vpop.f32.mrf.mxu1  ;;  %v1683_v33 = vmax.f32 %v1431_v43, 0.0 }
 0x1f8   : > { %v1687_v47 = vmax.f32 %v1441_v63, 0.0 }
 0x1f9   : > { %v5886_v4 = vpop.f32.mrf.mxu0  ;;  %v5888_v5 = vpop.f32.mrf.mxu1  ;;  %v1789_v34 = vpack.c.bf16 %v1685_v0, %v1683_v33  ;;  %v1098_v33 = vadd.f32 %v5751_v36, %v5549_v29 }
 0x1fb   : > { %v5892_v32 = vpop.f32.mrf.mxu0  ;;  %v5894_v60 = vpop.f32.mrf.mxu1  ;;  %2168 = vmatmul.mubr.bf16.gmra.mxu0 %v1787_v30  ;;  %v1445_v30 = vadd.f32 %v5746_v61, %v1092_v62  ;;  %v1102_v61 = vadd.f32 %v5766_v48, %v5549_v29  ;;  %v1110_v48 = vadd.f32 %v5786_v27, %v5525_v40  ;;  %v1451_v36 = vadd.f32 %v5760_v1, %v1098_v33 }
 0x1fc   : > { %2177 = vmatprep.mubr.bf16.mxu0 %v1790_v55  ;;  %v1792_v55 = vpack.c.bf16 %v1690_v42, %v1688_v2  ;;  %v1114_v42 = vadd.f32 %v5801_v10, %v5525_v40  ;;  %v1692_v2 = vmax.f32 %v1453_v58, 0.0  ;;  %v1124_v1 = vadd.f32 %v5830_v15, %v5525_v40 }
 0x1fd   : > { %v5899_v22 = vpop.f32.mrf.mxu0  ;;  %v5901_v7 = vpop.f32.mrf.mxu1  ;;  %v1689_v25 = vmax.f32 %v1445_v30, 0.0  ;;  %v1463_v58 = vadd.f32 %v5796_v39, %v1110_v48 }
 0x1fe   : > { %7205 = vst [vmem:[#allocation18_spill] sm:$0xff] %v5901_v7  ;;  %v1467_v10 = vadd.f32 %v5810_v49, %v1114_v42  ;;  %v1108_v42 = vadd.f32 %v5779_v31, %v5549_v29  ;;  %v1477_v15 = vadd.f32 %v5838_v8, %v1124_v1  ;;  %v1118_v1 = vadd.f32 %v5808_v41, %v5549_v29 }
 0x1ff   : > { %v5907_v14 = vpop.f32.mrf.mxu0  ;;  %v5909_v9 = vpop.f32.mrf.mxu1  ;;  %v1791_v18 = vpack.c.bf16 %v1689_v25, %v1687_v47  ;;  %v1696_v33 = vmax.f32 %v1463_v58, 0.0 }
 0x200   : > { %v1698_v49 = vmax.f32 %v1467_v10, 0.0  ;;  %v1461_v31 = vadd.f32 %v5788_v45, %v1108_v42  ;;  %v1702_v8 = vmax.f32 %v1477_v15, 0.0  ;;  %v1134_v45 = vadd.f32 %v5858_v38, %v5525_v40 }
 0x201   : > { %v5914_v21 = vpop.f32.mrf.mxu0  ;;  %v5916_v13 = vpop.f32.mrf.mxu1  ;;  %v1471_v41 = vadd.f32 %v5817_v52, %v1118_v1  ;;  %v1144_v52 = vadd.f32 %v5886_v4, %v5525_v40 }
 0x202   : > { %v1796_v10 = vpack.c.bf16 %v1698_v49, %v1696_v33  ;;  %v1695_v49 = vmax.f32 %v1461_v31, 0.0  ;;  %v1487_v38 = vadd.f32 %v5866_v17, %v1134_v45  ;;  %v1128_v45 = vadd.f32 %v5836_v26, %v5549_v29 }
 0x203   : > { %v5920_v43 = vpop.f32.mrf.mxu0  ;;  %v5922_v7 = vpop.f32.mrf.mxu1  ;;  %2178 = vmatmul.mubr.bf16.gmra.mxu0 %v1789_v34  ;;  %v1455_v34 = vadd.f32 %v5775_v16, %v1102_v61  ;;  %v1112_v16 = vadd.f32 %v5794_v51, %v5549_v29  ;;  %v1120_v51 = vadd.f32 %v5815_v19, %v5525_v40  ;;  %v1497_v4 = vadd.f32 %v5894_v60, %v1144_v52 }
 0x204   : > { %2187 = vmatprep.mubr.bf16.mxu0 %v1792_v55  ;;  %v1794_v55 = vpack.c.bf16 %v1694_v35, %v1692_v2  ;;  %v1691_v35 = vmax.f32 %v1451_v36, 0.0  ;;  %v1706_v17 = vmax.f32 %v1487_v38, 0.0  ;;  %v1481_v26 = vadd.f32 %v5845_v57, %v1128_v45 }
 0x205   : > { %v5927_v0 = vpop.f32.mrf.mxu0  ;;  %v5929_v62 = vpop.f32.mrf.mxu1  ;;  %v1693_v27 = vmax.f32 %v1455_v34, 0.0  ;;  %v1465_v48 = vadd.f32 %v5803_v23, %v1112_v16  ;;  %v1473_v58 = vadd.f32 %v5825_v54, %v1120_v51  ;;  %v1122_v23 = vadd.f32 %v5823_v3, %v5549_v29 }
 0x206   : > { %v1130_v3 = vadd.f32 %v5843_v28, %v5525_v40  ;;  %v1710_v60 = vmax.f32 %v1497_v4, 0.0  ;;  %v1154_v57 = vadd.f32 %v5914_v21, %v5525_v40  ;;  %v1138_v52 = vadd.f32 %v5864_v59, %v5549_v29 }
 0x207   : > { %v5935_v50 = vpop.f32.mrf.mxu0  ;;  %v5937_v24 = vpop.f32.mrf.mxu1  ;;  %v1793_v2 = vpack.c.bf16 %v1693_v27, %v1691_v35  ;;  %v1697_v19 = vmax.f32 %v1465_v48, 0.0  ;;  %v1700_v42 = vmax.f32 %v1473_v58, 0.0  ;;  %v1475_v51 = vadd.f32 %v5832_v46, %v1122_v23 }
 0x208   : > { %v1483_v58 = vadd.f32 %v5853_v11, %v1130_v3  ;;  %v1132_v46 = vadd.f32 %v5851_v20, %v5549_v29  ;;  %v1140_v20 = vadd.f32 %v5871_v44, %v5525_v40  ;;  %v1507_v21 = vadd.f32 %v5922_v7, %v1154_v57 }
 0x209   : > { %v5942_v30 = vpop.f32.mrf.mxu0  ;;  %v5944_v53 = vpop.f32.mrf.mxu1  ;;  %v1795_v33 = vpack.c.bf16 %v1697_v19, %v1695_v49  ;;  %v1798_v15 = vpack.c.bf16 %v1702_v8, %v1700_v42  ;;  %v1701_v28 = vmax.f32 %v1475_v51, 0.0  ;;  %v1699_v8 = vmax.f32 %v1471_v41, 0.0 }
 0x20a   : > { %v1704_v1 = vmax.f32 %v1483_v58, 0.0  ;;  %v1485_v3 = vadd.f32 %v5860_v6, %v1132_v46  ;;  %v1493_v58 = vadd.f32 %v5881_v56, %v1140_v20  ;;  %v1142_v6 = vadd.f32 %v5879_v12, %v5549_v29 }
 0x20b   : > { %v5948_v37 = vpop.f32.mrf.mxu0  ;;  %v5950_v63 = vpop.f32.mrf.mxu1  ;;  %2188 = vmatmul.mubr.bf16.gmra.mxu0 %v1791_v18  ;;  %v1797_v42 = vpack.c.bf16 %v1701_v28, %v1699_v8  ;;  %v1150_v12 = vadd.f32 %v5899_v22, %v5525_v40  ;;  %v1714_v7 = vmax.f32 %v1507_v21, 0.0 }
 0x20c   : > { %2197 = vmatprep.mubr.bf16.mxu0 %v1794_v55  ;;  %v1800_v38 = vpack.c.bf16 %v1706_v17, %v1704_v1  ;;  %v1705_v44 = vmax.f32 %v1485_v3, 0.0  ;;  %v1703_v17 = vmax.f32 %v1481_v26, 0.0  ;;  %v1708_v45 = vmax.f32 %v1493_v58, 0.0 }
 0x20d   : > { %v5955_v25 = vpop.f32.mrf.mxu0  ;;  %v5957_v61 = vpop.f32.mrf.mxu1  ;;  %v1495_v20 = vadd.f32 %v5888_v5, %v1142_v6  ;;  %v1503_v58 = vadd.f32 %v5909_v9, %v1150_v12  ;;  %v1152_v5 = vadd.f32 %v5907_v14, %v5549_v29  ;;  %v1160_v14 = vadd.f32 %v5927_v0, %v5525_v40 }
 0x20e   : > { %v1799_v1 = vpack.c.bf16 %v1705_v44, %v1703_v17  ;;  %v1802_v4 = vpack.c.bf16 %v1710_v60, %v1708_v45  ;;  %v1164_v60 = vadd.f32 %v5942_v30, %v5525_v40  ;;  %v1148_v17 = vadd.f32 %v5892_v32, %v5549_v29 }
 0x20f   : > { %v5963_v47 = vpop.f32.mrf.mxu0  ;;  %v5965_v39 = vpop.f32.mrf.mxu1  ;;  %v1709_v22 = vmax.f32 %v1495_v20, 0.0  ;;  %v1712_v45 = vmax.f32 %v1503_v58, 0.0  ;;  %v1513_v58 = vadd.f32 %v5937_v24, %v1160_v14 }
 0x210   : > { %v1517_v30 = vadd.f32 %v5950_v63, %v1164_v60 }
 0x211   : > { %v5970_v18 = vpop.f32.mrf.mxu0  ;;  %v5972_v34 = vpop.f32.mrf.mxu1 }
 0x212   : > { %v1718_v63 = vmax.f32 %v1517_v30, 0.0 }
 0x213   : > { %v5976_v55 = vpop.f32.mrf.mxu0  ;;  %v5978_v36 = vpop.f32.mrf.mxu1  ;;  %2198 = vmatmul.mubr.bf16.gmra.mxu0 %v1793_v2 }
 0x214   : > { %2207 = vmatprep.mubr.bf16.mxu0 %v1796_v10 }
 0x215   : > { %v5983_v27 = vpop.f32.mrf.mxu0  ;;  %v5985_v16 = vpop.f32.mrf.mxu1 }
 0x217   : > { %v5991_v35 = vpop.f32.mrf.mxu0  ;;  %v5993_v54 = vpop.f32.mrf.mxu1 }
 0x219   : > { %v5998_v2 = vpop.f32.mrf.mxu0  ;;  %v6000_v48 = vpop.f32.mrf.mxu1 }
 0x21b   : > { %v6004_v10 = vpop.f32.mrf.mxu0  ;;  %v6006_v31 = vpop.f32.mrf.mxu1  ;;  %2208 = vmatmul.mubr.bf16.gmra.mxu0 %v1795_v33 }
 0x21c   : > { %2217 = vmatprep.mubr.bf16.mxu0 %v1798_v15 }
 0x21d   : > { %v6011_v19 = vpop.f32.mrf.mxu0  ;;  %v6013_v23 = vpop.f32.mrf.mxu1 }
 0x21f   : > { %v6019_v49 = vpop.f32.mrf.mxu0  ;;  %v6021_v11 = vpop.f32.mrf.mxu1 }
 0x221   : > { %v6026_v33 = vpop.f32.mrf.mxu0  ;;  %v6028_v51 = vpop.f32.mrf.mxu1 }
 0x223   : > { %v6032_v15 = vpop.f32.mrf.mxu0  ;;  %v6034_v41 = vpop.f32.mrf.mxu1  ;;  %2218 = vmatmul.mubr.bf16.gmra.mxu0 %v1797_v42 }
 0x224   : > { %2227 = vmatprep.mubr.bf16.mxu0 %v1800_v38  ;;  %v7208_v38 = vld [vmem:[#allocation16_spill] sm:$0xff] }
 0x225   : > { %v6039_v28 = vpop.f32.mrf.mxu0  ;;  %v6041_v46 = vpop.f32.mrf.mxu1  ;;  %v1491_v59 = vadd.f32 %v7208_v38, %v1138_v52  ;;  %v7210_v38 = vld [vmem:[#allocation18_spill] sm:$0xff] }
 0x226   : > { %7207 = vst [vmem:[#allocation19_spill] sm:$0xff] %v6041_v46  ;;  %v1501_v32 = vadd.f32 %v7210_v38, %v1148_v17 }
 0x227   : > { %v6047_v8 = vpop.f32.mrf.mxu0  ;;  %v6049_v56 = vpop.f32.mrf.mxu1  ;;  %v1707_v57 = vmax.f32 %v1491_v59, 0.0 }
 0x228   : > { %v1711_v60 = vmax.f32 %v1501_v32, 0.0 }
 0x229   : > { %v6054_v42 = vpop.f32.mrf.mxu0  ;;  %v6056_v3 = vpop.f32.mrf.mxu1  ;;  %v1801_v12 = vpack.c.bf16 %v1709_v22, %v1707_v57  ;;  %v1158_v57 = vadd.f32 %v5920_v43, %v5549_v29 }
 0x22b   : > { %v6060_v26 = vpop.f32.mrf.mxu0  ;;  %v6062_v46 = vpop.f32.mrf.mxu1  ;;  %2228 = vmatmul.mubr.bf16.gmra.mxu0 %v1799_v1  ;;  %v1505_v1 = vadd.f32 %v5916_v13, %v1152_v5  ;;  %v1162_v13 = vadd.f32 %v5935_v50, %v5549_v29  ;;  %v1170_v50 = vadd.f32 %v5955_v25, %v5525_v40  ;;  %v1511_v43 = vadd.f32 %v5929_v62, %v1158_v57 }
 0x22c   : > { %2237 = vmatprep.mubr.bf16.mxu0 %v1802_v4  ;;  %v1804_v4 = vpack.c.bf16 %v1714_v7, %v1712_v45  ;;  %v1174_v7 = vadd.f32 %v5970_v18, %v5525_v40  ;;  %v1716_v45 = vmax.f32 %v1513_v58, 0.0  ;;  %v1184_v62 = vadd.f32 %v5998_v2, %v5525_v40 }
 0x22d   : > { %v6067_v44 = vpop.f32.mrf.mxu0  ;;  %v6069_v6 = vpop.f32.mrf.mxu1  ;;  %v1713_v0 = vmax.f32 %v1505_v1, 0.0  ;;  %v1523_v58 = vadd.f32 %v5965_v39, %v1170_v50 }
 0x22e   : > { %7209 = vst [vmem:[#allocation20_spill] sm:$0xff] %v6069_v6  ;;  %v1527_v18 = vadd.f32 %v5978_v36, %v1174_v7  ;;  %v1168_v7 = vadd.f32 %v5948_v37, %v5549_v29  ;;  %v1537_v2 = vadd.f32 %v6006_v31, %v1184_v62  ;;  %v1178_v62 = vadd.f32 %v5976_v55, %v5549_v29 }
 0x22f   : > { %v6075_v52 = vpop.f32.mrf.mxu0  ;;  %v6077_v9 = vpop.f32.mrf.mxu1  ;;  %v1803_v14 = vpack.c.bf16 %v1713_v0, %v1711_v60  ;;  %v1720_v57 = vmax.f32 %v1523_v58, 0.0 }
 0x230   : > { %v1722_v36 = vmax.f32 %v1527_v18, 0.0  ;;  %v1521_v37 = vadd.f32 %v5957_v61, %v1168_v7  ;;  %v1726_v31 = vmax.f32 %v1537_v2, 0.0  ;;  %v1194_v61 = vadd.f32 %v6026_v33, %v5525_v40 }
 0x231   : > { %v6082_v20 = vpop.f32.mrf.mxu0  ;;  %v6084_v21 = vpop.f32.mrf.mxu1  ;;  %v1531_v2 = vadd.f32 %v5985_v16, %v1178_v62  ;;  %v1188_v16 = vadd.f32 %v6004_v10, %v5549_v29 }
 0x232   : > { %v1808_v18 = vpack.c.bf16 %v1722_v36, %v1720_v57  ;;  %v1719_v36 = vmax.f32 %v1521_v37, 0.0 }
 0x233   : > { %v6088_v59 = vpop.f32.mrf.mxu0  ;;  %v6090_v6 = vpop.f32.mrf.mxu1  ;;  %2238 = vmatmul.mubr.bf16.gmra.mxu0 %v1801_v12  ;;  %v1515_v12 = vadd.f32 %v5944_v53, %v1162_v13  ;;  %v1172_v53 = vadd.f32 %v5963_v47, %v5549_v29  ;;  %v1180_v47 = vadd.f32 %v5983_v27, %v5525_v40 }
 0x234   : > { %2247 = vmatprep.mubr.bf16.mxu0 %v1804_v4  ;;  %v1806_v4 = vpack.c.bf16 %v1718_v63, %v1716_v45  ;;  %v1715_v63 = vmax.f32 %v1511_v43, 0.0 }
 0x235   : > { %v6095_v22 = vpop.f32.mrf.mxu0  ;;  %v6097_v5 = vpop.f32.mrf.mxu1  ;;  %v1717_v25 = vmax.f32 %v1515_v12, 0.0  ;;  %v1525_v50 = vadd.f32 %v5972_v34, %v1172_v53  ;;  %v1533_v58 = vadd.f32 %v5993_v54, %v1180_v47  ;;  %v1182_v34 = vadd.f32 %v5991_v35, %v5549_v29 }
 0x236   : > { %v1190_v35 = vadd.f32 %v6011_v19, %v5525_v40  ;;  %v1192_v19 = vadd.f32 %v6019_v49, %v5549_v29 }
 0x237   : > { %v6103_v17 = vpop.f32.mrf.mxu0  ;;  %v6105_v24 = vpop.f32.mrf.mxu1  ;;  %v1805_v45 = vpack.c.bf16 %v1717_v25, %v1715_v63  ;;  %v1721_v27 = vmax.f32 %v1525_v50, 0.0  ;;  %v1724_v7 = vmax.f32 %v1533_v58, 0.0  ;;  %v1535_v47 = vadd.f32 %v6000_v48, %v1182_v34 }
 0x238   : > { %v1547_v50 = vadd.f32 %v6034_v41, %v1194_v61  ;;  %v1543_v37 = vadd.f32 %v6021_v11, %v1190_v35  ;;  %v1204_v41 = vadd.f32 %v6054_v42, %v5525_v40  ;;  %v1723_v34 = vmax.f32 %v1531_v2, 0.0 }
 0x239   : > { %v6110_v1 = vpop.f32.mrf.mxu0  ;;  %v6112_v30 = vpop.f32.mrf.mxu1  ;;  %v1807_v57 = vpack.c.bf16 %v1721_v27, %v1719_v36  ;;  %v1810_v33 = vpack.c.bf16 %v1726_v31, %v1724_v7  ;;  %v1725_v58 = vmax.f32 %v1535_v47, 0.0  ;;  %v1200_v36 = vadd.f32 %v6039_v28, %v5525_v40 }
 0x23a   : > { %v1730_v27 = vmax.f32 %v1547_v50, 0.0  ;;  %v1728_v11 = vmax.f32 %v1543_v37, 0.0  ;;  %v1545_v49 = vadd.f32 %v6028_v51, %v1192_v19  ;;  %v1557_v35 = vadd.f32 %v6062_v46, %v1204_v41 }
 0x23b   : > { %v6116_v38 = vpop.f32.mrf.mxu0  ;;  %v6118_v32 = vpop.f32.mrf.mxu1  ;;  %2248 = vmatmul.mubr.bf16.gmra.mxu0 %v1803_v14  ;;  %v1809_v62 = vpack.c.bf16 %v1725_v58, %v1723_v34  ;;  %v1553_v50 = vadd.f32 %v6049_v56, %v1200_v36  ;;  %v1202_v28 = vadd.f32 %v6047_v8, %v5549_v29  ;;  %v1214_v46 = vadd.f32 %v6082_v20, %v5525_v40 }
 0x23c   : > { %2257 = vmatprep.mubr.bf16.mxu0 %v1806_v4  ;;  %v1812_v42 = vpack.c.bf16 %v1730_v27, %v1728_v11  ;;  %v1734_v2 = vmax.f32 %v1557_v35, 0.0  ;;  %v1210_v27 = vadd.f32 %v6067_v44, %v5525_v40  ;;  %v7211_v11 = vld [vmem:[#allocation19_spill] sm:$0xff]  ;;  %v1212_v44 = vadd.f32 %v6075_v52, %v5549_v29 }
 0x23d   : > { %v6123_v0 = vpop.f32.mrf.mxu0  ;;  %v6125_v13 = vpop.f32.mrf.mxu1  ;;  %v1732_v56 = vmax.f32 %v1553_v50, 0.0  ;;  %v1555_v8 = vadd.f32 %v6056_v3, %v1202_v28  ;;  %v1208_v50 = vadd.f32 %v6060_v26, %v5549_v29 }
 0x23e   : > { %v1565_v52 = vadd.f32 %v6084_v21, %v1212_v44  ;;  %v1230_v44 = vadd.f32 %v6123_v0, %v5525_v40 }
 0x23f   : > { %v6131_v60 = vpop.f32.mrf.mxu0  ;;  %v6133_v39 = vpop.f32.mrf.mxu1  ;;  %v1814_v20 = vpack.c.bf16 %v1734_v2, %v1732_v56  ;;  %v1733_v35 = vmax.f32 %v1555_v8, 0.0  ;;  %v1220_v2 = vadd.f32 %v6095_v22, %v5525_v40  ;;  %v7212_v56 = vld [vmem:[#allocation20_spill] sm:$0xff]  ;;  %v1222_v22 = vadd.f32 %v6103_v17, %v5549_v29 }
 0x240   : > { %v1583_v0 = vadd.f32 %v6133_v39, %v1230_v44  ;;  %v1228_v39 = vadd.f32 %v6116_v38, %v5549_v29 }
 0x241   : > { %v6138_v14 = vpop.f32.mrf.mxu0  ;;  %v6140_v12 = vpop.f32.mrf.mxu1  ;;  %v1573_v8 = vadd.f32 %v6105_v24, %v1220_v2  ;;  %v1575_v17 = vadd.f32 %v6112_v30, %v1222_v22 }
 0x243   : > { %v6144_v4 = vpop.f32.mrf.mxu0  ;;  %v6146_v43 = vpop.f32.mrf.mxu1  ;;  %2258 = vmatmul.mubr.bf16.gmra.mxu0 %v1805_v45  ;;  %v1740_v24 = vmax.f32 %v1573_v8, 0.0 }
 0x244   : > { %2267 = vmatprep.mubr.bf16.mxu0 %v1808_v18 }
 0x245   : > { %v6151_v25 = vpop.f32.mrf.mxu0  ;;  %v6153_v53 = vpop.f32.mrf.mxu1 }
 0x247   : > { %v6159_v63 = vpop.f32.mrf.mxu0  ;;  %v6161_v54 = vpop.f32.mrf.mxu1 }
 0x249   : > { %v6166_v45 = vpop.f32.mrf.mxu0  ;;  %v6170_v18 = vpop.f32.mrf.mxu1 }
 0x24a   : > { %v1244_v8 = vadd.f32 %v6166_v45, %v5525_v40 }
 0x24b   : > { %v6172_v55 = vpop.f32.mrf.mxu0  ;;  %2268 = vmatmul.mubr.bf16.gmra.mxu0 %v1807_v57  ;;  %v6183_v31 = vpop.f32.mrf.mxu1  ;;  %v1541_v57 = vadd.f32 %v6013_v23, %v1188_v16  ;;  %v1198_v23 = vadd.f32 %v6032_v15, %v5549_v29  ;;  %v1567_v16 = vadd.f32 %v6090_v6, %v1214_v46  ;;  %v1224_v6 = vadd.f32 %v6110_v1, %v5525_v40 }
 0x24c   : > { %2277 = vmatprep.mubr.bf16.mxu0 %v1810_v33  ;;  %v1729_v33 = vmax.f32 %v1545_v49, 0.0  ;;  %v1563_v49 = vadd.f32 %v6077_v9, %v1210_v27  ;;  %v1561_v27 = vadd.f32 %v7212_v56, %v1208_v50 }
 0x24d   : > { %v6177_v48 = vpop.f32.mrf.mxu0  ;;  %v6194_v47 = vpop.f32.mrf.mxu1  ;;  %v1727_v37 = vmax.f32 %v1541_v57, 0.0  ;;  %v1551_v36 = vadd.f32 %v7211_v11, %v1198_v23  ;;  %v1577_v23 = vadd.f32 %v6118_v32, %v1224_v6  ;;  %v1234_v32 = vadd.f32 %v6138_v14, %v5525_v40  ;;  %v1863_v14 = vld [vmem:[%s7152_s4] sm:$0x3] }
 0x24e   : > { %v1736_v9 = vmax.f32 %v1563_v49, 0.0  ;;  %v1735_v11 = vmax.f32 %v1561_v27, 0.0 }
 0x24f   : > { %v6185_v61 = vpop.f32.mrf.mxu0  ;;  %v6207_v58 = vpop.f32.mrf.mxu1  ;;  %v1811_v41 = vpack.c.bf16 %v1729_v33, %v1727_v37  ;;  %v1731_v57 = vmax.f32 %v1551_v36, 0.0  ;;  %v1218_v36 = vadd.f32 %v6088_v59, %v5549_v29 }
 0x251   : > { %v6190_v7 = vpop.f32.mrf.mxu0  ;;  %v1813_v46 = vpack.c.bf16 %v1733_v35, %v1731_v57  ;;  %v1587_v57 = vadd.f32 %v6146_v43, %v1234_v32  ;;  %v1571_v50 = vadd.f32 %v6097_v5, %v1218_v36  ;;  %v1232_v43 = vadd.f32 %v6131_v60, %v5549_v29 }
 0x252   : > { %v1744_v32 = vmax.f32 %v1583_v0, 0.0  ;;  %v1240_v60 = vadd.f32 %v6151_v25, %v5525_v40 }
 0x253   : > { %v6196_v10 = vpop.f32.mrf.mxu0  ;;  %2278 = vmatmul.mubr.bf16.gmra.mxu0 %v1809_v62  ;;  %v6218_v62 = vpop.f32.mrf.mxu1  ;;  %v1746_v27 = vmax.f32 %v1587_v57, 0.0  ;;  %v1585_v44 = vadd.f32 %v6140_v12, %v1232_v43 }
 0x254   : > { %2287 = vmatprep.mubr.bf16.mxu0 %v1812_v42  ;;  %v1738_v42 = vmax.f32 %v1567_v16, 0.0  ;;  %v1737_v16 = vmax.f32 %v1565_v52, 0.0  ;;  %v1593_v0 = vadd.f32 %v6161_v54, %v1240_v60 }
 0x255   : > { %v6201_v51 = vpop.f32.mrf.mxu0  ;;  %v6231_v33 = vpop.f32.mrf.mxu1  ;;  %v1820_v57 = vpack.c.bf16 %v1746_v27, %v1744_v32  ;;  %v1745_v12 = vmax.f32 %v1585_v44, 0.0  ;;  %v1238_v27 = vadd.f32 %v6144_v4, %v5549_v29 }
 0x256   : > { %v1816_v1 = vpack.c.bf16 %v1738_v42, %v1736_v9  ;;  %v1815_v42 = vpack.c.bf16 %v1737_v16, %v1735_v11  ;;  %v1739_v16 = vmax.f32 %v1571_v50, 0.0 }
 0x257   : > { %v6209_v19 = vpop.f32.mrf.mxu0 }
 0x259   : > { %v6214_v34 = vpop.f32.mrf.mxu0 }
 0x25b   : > { %v6220_v15 = vpop.f32.mrf.mxu0  ;;  %2288 = vmatmul.mubr.bf16.gmra.mxu0 %v1811_v41  ;;  %v6242_v41 = vpop.f32.mrf.mxu1 }
 0x25c   : > { %2297 = vmatprep.mubr.bf16.mxu0 %v1814_v20  ;;  %v1742_v20 = vmax.f32 %v1577_v23, 0.0  ;;  %v1741_v23 = vmax.f32 %v1575_v17, 0.0  ;;  %v1597_v17 = vadd.f32 %v6183_v31, %v1244_v8 }
 0x25d   : > { %v6225_v3 = vpop.f32.mrf.mxu0  ;;  %v6255_v49 = vpop.f32.mrf.mxu1 }
 0x25e   : > { %v1818_v59 = vpack.c.bf16 %v1742_v20, %v1740_v24  ;;  %v1817_v24 = vpack.c.bf16 %v1741_v23, %v1739_v16  ;;  %v1750_v43 = vmax.f32 %v1597_v17, 0.0 }
 0x25f   : > { %v6233_v28 = vpop.f32.mrf.mxu0  ;;  %v6269_v9 = vpop.f32.mrf.mxu1 }
 0x261   : > { %v6238_v37 = vpop.f32.mrf.mxu0  ;;  %v6286_v22 = vpop.f32.mrf.mxu1 }
 0x263   : > { %v6244_v26 = vpop.f32.mrf.mxu0  ;;  %2298 = vmatmul.mubr.bf16.gmra.mxu0 %v1813_v46  ;;  %v7213_v46 = vld [vmem:[#allocation15_spill] sm:$0xff] }
 0x264   : > { %2307 = vmatprep.mubr.bf16.mxu0 %v1816_v1  ;;  %v7214_v30 = vsub.s32 1, %v7213_v46  ;;  %v7215_v1 = vsub.s32 0, %v7213_v46 }
 0x265   : > { %v6249_v21 = vpop.f32.mrf.mxu0 }
 0x266   : > { %v6274_v52 = vrot.slane %v1863_v14, %v7214_v30  ;;  %v6280_v56 = vrot.slane %v1863_v14, %v7215_v1  ;;  %v1581_v14 = vadd.f32 %v6125_v13, %v1228_v39  ;;  %v1254_v13 = vadd.f32 %v6190_v7, %v5525_v40 }
 0x267   : > { %v6257_v35 = vpop.f32.mrf.mxu0  ;;  %v1748_v39 = vmax.f32 %v1593_v0, 0.0 }
 0x268   : > { %v1607_v4 = vadd.f32 %v6231_v33, %v1254_v13 }
 0x269   : > { %v6262_v6 = vpop.f32.mrf.mxu0  ;;  %v1822_v44 = vpack.c.bf16 %v1750_v43, %v1748_v39  ;;  %v1260_v43 = vadd.f32 %v6201_v51, %v5525_v40 }
 0x26a   : > { %v1754_v0 = vmax.f32 %v1607_v4, 0.0 }
 0x26b   : > { %v2069_v2 = vpop.f32.mrf.mxu0  ;;  %2308 = vmatmul.mubr.bf16.gmra.mxu0 %v1815_v42 }
 0x26c   : > { %2317 = vmatprep.mubr.bf16.mxu0 %v1818_v59  ;;  %v2070_v45 = vadd.f32 %v2069_v2, %v6280_v56  ;;  %v6297_v59 = vpop.f32.mrf.mxu1  ;;  %v1242_v2 = vadd.f32 %v6159_v63, %v5549_v29 }
 0x26d   : > { %v2071_v5 = vpop.f32.mrf.mxu0 }
 0x26e   : > { %v2072_v11 = vadd.f32 %v2071_v5, %v6274_v52  ;;  %v2388_v31 = vmax.f32 %v2070_v45, 0.0  ;;  %v1743_v5 = vmax.f32 %v1581_v14, 0.0  ;;  %v6306_v8 = vpop.f32.mrf.mxu1  ;;  %v1595_v7 = vadd.f32 %v6170_v18, %v1242_v2 }
 0x26f   : > { %v2073_v20 = vpop.f32.mrf.mxu0  ;;  %v1591_v45 = vadd.f32 %v6153_v53, %v1238_v27  ;;  %v1264_v53 = vadd.f32 %v6214_v34, %v5525_v40 }
 0x270   : > { %v2074_v36 = vadd.f32 %v2073_v20, %v6280_v56  ;;  %v2389_v46 = vmax.f32 %v2072_v11, 0.0  ;;  %v1250_v20 = vadd.f32 %v6177_v48, %v5525_v40  ;;  %v1819_v60 = vpack.c.bf16 %v1745_v12, %v1743_v5  ;;  %v6317_v48 = vpop.f32.mrf.mxu1 }
 0x271   : > { %v2075_v42 = vpop.f32.mrf.mxu0  ;;  %v1749_v14 = vmax.f32 %v1595_v7, 0.0  ;;  %v1248_v12 = vadd.f32 %v6172_v55, %v5549_v29  ;;  %v1617_v55 = vadd.f32 %v6286_v22, %v1264_v53 }
 0x272   : > { %v2076_v38 = vadd.f32 %v2075_v42, %v6274_v52  ;;  %v2390_v25 = vmax.f32 %v2074_v36, 0.0  ;;  %v1626_v2 = vpop.f32.mrf.mxu1 }
 0x273   : > { %v2079_v50 = vpop.f32.mrf.mxu0  ;;  %2318 = vmatmul.mubr.bf16.gmra.mxu0 %v1817_v24  ;;  %v1601_v39 = vadd.f32 %v6194_v47, %v1248_v12  ;;  %v1758_v4 = vmax.f32 %v1617_v55, 0.0  ;;  %v1274_v47 = vadd.f32 %v6238_v37, %v5525_v40 }
 0x274   : > { %v2391_v30 = vmax.f32 %v2076_v38, 0.0  ;;  %2327 = vmatprep.mubr.bf16.mxu0 %v1820_v57  ;;  %v2516_v54 = vpack.c.bf16 %v2390_v25, %v2388_v31  ;;  %v2080_v11 = vadd.f32 %v2079_v50, %v6280_v56  ;;  %v1603_v38 = vadd.f32 %v6207_v58, %v1250_v20  ;;  %v6335_v51 = vpop.f32.mrf.mxu1 }
 0x275   : > { %v2081_v23 = vpop.f32.mrf.mxu0  ;;  %v1252_v25 = vadd.f32 %v6185_v61, %v5549_v29 }
 0x276   : > { %v2517_v1 = vpack.c.bf16 %v2391_v30, %v2389_v46  ;;  %v2082_v63 = vadd.f32 %v2081_v23, %v6274_v52  ;;  %v2392_v33 = vmax.f32 %v2080_v11, 0.0  ;;  %v1747_v30 = vmax.f32 %v1591_v45, 0.0 }
 0x277   : > { %v2083_v16 = vpop.f32.mrf.mxu0  ;;  %v1752_v23 = vmax.f32 %v1603_v38, 0.0  ;;  %v1605_v34 = vadd.f32 %v6218_v62, %v1252_v25  ;;  %v1262_v11 = vadd.f32 %v6209_v19, %v5549_v29  ;;  %v1258_v45 = vadd.f32 %v6196_v10, %v5549_v29 }
 0x278   : > { %v2084_v32 = vadd.f32 %v2083_v16, %v6280_v56  ;;  %2747 = vmatprep.mubr.bf16.mxu1 %v2517_v1  ;;  %v2393_v57 = vmax.f32 %v2082_v63, 0.0  ;;  %v1821_v1 = vpack.c.bf16 %v1749_v14, %v1747_v30  ;;  %v1627_v10 = vadd.f32 %v1626_v2, %v1274_v47 }
 0x279   : > { %v2085_v36 = vpop.f32.mrf.mxu0  ;;  %2748 = vmatmul.mubr.bf16.vlgmr.msra.gmra.mxu1 %v2516_v54  ;;  %v1824_v16 = vpack.c.bf16 %v1754_v0, %v1752_v23  ;;  %v1753_v7 = vmax.f32 %v1605_v34, 0.0  ;;  %v1615_v37 = vadd.f32 %v6269_v9, %v1262_v11  ;;  %v1611_v53 = vadd.f32 %v6242_v41, %v1258_v45 }
 0x27a   : > { %v2086_v24 = vadd.f32 %v2085_v36, %v6274_v52  ;;  %v2394_v42 = vmax.f32 %v2084_v32, 0.0  ;;  %v1613_v32 = vadd.f32 %v6255_v49, %v1260_v43  ;;  %v1272_v23 = vadd.f32 %v6233_v28, %v5549_v29 }
 0x27b   : > { %v2089_v17 = vpop.f32.mrf.mxu0  ;;  %2328 = vmatmul.mubr.bf16.gmra.mxu0 %v1819_v60  ;;  %v1757_v9 = vmax.f32 %v1615_v37, 0.0  ;;  %v1268_v34 = vadd.f32 %v6220_v15, %v5549_v29 }
 0x27c   : > { %v2395_v18 = vmax.f32 %v2086_v24, 0.0  ;;  %2337 = vmatprep.mubr.bf16.mxu0 %v1822_v44  ;;  %v2518_v58 = vpack.c.bf16 %v2394_v42, %v2392_v33  ;;  %v2090_v5 = vadd.f32 %v2089_v17, %v6280_v56  ;;  %v1751_v44 = vmax.f32 %v1601_v39, 0.0  ;;  %v1632_v42 = vpop.f32.mrf.mxu1 }
 0x27d   : > { %v2091_v50 = vpop.f32.mrf.mxu0  ;;  %v1756_v38 = vmax.f32 %v1613_v32, 0.0 }
 0x27e   : > { %v2519_v46 = vpack.c.bf16 %v2395_v18, %v2393_v57  ;;  %v2092_v61 = vadd.f32 %v2091_v50, %v6274_v52  ;;  %v2396_v22 = vmax.f32 %v2090_v5, 0.0  ;;  %v1270_v57 = vadd.f32 %v6225_v3, %v5525_v40 }
 0x27f   : > { %v2093_v31 = vpop.f32.mrf.mxu0  ;;  %v1823_v14 = vpack.c.bf16 %v1753_v7, %v1751_v44  ;;  %v1826_v0 = vpack.c.bf16 %v1758_v4, %v1756_v38 }
 0x280   : > { %v2094_v13 = vadd.f32 %v2093_v31, %v6280_v56  ;;  %2755 = vmatprep.mubr.bf16.mxu1 %v2519_v46  ;;  %v2397_v60 = vmax.f32 %v2092_v61, 0.0  ;;  %v1634_v46 = vpop.f32.mrf.mxu1  ;;  %v1623_v12 = vadd.f32 %v6306_v8, %v1270_v57  ;;  %v1762_v61 = vmax.f32 %v1627_v10, 0.0 }
 0x281   : > { %v2095_v27 = vpop.f32.mrf.mxu0  ;;  %2756 = vmatmul.mubr.bf16.gmra.mxu1 %v2518_v58 }
 0x282   : > { %v2096_v54 = vadd.f32 %v2095_v27, %v6274_v52  ;;  %v2398_v20 = vmax.f32 %v2094_v13, 0.0  ;;  %v1284_v13 = vadd.f32 %v6262_v6, %v5525_v40  ;;  %v1636_v5 = vpop.f32.mrf.mxu1  ;;  %v1760_v55 = vmax.f32 %v1623_v12, 0.0 }
 0x283   : > { %v2099_v63 = vpop.f32.mrf.mxu0  ;;  %2338 = vmatmul.mubr.bf16.gmra.mxu0 %v1821_v1  ;;  %v1755_v1 = vmax.f32 %v1611_v53, 0.0  ;;  %v1625_v6 = vadd.f32 %v6317_v48, %v1272_v23  ;;  %v1282_v48 = vadd.f32 %v6257_v35, %v5549_v29 }
 0x284   : > { %v2399_v62 = vmax.f32 %v2096_v54, 0.0  ;;  %2347 = vmatprep.mubr.bf16.mxu0 %v1824_v16  ;;  %v2520_v49 = vpack.c.bf16 %v2398_v20, %v2396_v22  ;;  %v2100_v25 = vadd.f32 %v2099_v63, %v6280_v56  ;;  %v1280_v54 = vadd.f32 %v6249_v21, %v5525_v40 }
 0x285   : > { %v2101_v36 = vpop.f32.mrf.mxu0  ;;  %v1825_v39 = vpack.c.bf16 %v1757_v9, %v1755_v1  ;;  %v1637_v15 = vadd.f32 %v1636_v5, %v1284_v13 }
 0x286   : > { %v2521_v24 = vpack.c.bf16 %v2399_v62, %v2397_v60  ;;  %v2102_v19 = vadd.f32 %v2101_v36, %v6274_v52  ;;  %v2400_v43 = vmax.f32 %v2100_v25, 0.0  ;;  %v1828_v60 = vpack.c.bf16 %v1762_v61, %v1760_v55 }
 0x287   : > { %v2103_v17 = vpop.f32.mrf.mxu0  ;;  %v1621_v62 = vadd.f32 %v6297_v59, %v1268_v34  ;;  %v1633_v21 = vadd.f32 %v1632_v42, %v1280_v54  ;;  %v1761_v36 = vmax.f32 %v1625_v6, 0.0 }
 0x288   : > { %v2104_v18 = vadd.f32 %v2103_v17, %v6280_v56  ;;  %2763 = vmatprep.mubr.bf16.mxu1 %v2521_v24  ;;  %v2401_v58 = vmax.f32 %v2102_v19, 0.0  ;;  %v1766_v24 = vmax.f32 %v1637_v15, 0.0 }
 0x289   : > { %v2105_v33 = vpop.f32.mrf.mxu0  ;;  %2764 = vmatmul.mubr.bf16.gmra.mxu1 %v2520_v49  ;;  %v1759_v45 = vmax.f32 %v1621_v62, 0.0  ;;  %v1278_v49 = vadd.f32 %v6244_v26, %v5549_v29  ;;  %v1764_v38 = vmax.f32 %v1633_v21, 0.0 }
 0x28a   : > { %v2106_v50 = vadd.f32 %v2105_v33, %v6274_v52  ;;  %v2402_v3 = vmax.f32 %v2104_v18, 0.0  ;;  %v1635_v18 = vadd.f32 %v1634_v46, %v1282_v48 }
 0x28b   : > { %v2109_v30 = vpop.f32.mrf.mxu0  ;;  %2348 = vmatmul.mubr.bf16.gmra.mxu0 %v1823_v14  ;;  %v1827_v19 = vpack.c.bf16 %v1761_v36, %v1759_v45  ;;  %v1830_v25 = vpack.c.bf16 %v1766_v24, %v1764_v38  ;;  %v1631_v33 = vadd.f32 %v6335_v51, %v1278_v49 }
 0x28c   : > { %v2403_v31 = vmax.f32 %v2106_v50, 0.0  ;;  %2357 = vmatprep.mubr.bf16.mxu0 %v1826_v0  ;;  %v2522_v8 = vpack.c.bf16 %v2402_v3, %v2400_v43  ;;  %v2110_v20 = vadd.f32 %v2109_v30, %v6280_v56  ;;  %v1765_v0 = vmax.f32 %v1635_v18, 0.0 }
 0x28d   : > { %v2111_v2 = vpop.f32.mrf.mxu0  ;;  %v1763_v46 = vmax.f32 %v1631_v33, 0.0 }
 0x28e   : > { %v2523_v41 = vpack.c.bf16 %v2403_v31, %v2401_v58  ;;  %v2112_v28 = vadd.f32 %v2111_v2, %v6274_v52  ;;  %v2404_v4 = vmax.f32 %v2110_v20, 0.0 }
 0x28f   : > { %v2113_v27 = vpop.f32.mrf.mxu0  ;;  %v1829_v23 = vpack.c.bf16 %v1765_v0, %v1763_v46 }
 0x290   : > { %v2114_v16 = vadd.f32 %v2113_v27, %v6280_v56  ;;  %2771 = vmatprep.mubr.bf16.mxu1 %v2523_v41  ;;  %v2405_v11 = vmax.f32 %v2112_v28, 0.0 }
 0x291   : > { %v2115_v63 = vpop.f32.mrf.mxu0  ;;  %2772 = vmatmul.mubr.bf16.gmra.mxu1 %v2522_v8 }
 0x292   : > { %v2116_v32 = vadd.f32 %v2115_v63, %v6274_v52  ;;  %v2406_v7 = vmax.f32 %v2114_v16, 0.0 }
 0x293   : > { %v2119_v40 = vpop.f32.mrf.mxu0  ;;  %2358 = vmatmul.mubr.bf16.gmra.mxu0 %v1825_v39 }
 0x294   : > { %v2407_v22 = vmax.f32 %v2116_v32, 0.0  ;;  %2367 = vmatprep.mubr.bf16.mxu0 %v1828_v60  ;;  %v2524_v59 = vpack.c.bf16 %v2406_v7, %v2404_v4  ;;  %v2120_v35 = vadd.f32 %v2119_v40, %v6280_v56 }
 0x295   : > { %v2121_v47 = vpop.f32.mrf.mxu0 }
 0x296   : > { %v2525_v44 = vpack.c.bf16 %v2407_v22, %v2405_v11  ;;  %v2122_v42 = vadd.f32 %v2121_v47, %v6274_v52  ;;  %v2408_v53 = vmax.f32 %v2120_v35, 0.0 }
 0x297   : > { %v2123_v17 = vpop.f32.mrf.mxu0 }
 0x298   : > { %v2124_v57 = vadd.f32 %v2123_v17, %v6280_v56  ;;  %2779 = vmatprep.mubr.bf16.mxu1 %v2525_v44  ;;  %v2409_v10 = vmax.f32 %v2122_v42, 0.0 }
 0x299   : > { %v2125_v14 = vpop.f32.mrf.mxu0  ;;  %2780 = vmatmul.mubr.bf16.gmra.mxu1 %v2524_v59 }
 0x29a   : > { %v2126_v37 = vadd.f32 %v2125_v14, %v6274_v52  ;;  %v2410_v29 = vmax.f32 %v2124_v57, 0.0 }
 0x29b   : > { %v2129_v26 = vpop.f32.mrf.mxu0  ;;  %2368 = vmatmul.mubr.bf16.gmra.mxu0 %v1827_v19 }
 0x29c   : > { %v2411_v50 = vmax.f32 %v2126_v37, 0.0  ;;  %2377 = vmatprep.mubr.bf16.mxu0 %v1830_v25  ;;  %v2526_v12 = vpack.c.bf16 %v2410_v29, %v2408_v53  ;;  %v2130_v51 = vadd.f32 %v2129_v26, %v6280_v56 }
 0x29d   : > { %v2131_v3 = vpop.f32.mrf.mxu0 }
 0x29e   : > { %v2527_v30 = vpack.c.bf16 %v2411_v50, %v2409_v10  ;;  %v2132_v31 = vadd.f32 %v2131_v3, %v6274_v52  ;;  %v2412_v34 = vmax.f32 %v2130_v51, 0.0 }
 0x29f   : > { %v2133_v58 = vpop.f32.mrf.mxu0 }
 0x2a0   : > { %v2134_v9 = vadd.f32 %v2133_v58, %v6280_v56  ;;  %2787 = vmatprep.mubr.bf16.mxu1 %v2527_v30  ;;  %v2413_v41 = vmax.f32 %v2132_v31, 0.0 }
 0x2a1   : > { %v2135_v43 = vpop.f32.mrf.mxu0  ;;  %2788 = vmatmul.mubr.bf16.gmra.mxu1 %v2526_v12 }
 0x2a2   : > { %v2136_v2 = vadd.f32 %v2135_v43, %v6274_v52  ;;  %v2414_v61 = vmax.f32 %v2134_v9, 0.0 }
 0x2a3   : > { %v2139_v13 = vpop.f32.mrf.mxu0  ;;  %2378 = vmatmul.mubr.bf16.gmra.mxu0 %v1829_v23 }
 0x2a4   : > { %v2415_v1 = vmax.f32 %v2136_v2, 0.0  ;;  %v2528_v27 = vpack.c.bf16 %v2414_v61, %v2412_v34  ;;  %v2140_v16 = vadd.f32 %v2139_v13, %v6280_v56 }
 0x2a5   : > { %v2141_v5 = vpop.f32.mrf.mxu0 }
 0x2a6   : > { %v2529_v8 = vpack.c.bf16 %v2415_v1, %v2413_v41  ;;  %v2142_v54 = vadd.f32 %v2141_v5, %v6274_v52  ;;  %v2416_v60 = vmax.f32 %v2140_v16, 0.0 }
 0x2a7   : > { %v2143_v55 = vpop.f32.mrf.mxu0 }
 0x2a8   : > { %v2144_v28 = vadd.f32 %v2143_v55, %v6280_v56  ;;  %2795 = vmatprep.mubr.bf16.mxu1 %v2529_v8  ;;  %v2417_v15 = vmax.f32 %v2142_v54, 0.0 }
 0x2a9   : > { %v2145_v39 = vpop.f32.mrf.mxu0  ;;  %2796 = vmatmul.mubr.bf16.gmra.mxu1 %v2528_v27 }
 0x2aa   : > { %v2146_v6 = vadd.f32 %v2145_v39, %v6274_v52  ;;  %v2418_v20 = vmax.f32 %v2144_v28, 0.0 }
 0x2ab   : > { %v2149_v63 = vpop.f32.mrf.mxu0 }
 0x2ac   : > { %v2419_v32 = vmax.f32 %v2146_v6, 0.0  ;;  %v2530_v40 = vpack.c.bf16 %v2418_v20, %v2416_v60  ;;  %v2150_v36 = vadd.f32 %v2149_v63, %v6280_v56 }
 0x2ad   : > { %v2151_v62 = vpop.f32.mrf.mxu0 }
 0x2ae   : > { %v2531_v7 = vpack.c.bf16 %v2419_v32, %v2417_v15  ;;  %v2152_v11 = vadd.f32 %v2151_v62, %v6274_v52  ;;  %v2420_v49 = vmax.f32 %v2150_v36, 0.0 }
 0x2af   : > { %v2153_v21 = vpop.f32.mrf.mxu0 }
 0x2b0   : > { %v2154_v22 = vadd.f32 %v2153_v21, %v6280_v56  ;;  %2803 = vmatprep.mubr.bf16.mxu1 %v2531_v7  ;;  %v2421_v44 = vmax.f32 %v2152_v11, 0.0 }
 0x2b1   : > { %v2155_v48 = vpop.f32.mrf.mxu0  ;;  %2804 = vmatmul.mubr.bf16.gmra.mxu1 %v2530_v40 }
 0x2b2   : > { %v2156_v4 = vadd.f32 %v2155_v48, %v6274_v52  ;;  %v2422_v47 = vmax.f32 %v2154_v22, 0.0 }
 0x2b3   : > { %v2159_v24 = vpop.f32.mrf.mxu0 }
 0x2b4   : > { %v2423_v45 = vmax.f32 %v2156_v4, 0.0  ;;  %v2532_v38 = vpack.c.bf16 %v2422_v47, %v2420_v49  ;;  %v2160_v18 = vadd.f32 %v2159_v24, %v6280_v56 }
 0x2b5   : > { %v2161_v59 = vpop.f32.mrf.mxu0 }
 0x2b6   : > { %v2533_v17 = vpack.c.bf16 %v2423_v45, %v2421_v44  ;;  %v2162_v57 = vadd.f32 %v2161_v59, %v6274_v52  ;;  %v2424_v26 = vmax.f32 %v2160_v18, 0.0 }
 0x2b7   : > { %v2163_v42 = vpop.f32.mrf.mxu0 }
 0x2b8   : > { %v2164_v19 = vadd.f32 %v2163_v42, %v6280_v56  ;;  %2811 = vmatprep.mubr.bf16.mxu1 %v2533_v17  ;;  %v2425_v33 = vmax.f32 %v2162_v57, 0.0 }
 0x2b9   : > { %v2165_v35 = vpop.f32.mrf.mxu0  ;;  %2812 = vmatmul.mubr.bf16.gmra.mxu1 %v2532_v38 }
 0x2ba   : > { %v2166_v14 = vadd.f32 %v2165_v35, %v6274_v52  ;;  %v2426_v37 = vmax.f32 %v2164_v19, 0.0 }
 0x2bb   : > { %v2169_v25 = vpop.f32.mrf.mxu0 }
 0x2bc   : > { %v2427_v29 = vmax.f32 %v2166_v14, 0.0  ;;  %v2534_v0 = vpack.c.bf16 %v2426_v37, %v2424_v26  ;;  %v2170_v46 = vadd.f32 %v2169_v25, %v6280_v56 }
 0x2bd   : > { %v2171_v10 = vpop.f32.mrf.mxu0 }
 0x2be   : > { %v2535_v50 = vpack.c.bf16 %v2427_v29, %v2425_v33  ;;  %v2172_v3 = vadd.f32 %v2171_v10, %v6274_v52  ;;  %v2428_v43 = vmax.f32 %v2170_v46, 0.0 }
 0x2bf   : > { %v2173_v53 = vpop.f32.mrf.mxu0 }
 0x2c0   : > { %v2174_v30 = vadd.f32 %v2173_v53, %v6280_v56  ;;  %2819 = vmatprep.mubr.bf16.mxu1 %v2535_v50  ;;  %v2429_v23 = vmax.f32 %v2172_v3, 0.0 }
 0x2c1   : > { %v2175_v12 = vpop.f32.mrf.mxu0  ;;  %2820 = vmatmul.mubr.bf16.gmra.mxu1 %v2534_v0 }
 0x2c2   : > { %v2176_v58 = vadd.f32 %v2175_v12, %v6274_v52  ;;  %v2430_v31 = vmax.f32 %v2174_v30, 0.0 }
 0x2c3   : > { %v2179_v9 = vpop.f32.mrf.mxu0 }
 0x2c4   : > { %v2431_v51 = vmax.f32 %v2176_v58, 0.0  ;;  %v2536_v13 = vpack.c.bf16 %v2430_v31, %v2428_v43  ;;  %v2180_v5 = vadd.f32 %v2179_v9, %v6280_v56 }
 0x2c5   : > { %v2181_v2 = vpop.f32.mrf.mxu0 }
 0x2c6   : > { %v2537_v61 = vpack.c.bf16 %v2431_v51, %v2429_v23  ;;  %v2182_v1 = vadd.f32 %v2181_v2, %v6274_v52  ;;  %v2432_v39 = vmax.f32 %v2180_v5, 0.0 }
 0x2c7   : > { %v2183_v41 = vpop.f32.mrf.mxu0 }
 0x2c8   : > { %v2184_v34 = vadd.f32 %v2183_v41, %v6280_v56  ;;  %2827 = vmatprep.mubr.bf16.mxu1 %v2537_v61  ;;  %v2433_v28 = vmax.f32 %v2182_v1, 0.0 }
 0x2c9   : > { %v2185_v8 = vpop.f32.mrf.mxu0  ;;  %2828 = vmatmul.mubr.bf16.gmra.mxu1 %v2536_v13 }
 0x2ca   : > { %v2186_v27 = vadd.f32 %v2185_v8, %v6274_v52  ;;  %v2434_v55 = vmax.f32 %v2184_v34, 0.0 }
 0x2cb   : > { %v2189_v54 = vpop.f32.mrf.mxu0 }
 0x2cc   : > { %v2435_v16 = vmax.f32 %v2186_v27, 0.0  ;;  %v2538_v63 = vpack.c.bf16 %v2434_v55, %v2432_v39  ;;  %v2190_v62 = vadd.f32 %v2189_v54, %v6280_v56 }
 0x2cd   : > { %v2191_v6 = vpop.f32.mrf.mxu0 }
 0x2ce   : > { %v2539_v20 = vpack.c.bf16 %v2435_v16, %v2433_v28  ;;  %v2192_v32 = vadd.f32 %v2191_v6, %v6274_v52  ;;  %v2436_v48 = vmax.f32 %v2190_v62, 0.0 }
 0x2cf   : > { %v2193_v15 = vpop.f32.mrf.mxu0 }
 0x2d0   : > { %v2194_v60 = vadd.f32 %v2193_v15, %v6280_v56  ;;  %2835 = vmatprep.mubr.bf16.mxu1 %v2539_v20  ;;  %v2437_v22 = vmax.f32 %v2192_v32, 0.0 }
 0x2d1   : > { %v2195_v7 = vpop.f32.mrf.mxu0  ;;  %2836 = vmatmul.mubr.bf16.gmra.mxu1 %v2538_v63 }
 0x2d2   : > { %v2196_v40 = vadd.f32 %v2195_v7, %v6274_v52  ;;  %v2438_v21 = vmax.f32 %v2194_v60, 0.0 }
 0x2d3   : > { %v2199_v11 = vpop.f32.mrf.mxu0 }
 0x2d4   : > { %v2439_v36 = vmax.f32 %v2196_v40, 0.0  ;;  %v2540_v24 = vpack.c.bf16 %v2438_v21, %v2436_v48  ;;  %v2200_v59 = vadd.f32 %v2199_v11, %v6280_v56 }
 0x2d5   : > { %v2201_v4 = vpop.f32.mrf.mxu0 }
 0x2d6   : > { %v2541_v47 = vpack.c.bf16 %v2439_v36, %v2437_v22  ;;  %v2202_v45 = vadd.f32 %v2201_v4, %v6274_v52  ;;  %v2440_v35 = vmax.f32 %v2200_v59, 0.0 }
 0x2d7   : > { %v2203_v44 = vpop.f32.mrf.mxu0 }
 0x2d8   : > { %v2204_v49 = vadd.f32 %v2203_v44, %v6280_v56  ;;  %2843 = vmatprep.mubr.bf16.mxu1 %v2541_v47  ;;  %v2441_v19 = vmax.f32 %v2202_v45, 0.0 }
 0x2d9   : > { %v2205_v17 = vpop.f32.mrf.mxu0  ;;  %2844 = vmatmul.mubr.bf16.gmra.mxu1 %v2540_v24 }
 0x2da   : > { %v2206_v38 = vadd.f32 %v2205_v17, %v6274_v52  ;;  %v2442_v42 = vmax.f32 %v2204_v49, 0.0 }
 0x2db   : > { %v2209_v57 = vpop.f32.mrf.mxu0 }
 0x2dc   : > { %v2443_v18 = vmax.f32 %v2206_v38, 0.0  ;;  %v2542_v25 = vpack.c.bf16 %v2442_v42, %v2440_v35  ;;  %v2210_v10 = vadd.f32 %v2209_v57, %v6280_v56 }
 0x2dd   : > { %v2211_v14 = vpop.f32.mrf.mxu0 }
 0x2de   : > { %v2543_v37 = vpack.c.bf16 %v2443_v18, %v2441_v19  ;;  %v2212_v29 = vadd.f32 %v2211_v14, %v6274_v52  ;;  %v2444_v12 = vmax.f32 %v2210_v10, 0.0 }
 0x2df   : > { %v2213_v33 = vpop.f32.mrf.mxu0 }
 0x2e0   : > { %v2214_v26 = vadd.f32 %v2213_v33, %v6280_v56  ;;  %2851 = vmatprep.mubr.bf16.mxu1 %v2543_v37  ;;  %v2445_v30 = vmax.f32 %v2212_v29, 0.0 }
 0x2e1   : > { %v2215_v50 = vpop.f32.mrf.mxu0  ;;  %2852 = vmatmul.mubr.bf16.gmra.mxu1 %v2542_v25 }
 0x2e2   : > { %v2216_v0 = vadd.f32 %v2215_v50, %v6274_v52  ;;  %v2446_v53 = vmax.f32 %v2214_v26, 0.0 }
 0x2e3   : > { %v2219_v3 = vpop.f32.mrf.mxu0 }
 0x2e4   : > { %v2447_v46 = vmax.f32 %v2216_v0, 0.0  ;;  %v2544_v9 = vpack.c.bf16 %v2446_v53, %v2444_v12  ;;  %v2220_v2 = vadd.f32 %v2219_v3, %v6280_v56 }
 0x2e5   : > { %v2221_v58 = vpop.f32.mrf.mxu0 }
 0x2e6   : > { %v2545_v31 = vpack.c.bf16 %v2447_v46, %v2445_v30  ;;  %v2222_v51 = vadd.f32 %v2221_v58, %v6274_v52  ;;  %v2448_v8 = vmax.f32 %v2220_v2, 0.0 }
 0x2e7   : > { %v2223_v23 = vpop.f32.mrf.mxu0 }
 0x2e8   : > { %v2224_v43 = vadd.f32 %v2223_v23, %v6280_v56  ;;  %2859 = vmatprep.mubr.bf16.mxu1 %v2545_v31  ;;  %v2449_v34 = vmax.f32 %v2222_v51, 0.0 }
 0x2e9   : > { %v2225_v61 = vpop.f32.mrf.mxu0  ;;  %2860 = vmatmul.mubr.bf16.gmra.mxu1 %v2544_v9 }
 0x2ea   : > { %v2226_v13 = vadd.f32 %v2225_v61, %v6274_v52  ;;  %v2450_v41 = vmax.f32 %v2224_v43, 0.0 }
 0x2eb   : > { %v2229_v1 = vpop.f32.mrf.mxu0 }
 0x2ec   : > { %v2451_v5 = vmax.f32 %v2226_v13, 0.0  ;;  %v2546_v54 = vpack.c.bf16 %v2450_v41, %v2448_v8  ;;  %v2230_v6 = vadd.f32 %v2229_v1, %v6280_v56 }
 0x2ed   : > { %v2231_v27 = vpop.f32.mrf.mxu0 }
 0x2ee   : > { %v2547_v55 = vpack.c.bf16 %v2451_v5, %v2449_v34  ;;  %v2232_v16 = vadd.f32 %v2231_v27, %v6274_v52  ;;  %v2452_v7 = vmax.f32 %v2230_v6, 0.0 }
 0x2ef   : > { %v2233_v28 = vpop.f32.mrf.mxu0 }
 0x2f0   : > { %v2234_v39 = vadd.f32 %v2233_v28, %v6280_v56  ;;  %2867 = vmatprep.mubr.bf16.mxu1 %v2547_v55  ;;  %v2453_v60 = vmax.f32 %v2232_v16, 0.0 }
 0x2f1   : > { %v2235_v20 = vpop.f32.mrf.mxu0  ;;  %2868 = vmatmul.mubr.bf16.gmra.mxu1 %v2546_v54 }
 0x2f2   : > { %v2236_v63 = vadd.f32 %v2235_v20, %v6274_v52  ;;  %v2454_v15 = vmax.f32 %v2234_v39, 0.0 }
 0x2f3   : > { %v2239_v32 = vpop.f32.mrf.mxu0 }
 0x2f4   : > { %v2455_v62 = vmax.f32 %v2236_v63, 0.0  ;;  %v2548_v11 = vpack.c.bf16 %v2454_v15, %v2452_v7  ;;  %v2240_v4 = vadd.f32 %v2239_v32, %v6280_v56 }
 0x2f5   : > { %v2241_v40 = vpop.f32.mrf.mxu0 }
 0x2f6   : > { %v2549_v21 = vpack.c.bf16 %v2455_v62, %v2453_v60  ;;  %v2242_v36 = vadd.f32 %v2241_v40, %v6274_v52  ;;  %v2456_v17 = vmax.f32 %v2240_v4, 0.0 }
 0x2f7   : > { %v2243_v22 = vpop.f32.mrf.mxu0 }
 0x2f8   : > { %v2244_v48 = vadd.f32 %v2243_v22, %v6280_v56  ;;  %2875 = vmatprep.mubr.bf16.mxu1 %v2549_v21  ;;  %v2457_v49 = vmax.f32 %v2242_v36, 0.0 }
 0x2f9   : > { %v2245_v47 = vpop.f32.mrf.mxu0  ;;  %2876 = vmatmul.mubr.bf16.gmra.mxu1 %v2548_v11 }
 0x2fa   : > { %v2246_v24 = vadd.f32 %v2245_v47, %v6274_v52  ;;  %v2458_v44 = vmax.f32 %v2244_v48, 0.0 }
 0x2fb   : > { %v2249_v45 = vpop.f32.mrf.mxu0 }
 0x2fc   : > { %v2459_v59 = vmax.f32 %v2246_v24, 0.0  ;;  %v2550_v57 = vpack.c.bf16 %v2458_v44, %v2456_v17  ;;  %v2250_v14 = vadd.f32 %v2249_v45, %v6280_v56 }
 0x2fd   : > { %v2251_v38 = vpop.f32.mrf.mxu0 }
 0x2fe   : > { %v2551_v42 = vpack.c.bf16 %v2459_v59, %v2457_v49  ;;  %v2252_v18 = vadd.f32 %v2251_v38, %v6274_v52  ;;  %v2460_v50 = vmax.f32 %v2250_v14, 0.0 }
 0x2ff   : > { %v2253_v19 = vpop.f32.mrf.mxu0 }
 0x300   : > { %v2254_v35 = vadd.f32 %v2253_v19, %v6280_v56  ;;  %2883 = vmatprep.mubr.bf16.mxu1 %v2551_v42  ;;  %v2461_v26 = vmax.f32 %v2252_v18, 0.0 }
 0x301   : > { %v2255_v37 = vpop.f32.mrf.mxu0  ;;  %2884 = vmatmul.mubr.bf16.gmra.mxu1 %v2550_v57 }
 0x302   : > { %v2256_v25 = vadd.f32 %v2255_v37, %v6274_v52  ;;  %v2462_v33 = vmax.f32 %v2254_v35, 0.0 }
 0x303   : > { %v2259_v29 = vpop.f32.mrf.mxu0 }
 0x304   : > { %v2463_v10 = vmax.f32 %v2256_v25, 0.0  ;;  %v2552_v3 = vpack.c.bf16 %v2462_v33, %v2460_v50  ;;  %v2260_v58 = vadd.f32 %v2259_v29, %v6280_v56 }
 0x305   : > { %v2261_v0 = vpop.f32.mrf.mxu0 }
 0x306   : > { %v2553_v53 = vpack.c.bf16 %v2463_v10, %v2461_v26  ;;  %v2262_v46 = vadd.f32 %v2261_v0, %v6274_v52  ;;  %v2464_v61 = vmax.f32 %v2260_v58, 0.0 }
 0x307   : > { %v2263_v30 = vpop.f32.mrf.mxu0 }
 0x308   : > { %v2264_v12 = vadd.f32 %v2263_v30, %v6280_v56  ;;  %2891 = vmatprep.mubr.bf16.mxu1 %v2553_v53  ;;  %v2465_v43 = vmax.f32 %v2262_v46, 0.0 }
 0x309   : > { %v2265_v31 = vpop.f32.mrf.mxu0  ;;  %2892 = vmatmul.mubr.bf16.gmra.mxu1 %v2552_v3 }
 0x30a   : > { %v2266_v9 = vadd.f32 %v2265_v31, %v6274_v52  ;;  %v2466_v23 = vmax.f32 %v2264_v12, 0.0 }
 0x30b   : > { %v2269_v51 = vpop.f32.mrf.mxu0 }
 0x30c   : > { %v2467_v2 = vmax.f32 %v2266_v9, 0.0  ;;  %v2554_v1 = vpack.c.bf16 %v2466_v23, %v2464_v61  ;;  %v2270_v27 = vadd.f32 %v2269_v51, %v6280_v56 }
 0x30d   : > { %v2271_v13 = vpop.f32.mrf.mxu0 }
 0x30e   : > { %v2555_v41 = vpack.c.bf16 %v2467_v2, %v2465_v43  ;;  %v2272_v5 = vadd.f32 %v2271_v13, %v6274_v52  ;;  %v2468_v20 = vmax.f32 %v2270_v27, 0.0 }
 0x30f   : > { %v2273_v34 = vpop.f32.mrf.mxu0 }
 0x310   : > { %v2274_v8 = vadd.f32 %v2273_v34, %v6280_v56  ;;  %2899 = vmatprep.mubr.bf16.mxu1 %v2555_v41  ;;  %v2469_v39 = vmax.f32 %v2272_v5, 0.0 }
 0x311   : > { %v2275_v55 = vpop.f32.mrf.mxu0  ;;  %2900 = vmatmul.mubr.bf16.gmra.mxu1 %v2554_v1 }
 0x312   : > { %v2276_v54 = vadd.f32 %v2275_v55, %v6274_v52  ;;  %v2470_v28 = vmax.f32 %v2274_v8, 0.0 }
 0x313   : > { %v2279_v16 = vpop.f32.mrf.mxu0 }
 0x314   : > { %v2471_v6 = vmax.f32 %v2276_v54, 0.0  ;;  %v2556_v32 = vpack.c.bf16 %v2470_v28, %v2468_v20  ;;  %v2280_v40 = vadd.f32 %v2279_v16, %v6280_v56 }
 0x315   : > { %v2281_v63 = vpop.f32.mrf.mxu0 }
 0x316   : > { %v2557_v15 = vpack.c.bf16 %v2471_v6, %v2469_v39  ;;  %v2282_v62 = vadd.f32 %v2281_v63, %v6274_v52  ;;  %v2472_v47 = vmax.f32 %v2280_v40, 0.0  ;;  %v6455_v6 = vld [vmem:[%s7154_s6] ss:$0 sm:$0xff] }
 0x317   : > { %v2283_v60 = vpop.f32.mrf.mxu0 }
 0x318   : > { %v2284_v7 = vadd.f32 %v2283_v60, %v6280_v56  ;;  %2907 = vmatprep.mubr.bf16.mxu1 %v2557_v15  ;;  %v2473_v48 = vmax.f32 %v2282_v62, 0.0 }
 0x319   : > { %v2285_v21 = vpop.f32.mrf.mxu0  ;;  %2908 = vmatmul.mubr.bf16.gmra.mxu1 %v2556_v32 }
 0x31a   : > { %v2286_v11 = vadd.f32 %v2285_v21, %v6274_v52  ;;  %v2474_v22 = vmax.f32 %v2284_v7, 0.0 }
 0x31b   : > { %v2289_v36 = vpop.f32.mrf.mxu0 }
 0x31c   : > { %v2475_v4 = vmax.f32 %v2286_v11, 0.0  ;;  %v2558_v45 = vpack.c.bf16 %v2474_v22, %v2472_v47  ;;  %v2290_v38 = vadd.f32 %v2289_v36, %v6280_v56 }
 0x31d   : > { %v2291_v24 = vpop.f32.mrf.mxu0 }
 0x31e   : > { %v2559_v44 = vpack.c.bf16 %v2475_v4, %v2473_v48  ;;  %v2292_v59 = vadd.f32 %v2291_v24, %v6274_v52  ;;  %v2476_v37 = vmax.f32 %v2290_v38, 0.0 }
 0x31f   : > { %v2293_v49 = vpop.f32.mrf.mxu0 }
 0x320   : > { %v2294_v17 = vadd.f32 %v2293_v49, %v6280_v56  ;;  %2915 = vmatprep.mubr.bf16.mxu1 %v2559_v44  ;;  %v2477_v35 = vmax.f32 %v2292_v59, 0.0 }
 0x321   : > { %v2295_v42 = vpop.f32.mrf.mxu0  ;;  %2916 = vmatmul.mubr.bf16.gmra.mxu1 %v2558_v45 }
 0x322   : > { %v2296_v57 = vadd.f32 %v2295_v42, %v6274_v52  ;;  %v2478_v19 = vmax.f32 %v2294_v17, 0.0 }
 0x323   : > { %v2299_v18 = vpop.f32.mrf.mxu0 }
 0x324   : > { %v2479_v14 = vmax.f32 %v2296_v57, 0.0  ;;  %v2560_v29 = vpack.c.bf16 %v2478_v19, %v2476_v37  ;;  %v2300_v0 = vadd.f32 %v2299_v18, %v6280_v56 }
 0x325   : > { %v2301_v25 = vpop.f32.mrf.mxu0 }
 0x326   : > { %v2561_v33 = vpack.c.bf16 %v2479_v14, %v2477_v35  ;;  %v2302_v10 = vadd.f32 %v2301_v25, %v6274_v52  ;;  %v2480_v31 = vmax.f32 %v2300_v0, 0.0 }
 0x327   : > { %v2303_v26 = vpop.f32.mrf.mxu0 }
 0x328   : > { %v2304_v50 = vadd.f32 %v2303_v26, %v6280_v56  ;;  %2923 = vmatprep.mubr.bf16.mxu1 %v2561_v33  ;;  %v2481_v12 = vmax.f32 %v2302_v10, 0.0 }
 0x329   : > { %v2305_v53 = vpop.f32.mrf.mxu0  ;;  %2924 = vmatmul.mubr.bf16.gmra.mxu1 %v2560_v29 }
 0x32a   : > { %v2306_v3 = vadd.f32 %v2305_v53, %v6274_v52  ;;  %v2482_v30 = vmax.f32 %v2304_v50, 0.0 }
 0x32b   : > { %v2309_v46 = vpop.f32.mrf.mxu0 }
 0x32c   : > { %v2483_v58 = vmax.f32 %v2306_v3, 0.0  ;;  %v2562_v51 = vpack.c.bf16 %v2482_v30, %v2480_v31  ;;  %v2310_v13 = vadd.f32 %v2309_v46, %v6280_v56 }
 0x32d   : > { %v2311_v9 = vpop.f32.mrf.mxu0 }
 0x32e   : > { %v2563_v23 = vpack.c.bf16 %v2483_v58, %v2481_v12  ;;  %v2312_v2 = vadd.f32 %v2311_v9, %v6274_v52  ;;  %v2484_v55 = vmax.f32 %v2310_v13, 0.0 }
 0x32f   : > { %v2313_v43 = vpop.f32.mrf.mxu0 }
 0x330   : > { %v2314_v61 = vadd.f32 %v2313_v43, %v6280_v56  ;;  %2931 = vmatprep.mubr.bf16.mxu1 %v2563_v23  ;;  %v2485_v8 = vmax.f32 %v2312_v2, 0.0 }
 0x331   : > { %v2315_v41 = vpop.f32.mrf.mxu0  ;;  %2932 = vmatmul.mubr.bf16.gmra.mxu1 %v2562_v51 }
 0x332   : > { %v2316_v1 = vadd.f32 %v2315_v41, %v6274_v52  ;;  %v2486_v34 = vmax.f32 %v2314_v61, 0.0 }
 0x333   : > { %v2319_v5 = vpop.f32.mrf.mxu0 }
 0x334   : > { %v2487_v27 = vmax.f32 %v2316_v1, 0.0  ;;  %v2564_v16 = vpack.c.bf16 %v2486_v34, %v2484_v55  ;;  %v2320_v15 = vadd.f32 %v2319_v5, %v6280_v56 }
 0x335   : > { %v2321_v54 = vpop.f32.mrf.mxu0 }
 0x336   : > { %v2565_v28 = vpack.c.bf16 %v2487_v27, %v2485_v8  ;;  %v2322_v20 = vadd.f32 %v2321_v54, %v6274_v52  ;;  %v2488_v48 = vmax.f32 %v2320_v15, 0.0 }
 0x337   : > { %v2323_v39 = vpop.f32.mrf.mxu0 }
 0x338   : > { %v2324_v63 = vadd.f32 %v2323_v39, %v6280_v56  ;;  %2939 = vmatprep.mubr.bf16.mxu1 %v2565_v28  ;;  %v2489_v22 = vmax.f32 %v2322_v20, 0.0 }
 0x339   : > { %v2325_v32 = vpop.f32.mrf.mxu0  ;;  %v2749_v60 = vpop.f32.mrf.mxu1  ;;  %2940 = vmatmul.mubr.bf16.gmra.mxu1 %v2564_v16 }
 0x33a   : > { %v2326_v62 = vadd.f32 %v2325_v32, %v6274_v52  ;;  %v6462_v7 = vadd.f32 %v6455_v6, %v2749_v60  ;;  %v2490_v40 = vmax.f32 %v2324_v63, 0.0 }
 0x33b   : > { %v2329_v21 = vpop.f32.mrf.mxu0  ;;  %v2751_v11 = vpop.f32.mrf.mxu1 }
 0x33c   : > { %v2491_v36 = vmax.f32 %v2326_v62, 0.0  ;;  %3004 = vmax.xlane.f32.xlu0 %v6462_v7  ;;  %v2566_v45 = vpack.c.bf16 %v2490_v40, %v2488_v48  ;;  %v2330_v42 = vadd.f32 %v2329_v21, %v6280_v56 }
 0x33d   : > { %v2331_v4 = vpop.f32.mrf.mxu0  ;;  %v2752_v47 = vpop.f32.mrf.mxu1 }
 0x33e   : > { %v2567_v24 = vpack.c.bf16 %v2491_v36, %v2489_v22  ;;  %v6466_v44 = vadd.f32 %v6455_v6, %v2752_v47  ;;  %v2332_v17 = vadd.f32 %v2331_v4, %v6274_v52  ;;  %v2492_v26 = vmax.f32 %v2330_v42, 0.0 }
 0x33f   : > { %v2333_v49 = vpop.f32.mrf.mxu0  ;;  %v2754_v59 = vpop.f32.mrf.mxu1 }
 0x340   : > { %v2334_v38 = vadd.f32 %v2333_v49, %v6280_v56  ;;  %2947 = vmatprep.mubr.bf16.mxu1 %v2567_v24  ;;  %3006 = vmax.xlane.f32.xlu0 %v6466_v44  ;;  %v2493_v33 = vmax.f32 %v2332_v17, 0.0 }
 0x341   : > { %v2335_v57 = vpop.f32.mrf.mxu0  ;;  %v2757_v19 = vpop.f32.mrf.mxu1  ;;  %2948 = vmatmul.mubr.bf16.gmra.mxu1 %v2566_v45 }
 0x342   : > { %v2336_v18 = vadd.f32 %v2335_v57, %v6274_v52  ;;  %v6474_v35 = vadd.f32 %v6455_v6, %v2757_v19  ;;  %v2494_v14 = vmax.f32 %v2334_v38, 0.0 }
 0x343   : > { %v2339_v37 = vpop.f32.mrf.mxu0  ;;  %v2759_v25 = vpop.f32.mrf.mxu1 }
 0x344   : > { %v2495_v29 = vmax.f32 %v2336_v18, 0.0  ;;  %3008 = vmax.xlane.f32.xlu1 %v6474_v35  ;;  %v2568_v3 = vpack.c.bf16 %v2494_v14, %v2492_v26  ;;  %v2340_v31 = vadd.f32 %v2339_v37, %v6280_v56 }
 0x345   : > { %v2341_v10 = vpop.f32.mrf.mxu0  ;;  %v2760_v50 = vpop.f32.mrf.mxu1 }
 0x346   : > { %v2569_v0 = vpack.c.bf16 %v2495_v29, %v2493_v33  ;;  %v6478_v53 = vadd.f32 %v6455_v6, %v2760_v50  ;;  %v2342_v12 = vadd.f32 %v2341_v10, %v6274_v52  ;;  %v2496_v34 = vmax.f32 %v2340_v31, 0.0 }
 0x347   : > { %v2343_v30 = vpop.f32.mrf.mxu0  ;;  %v2762_v46 = vpop.f32.mrf.mxu1 }
 0x348   : > { %v2344_v58 = vadd.f32 %v2343_v30, %v6280_v56  ;;  %2955 = vmatprep.mubr.bf16.mxu1 %v2569_v0  ;;  %3010 = vmax.xlane.f32.xlu1 %v6478_v53  ;;  %v2497_v41 = vmax.f32 %v2342_v12, 0.0 }
 0x349   : > { %v2345_v9 = vpop.f32.mrf.mxu0  ;;  %v2765_v23 = vpop.f32.mrf.mxu1  ;;  %2956 = vmatmul.mubr.bf16.gmra.mxu1 %v2568_v3 }
 0x34a   : > { %v2346_v51 = vadd.f32 %v2345_v9, %v6274_v52  ;;  %v6486_v43 = vadd.f32 %v6455_v6, %v2765_v23  ;;  %v2498_v2 = vmax.f32 %v2344_v58, 0.0 }
 0x34b   : > { %v2349_v61 = vpop.f32.mrf.mxu0  ;;  %v2767_v13 = vpop.f32.mrf.mxu1 }
 0x34c   : > { %v2499_v1 = vmax.f32 %v2346_v51, 0.0  ;;  %3012 = vmax.xlane.f32.xlu0 %v6486_v43  ;;  %v2570_v54 = vpack.c.bf16 %v2498_v2, %v2496_v34  ;;  %v2350_v63 = vadd.f32 %v2349_v61, %v6280_v56 }
 0x34d   : > { %v2351_v5 = vpop.f32.mrf.mxu0  ;;  %v2768_v8 = vpop.f32.mrf.mxu1 }
 0x34e   : > { %v2571_v27 = vpack.c.bf16 %v2499_v1, %v2497_v41  ;;  %v6490_v55 = vadd.f32 %v6455_v6, %v2768_v8  ;;  %v2352_v39 = vadd.f32 %v2351_v5, %v6274_v52  ;;  %v2500_v48 = vmax.f32 %v2350_v63, 0.0 }
 0x34f   : > { %v2353_v28 = vpop.f32.mrf.mxu0  ;;  %v2770_v16 = vpop.f32.mrf.mxu1 }
 0x350   : > { %v2354_v20 = vadd.f32 %v2353_v28, %v6280_v56  ;;  %2963 = vmatprep.mubr.bf16.mxu1 %v2571_v27  ;;  %3014 = vmax.xlane.f32.xlu1 %v6490_v55  ;;  %v2501_v22 = vmax.f32 %v2352_v39, 0.0 }
 0x351   : > { %v2355_v15 = vpop.f32.mrf.mxu0  ;;  %v2773_v32 = vpop.f32.mrf.mxu1  ;;  %2964 = vmatmul.mubr.bf16.gmra.mxu1 %v2570_v54 }
 0x352   : > { %v2356_v60 = vadd.f32 %v2355_v15, %v6274_v52  ;;  %v6498_v62 = vadd.f32 %v6455_v6, %v2773_v32  ;;  %v2502_v40 = vmax.f32 %v2354_v20, 0.0 }
 0x353   : > { %v2359_v21 = vpop.f32.mrf.mxu0  ;;  %v2775_v11 = vpop.f32.mrf.mxu1 }
 0x354   : > { %v2503_v36 = vmax.f32 %v2356_v60, 0.0  ;;  %3016 = vmax.xlane.f32.xlu0 %v6498_v62  ;;  %v2572_v49 = vpack.c.bf16 %v2502_v40, %v2500_v48  ;;  %v2360_v57 = vadd.f32 %v2359_v21, %v6280_v56 }
 0x355   : > { %v2361_v4 = vpop.f32.mrf.mxu0  ;;  %v2776_v47 = vpop.f32.mrf.mxu1 }
 0x356   : > { %v2573_v24 = vpack.c.bf16 %v2503_v36, %v2501_v22  ;;  %v6502_v45 = vadd.f32 %v6455_v6, %v2776_v47  ;;  %v2362_v38 = vadd.f32 %v2361_v4, %v6274_v52  ;;  %v2504_v50 = vmax.f32 %v2360_v57, 0.0 }
 0x357   : > { %v2363_v59 = vpop.f32.mrf.mxu0  ;;  %v2778_v17 = vpop.f32.mrf.mxu1 }
 0x358   : > { %v2364_v42 = vadd.f32 %v2363_v59, %v6280_v56  ;;  %2971 = vmatprep.mubr.bf16.mxu1 %v2573_v24  ;;  %3018 = vmax.xlane.f32.xlu1 %v6502_v45  ;;  %v2505_v26 = vmax.f32 %v2362_v38, 0.0 }
 0x359   : > { %v2365_v19 = vpop.f32.mrf.mxu0  ;;  %v2781_v18 = vpop.f32.mrf.mxu1  ;;  %2972 = vmatmul.mubr.bf16.gmra.mxu1 %v2572_v49 }
 0x35a   : > { %v2366_v14 = vadd.f32 %v2365_v19, %v6274_v52  ;;  %v6510_v37 = vadd.f32 %v6455_v6, %v2781_v18  ;;  %v2506_v25 = vmax.f32 %v2364_v42, 0.0 }
 0x35b   : > { %v2369_v33 = vpop.f32.mrf.mxu0  ;;  %v2783_v29 = vpop.f32.mrf.mxu1 }
 0x35c   : > { %v2507_v10 = vmax.f32 %v2366_v14, 0.0  ;;  %3020 = vmax.xlane.f32.xlu0 %v6510_v37  ;;  %v2574_v12 = vpack.c.bf16 %v2506_v25, %v2504_v50  ;;  %v2370_v51 = vadd.f32 %v2369_v33, %v6280_v56 }
 0x35d   : > { %v2371_v0 = vpop.f32.mrf.mxu0  ;;  %v2784_v3 = vpop.f32.mrf.mxu1 }
 0x35e   : > { %v2575_v30 = vpack.c.bf16 %v2507_v10, %v2505_v26  ;;  %v6514_v46 = vadd.f32 %v6455_v6, %v2784_v3  ;;  %v2372_v9 = vadd.f32 %v2371_v0, %v6274_v52  ;;  %v2508_v54 = vmax.f32 %v2370_v51, 0.0 }
 0x35f   : > { %v2373_v58 = vpop.f32.mrf.mxu0  ;;  %v2786_v31 = vpop.f32.mrf.mxu1 }
 0x360   : > { %v2374_v23 = vadd.f32 %v2373_v58, %v6280_v56  ;;  %2979 = vmatprep.mubr.bf16.mxu1 %v2575_v30  ;;  %3022 = vmax.xlane.f32.xlu1 %v6514_v46  ;;  %v2509_v8 = vmax.f32 %v2372_v9, 0.0 }
 0x361   : > { %v2375_v2 = vpop.f32.mrf.mxu0  ;;  %v2789_v61 = vpop.f32.mrf.mxu1  ;;  %2980 = vmatmul.mubr.bf16.gmra.mxu1 %v2574_v12 }
 0x362   : > { %v2376_v13 = vadd.f32 %v2375_v2, %v6274_v52  ;;  %v6522_v41 = vadd.f32 %v6455_v6, %v2789_v61  ;;  %v2510_v1 = vmax.f32 %v2374_v23, 0.0 }
 0x363   : > { %v2379_v34 = vpop.f32.mrf.mxu0  ;;  %v2791_v5 = vpop.f32.mrf.mxu1 }
 0x364   : > { %v2511_v27 = vmax.f32 %v2376_v13, 0.0  ;;  %3024 = vmax.xlane.f32.xlu0 %v6522_v41  ;;  %v2576_v63 = vpack.c.bf16 %v2510_v1, %v2508_v54  ;;  %v2380_v21 = vadd.f32 %v2379_v34, %v6280_v56 }
 0x365   : > { %v2381_v28 = vpop.f32.mrf.mxu0  ;;  %v2792_v16 = vpop.f32.mrf.mxu1 }
 0x366   : > { %v2577_v39 = vpack.c.bf16 %v2511_v27, %v2509_v8  ;;  %v6526_v20 = vadd.f32 %v6455_v6, %v2792_v16  ;;  %v2382_v60 = vadd.f32 %v2381_v28, %v6274_v52  ;;  %v2512_v59 = vmax.f32 %v2380_v21, 0.0 }
 0x367   : > { %v2383_v15 = vpop.f32.mrf.mxu0  ;;  %v2794_v32 = vpop.f32.mrf.mxu1 }
 0x368   : > { %v2384_v40 = vadd.f32 %v2383_v15, %v6280_v56  ;;  %2987 = vmatprep.mubr.bf16.mxu1 %v2577_v39  ;;  %3026 = vmax.xlane.f32.xlu1 %v6526_v20  ;;  %v2513_v24 = vmax.f32 %v2382_v60, 0.0 }
 0x369   : > { %v2385_v11 = vpop.f32.mrf.mxu0  ;;  %v2797_v22 = vpop.f32.mrf.mxu1  ;;  %2988 = vmatmul.mubr.bf16.gmra.mxu1 %v2576_v63 }
 0x36a   : > { %v2386_v36 = vadd.f32 %v2385_v11, %v6274_v52  ;;  %v6534_v48 = vadd.f32 %v6455_v6, %v2797_v22  ;;  %v2514_v4 = vmax.f32 %v2384_v40, 0.0 }
 0x36b   : > { %v2799_v47 = vpop.f32.mrf.mxu1 }
 0x36c   : > { %v2515_v49 = vmax.f32 %v2386_v36, 0.0  ;;  %3028 = vmax.xlane.f32.xlu0 %v6534_v48  ;;  %v2578_v56 = vpack.c.bf16 %v2514_v4, %v2512_v59 }
 0x36d   : > { %v2800_v17 = vpop.f32.mrf.mxu1 }
 0x36e   : > { %v2579_v38 = vpack.c.bf16 %v2515_v49, %v2513_v24  ;;  %v6538_v42 = vadd.f32 %v6455_v6, %v2800_v17 }
 0x36f   : > { %v2802_v57 = vpop.f32.mrf.mxu1 }
 0x370   : > { %2995 = vmatprep.mubr.bf16.mxu1 %v2579_v38  ;;  %3030 = vmax.xlane.f32.xlu1 %v6538_v42 }
 0x371   : > { %v2805_v52 = vpop.f32.mrf.mxu1  ;;  %2996 = vmatmul.mubr.bf16.gmra.mxu1 %v2578_v56 }
 0x372   : > { %v6542_v19 = vadd.f32 %v6455_v6, %v2805_v52 }
 0x373   : > { %v2807_v18 = vpop.f32.mrf.mxu1 }
 0x374   : > { %3032 = vmax.xlane.f32.xlu0 %v6542_v19 }
 0x375   : > { %v2808_v14 = vpop.f32.mrf.mxu1 }
 0x376   : > { %v6546_v25 = vadd.f32 %v6455_v6, %v2808_v14 }
 0x377   : > { %v2810_v33 = vpop.f32.mrf.mxu1 }
 0x378   : > { %3034 = vmax.xlane.f32.xlu1 %v6546_v25 }
 0x379   : > { %v2813_v29 = vpop.f32.mrf.mxu1 }
 0x37a   : > { %v6550_v26 = vadd.f32 %v6455_v6, %v2813_v29 }
 0x37b   : > { %v2815_v10 = vpop.f32.mrf.mxu1 }
 0x37c   : > { %3036 = vmax.xlane.f32.xlu0 %v6550_v26 }
 0x37d   : > { %v2816_v50 = vpop.f32.mrf.mxu1 }
 0x37e   : > { %v6554_v0 = vadd.f32 %v6455_v6, %v2816_v50 }
 0x37f   : > { %v2818_v3 = vpop.f32.mrf.mxu1 }
 0x380   : > { %3038 = vmax.xlane.f32.xlu1 %v6554_v0 }
 0x381   : > { %v2821_v30 = vpop.f32.mrf.mxu1 }
 0x382   : > { %v6558_v12 = vadd.f32 %v6455_v6, %v2821_v30 }
 0x383   : > { %v2823_v58 = vpop.f32.mrf.mxu1 }
 0x384   : > { %3040 = vmax.xlane.f32.xlu0 %v6558_v12 }
 0x385   : > { %v2824_v31 = vpop.f32.mrf.mxu1 }
 0x386   : > { %v6562_v9 = vadd.f32 %v6455_v6, %v2824_v31 }
 0x387   : > { %v2826_v23 = vpop.f32.mrf.mxu1 }
 0x388   : > { %3042 = vmax.xlane.f32.xlu1 %v6562_v9 }
 0x389   : > { %v2829_v51 = vpop.f32.mrf.mxu1 }
 0x38a   : > { %v6566_v2 = vadd.f32 %v6455_v6, %v2829_v51 }
 0x38b   : > { %v2831_v61 = vpop.f32.mrf.mxu1 }
 0x38c   : > { %3044 = vmax.xlane.f32.xlu0 %v6566_v2 }
 0x38d   : > { %v2832_v13 = vpop.f32.mrf.mxu1 }
 0x38e   : > { %v6570_v1 = vadd.f32 %v6455_v6, %v2832_v13 }
 0x38f   : > { %v2834_v34 = vpop.f32.mrf.mxu1 }
 0x390   : > { %3046 = vmax.xlane.f32.xlu1 %v6570_v1 }
 0x391   : > { %v2837_v5 = vpop.f32.mrf.mxu1 }
 0x392   : > { %v6574_v8 = vadd.f32 %v6455_v6, %v2837_v5 }
 0x393   : > { %v2839_v27 = vpop.f32.mrf.mxu1 }
 0x394   : > { %3048 = vmax.xlane.f32.xlu0 %v6574_v8 }
 0x395   : > { %v2840_v54 = vpop.f32.mrf.mxu1 }
 0x396   : > { %v6578_v28 = vadd.f32 %v6455_v6, %v2840_v54 }
 0x397   : > { %v2842_v16 = vpop.f32.mrf.mxu1 }
 0x398   : > { %3050 = vmax.xlane.f32.xlu1 %v6578_v28 }
 0x399   : > { %v2845_v39 = vpop.f32.mrf.mxu1 }
 0x39a   : > { %v6582_v63 = vadd.f32 %v6455_v6, %v2845_v39 }
 0x39b   : > { %v2847_v15 = vpop.f32.mrf.mxu1 }
 0x39c   : > { %3052 = vmax.xlane.f32.xlu0 %v6582_v63 }
 0x39d   : > { %v2848_v32 = vpop.f32.mrf.mxu1 }
 0x39e   : > { %v6586_v60 = vadd.f32 %v6455_v6, %v2848_v32 }
 0x39f   : > { %v2850_v40 = vpop.f32.mrf.mxu1 }
 0x3a0   : > { %3054 = vmax.xlane.f32.xlu1 %v6586_v60 }
 0x3a1   : > { %v2853_v21 = vpop.f32.mrf.mxu1 }
 0x3a2   : > { %v6590_v11 = vadd.f32 %v6455_v6, %v2853_v21 }
 0x3a3   : > { %v2855_v22 = vpop.f32.mrf.mxu1 }
 0x3a4   : > { %3056 = vmax.xlane.f32.xlu0 %v6590_v11 }
 0x3a5   : > { %v2856_v36 = vpop.f32.mrf.mxu1 }
 0x3a6   : > { %v6594_v4 = vadd.f32 %v6455_v6, %v2856_v36 }
 0x3a7   : > { %v2858_v47 = vpop.f32.mrf.mxu1 }
 0x3a8   : > { %3058 = vmax.xlane.f32.xlu1 %v6594_v4 }
 0x3a9   : > { %v2861_v24 = vpop.f32.mrf.mxu1 }
 0x3aa   : > { %v6598_v49 = vadd.f32 %v6455_v6, %v2861_v24 }
 0x3ab   : > { %v2863_v59 = vpop.f32.mrf.mxu1 }
 0x3ac   : > { %3060 = vmax.xlane.f32.xlu0 %v6598_v49 }
 0x3ad   : > { %v2864_v17 = vpop.f32.mrf.mxu1 }
 0x3ae   : > { %v6602_v38 = vadd.f32 %v6455_v6, %v2864_v17 }
 0x3af   : > { %v2866_v56 = vpop.f32.mrf.mxu1 }
 0x3b0   : > { %3062 = vmax.xlane.f32.xlu1 %v6602_v38 }
 0x3b1   : > { %v2869_v57 = vpop.f32.mrf.mxu1 }
 0x3b2   : > { %v6606_v52 = vadd.f32 %v6455_v6, %v2869_v57 }
 0x3b3   : > { %v2871_v18 = vpop.f32.mrf.mxu1 }
 0x3b4   : > { %3064 = vmax.xlane.f32.xlu0 %v6606_v52 }
 0x3b5   : > { %v2872_v14 = vpop.f32.mrf.mxu1 }
 0x3b6   : > { %v6610_v33 = vadd.f32 %v6455_v6, %v2872_v14 }
 0x3b7   : > { %v2874_v29 = vpop.f32.mrf.mxu1 }
 0x3b8   : > { %3066 = vmax.xlane.f32.xlu1 %v6610_v33 }
 0x3b9   : > { %v2877_v10 = vpop.f32.mrf.mxu1 }
 0x3ba   : > { %v6614_v50 = vadd.f32 %v6455_v6, %v2877_v10 }
 0x3bb   : > { %v2879_v3 = vpop.f32.mrf.mxu1 }
 0x3bc   : > { %3068 = vmax.xlane.f32.xlu0 %v6614_v50 }
 0x3bd   : > { %v2880_v30 = vpop.f32.mrf.mxu1 }
 0x3be   : > { %v6618_v58 = vadd.f32 %v6455_v6, %v2880_v30 }
 0x3bf   : > { %v2882_v31 = vpop.f32.mrf.mxu1 }
 0x3c0   : > { %3070 = vmax.xlane.f32.xlu1 %v6618_v58 }
 0x3c1   : > { %v2885_v23 = vpop.f32.mrf.mxu1 }
 0x3c2   : > { %v6622_v51 = vadd.f32 %v6455_v6, %v2885_v23 }
 0x3c3   : > { %v2887_v61 = vpop.f32.mrf.mxu1 }
 0x3c4   : > { %3072 = vmax.xlane.f32.xlu0 %v6622_v51 }
 0x3c5   : > { %v2888_v13 = vpop.f32.mrf.mxu1  ;;  %v3005_v34 = vpop.xlane.xlu0 %3004 }
 0x3c6   : > { %v6626_v5 = vadd.f32 %v6455_v6, %v2888_v13  ;;  %v3132_v27 = vsub.f32 %v6462_v7, %v3005_v34 }
 0x3c7   : > { %v2890_v54 = vpop.f32.mrf.mxu1 }
 0x3c8   : > { %v3196_v16 = vmul.f32 1.442695, %v3132_v27  ;;  %3074 = vmax.xlane.f32.xlu1 %v6626_v5 }
 0x3c9   : > { %v2893_v39 = vpop.f32.mrf.mxu1  ;;  %v3007_v15 = vpop.xlane.xlu0 %3006 }
 0x3ca   : > { %4718 = vpow2.f32 %v3196_v16  ;;  %v6631_v32 = vadd.f32 %v6455_v6, %v2893_v39  ;;  %v3133_v40 = vsub.f32 %v6466_v44, %v3007_v15 }
 0x3cb   : > { %v2895_v21 = vpop.f32.mrf.mxu1 }
 0x3cc   : > { %v3198_v22 = vmul.f32 1.442695, %v3133_v40  ;;  %3076 = vmax.xlane.f32.xlu0 %v6631_v32 }
 0x3cd   : > { %v2896_v36 = vpop.f32.mrf.mxu1  ;;  %v3009_v47 = vpop.xlane.xlu1 %3008 }
 0x3ce   : > { %4720 = vpow2.f32 %v3198_v22  ;;  %v6636_v7 = vadd.f32 %v6455_v6, %v2896_v36  ;;  %v3134_v24 = vsub.f32 %v6474_v35, %v3009_v47 }
 0x3cf   : > { %v2898_v59 = vpop.f32.mrf.mxu1 }
 0x3d0   : > { %v3200_v17 = vmul.f32 1.442695, %v3134_v24  ;;  %3078 = vmax.xlane.f32.xlu1 %v6636_v7 }
 0x3d1   : > { %v2901_v56 = vpop.f32.mrf.mxu1  ;;  %v3011_v57 = vpop.xlane.xlu1 %3010 }
 0x3d2   : > { %4722 = vpow2.f32 %v3200_v17  ;;  %v6641_v44 = vadd.f32 %v6455_v6, %v2901_v56  ;;  %v3135_v18 = vsub.f32 %v6478_v53, %v3011_v57 }
 0x3d3   : > { %v2903_v14 = vpop.f32.mrf.mxu1 }
 0x3d4   : > { %v3202_v29 = vmul.f32 1.442695, %v3135_v18  ;;  %3080 = vmax.xlane.f32.xlu0 %v6641_v44 }
 0x3d5   : > { %v2904_v10 = vpop.f32.mrf.mxu1  ;;  %v3013_v3 = vpop.xlane.xlu0 %3012 }
 0x3d6   : > { %4724 = vpow2.f32 %v3202_v29  ;;  %v6646_v35 = vadd.f32 %v6455_v6, %v2904_v10  ;;  %v3136_v30 = vsub.f32 %v6486_v43, %v3013_v3 }
 0x3d7   : > { %v6649_v31 = vpop.eup %4718  ;;  %v2906_v23 = vpop.f32.mrf.mxu1 }
 0x3d8   : > { %v3204_v61 = vmul.f32 1.442695, %v3136_v30  ;;  %3082 = vmax.xlane.f32.xlu1 %v6646_v35  ;;  %3324 = vadd.xlane.f32.xlu0 %v6649_v31 }
 0x3d9   : > { %v2909_v53 = vpop.f32.mrf.mxu1  ;;  %v3015_v13 = vpop.xlane.xlu1 %3014 }
 0x3da   : > { %4726 = vpow2.f32 %v3204_v61  ;;  %v6654_v34 = vadd.f32 %v6455_v6, %v2909_v53  ;;  %v3137_v27 = vsub.f32 %v6490_v55, %v3015_v13 }
 0x3db   : > { %v6657_v54 = vpop.eup %4720  ;;  %v2911_v16 = vpop.f32.mrf.mxu1 }
 0x3dc   : > { %v3206_v43 = vmul.f32 1.442695, %v3137_v27  ;;  %3084 = vmax.xlane.f32.xlu0 %v6654_v34  ;;  %3326 = vadd.xlane.f32.xlu1 %v6657_v54 }
 0x3dd   : > { %v2912_v39 = vpop.f32.mrf.mxu1  ;;  %v3017_v15 = vpop.xlane.xlu0 %3016 }
 0x3de   : > { %4728 = vpow2.f32 %v3206_v43  ;;  %v6662_v40 = vadd.f32 %v6455_v6, %v2912_v39  ;;  %v3138_v21 = vsub.f32 %v6498_v62, %v3017_v15 }
 0x3df   : > { %v6665_v22 = vpop.eup %4722  ;;  %v2914_v36 = vpop.f32.mrf.mxu1 }
 0x3e0   : > { %v3208_v55 = vmul.f32 1.442695, %v3138_v21  ;;  %3328 = vadd.xlane.f32.xlu0 %v6665_v22  ;;  %3086 = vmax.xlane.f32.xlu1 %v6662_v40 }
 0x3e1   : > { %v2917_v47 = vpop.f32.mrf.mxu1  ;;  %v3019_v24 = vpop.xlane.xlu1 %3018 }
 0x3e2   : > { %4730 = vpow2.f32 %v3208_v55  ;;  %v6670_v59 = vadd.f32 %v6455_v6, %v2917_v47  ;;  %v3139_v17 = vsub.f32 %v6502_v45, %v3019_v24 }
 0x3e3   : > { %v6673_v56 = vpop.eup %4724  ;;  %v2919_v57 = vpop.f32.mrf.mxu1 }
 0x3e4   : > { %v3210_v62 = vmul.f32 1.442695, %v3139_v17  ;;  %3088 = vmax.xlane.f32.xlu0 %v6670_v59  ;;  %3330 = vadd.xlane.f32.xlu1 %v6673_v56 }
 0x3e5   : > { %v2920_v18 = vpop.f32.mrf.mxu1  ;;  %v3021_v14 = vpop.xlane.xlu0 %3020 }
 0x3e6   : > { %4732 = vpow2.f32 %v3210_v62  ;;  %v6678_v29 = vadd.f32 %v6455_v6, %v2920_v18  ;;  %v3140_v10 = vsub.f32 %v6510_v37, %v3021_v14 }
 0x3e7   : > { %v6681_v3 = vpop.eup %4726  ;;  %v2922_v30 = vpop.f32.mrf.mxu1 }
 0x3e8   : > { %v3212_v45 = vmul.f32 1.442695, %v3140_v10  ;;  %3090 = vmax.xlane.f32.xlu1 %v6678_v29  ;;  %3332 = vadd.xlane.f32.xlu0 %v6681_v3 }
 0x3e9   : > { %v2925_v23 = vpop.f32.mrf.mxu1  ;;  %v3023_v61 = vpop.xlane.xlu1 %3022 }
 0x3ea   : > { %4734 = vpow2.f32 %v3212_v45  ;;  %v6686_v53 = vadd.f32 %v6455_v6, %v2925_v23  ;;  %v3141_v13 = vsub.f32 %v6514_v46, %v3023_v61 }
 0x3eb   : > { %v6689_v27 = vpop.eup %4728  ;;  %v2927_v16 = vpop.f32.mrf.mxu1 }
 0x3ec   : > { %v3214_v37 = vmul.f32 1.442695, %v3141_v13  ;;  %3334 = vadd.xlane.f32.xlu1 %v6689_v27  ;;  %3092 = vmax.xlane.f32.xlu0 %v6686_v53 }
 0x3ed   : > { %v2928_v43 = vpop.f32.mrf.mxu1  ;;  %v3025_v39 = vpop.xlane.xlu0 %3024 }
 0x3ee   : > { %4736 = vpow2.f32 %v3214_v37  ;;  %v6694_v15 = vadd.f32 %v6455_v6, %v2928_v43  ;;  %v3142_v21 = vsub.f32 %v6522_v41, %v3025_v39 }
 0x3ef   : > { %v6697_v36 = vpop.eup %4730  ;;  %v2930_v55 = vpop.f32.mrf.mxu1 }
 0x3f0   : > { %v3216_v46 = vmul.f32 1.442695, %v3142_v21  ;;  %3094 = vmax.xlane.f32.xlu1 %v6694_v15  ;;  %3336 = vadd.xlane.f32.xlu0 %v6697_v36 }
 0x3f1   : > { %v2933_v47 = vpop.f32.mrf.mxu1  ;;  %v3027_v24 = vpop.xlane.xlu1 %3026 }
 0x3f2   : > { %4738 = vpow2.f32 %v3216_v46  ;;  %v6702_v17 = vadd.f32 %v6455_v6, %v2933_v47  ;;  %v3143_v57 = vsub.f32 %v6526_v20, %v3027_v24 }
 0x3f3   : > { %v6705_v62 = vpop.eup %4732  ;;  %v2935_v18 = vpop.f32.mrf.mxu1 }
 0x3f4   : > { %v3218_v41 = vmul.f32 1.442695, %v3143_v57  ;;  %3338 = vadd.xlane.f32.xlu1 %v6705_v62  ;;  %3096 = vmax.xlane.f32.xlu0 %v6702_v17 }
 0x3f5   : > { %v2936_v14 = vpop.f32.mrf.mxu1  ;;  %v3029_v10 = vpop.xlane.xlu0 %3028 }
 0x3f6   : > { %4740 = vpow2.f32 %v3218_v41  ;;  %v6710_v30 = vadd.f32 %v6455_v6, %v2936_v14  ;;  %v3144_v45 = vsub.f32 %v6534_v48, %v3029_v10 }
 0x3f7   : > { %v6713_v23 = vpop.eup %4734  ;;  %v2938_v61 = vpop.f32.mrf.mxu1 }
 0x3f8   : > { %v3220_v20 = vmul.f32 1.442695, %v3144_v45  ;;  %3098 = vmax.xlane.f32.xlu1 %v6710_v30  ;;  %3340 = vadd.xlane.f32.xlu0 %v6713_v23 }
 0x3f9   : > { %v2941_v13 = vpop.f32.mrf.mxu1  ;;  %v3031_v16 = vpop.xlane.xlu1 %3030 }
 0x3fa   : > { %4742 = vpow2.f32 %v3220_v20  ;;  %v6718_v37 = vadd.f32 %v6455_v6, %v2941_v13  ;;  %v3145_v43 = vsub.f32 %v6538_v42, %v3031_v16 }
 0x3fb   : > { %v6721_v39 = vpop.eup %4736  ;;  %v2943_v21 = vpop.f32.mrf.mxu1 }
 0x3fc   : > { %v3222_v48 = vmul.f32 1.442695, %v3145_v43  ;;  %3342 = vadd.xlane.f32.xlu1 %v6721_v39  ;;  %3100 = vmax.xlane.f32.xlu0 %v6718_v37 }
 0x3fd   : > { %v2944_v55 = vpop.f32.mrf.mxu1  ;;  %v3033_v46 = vpop.xlane.xlu0 %3032 }
 0x3fe   : > { %4744 = vpow2.f32 %v3222_v48  ;;  %v6726_v47 = vadd.f32 %v6455_v6, %v2944_v55  ;;  %v3146_v24 = vsub.f32 %v6542_v19, %v3033_v46 }
 0x3ff   : > { %v6729_v57 = vpop.eup %4738  ;;  %v2946_v18 = vpop.f32.mrf.mxu1 }
 0x400   : > { %v3224_v42 = vmul.f32 1.442695, %v3146_v24  ;;  %3102 = vmax.xlane.f32.xlu1 %v6726_v47  ;;  %3344 = vadd.xlane.f32.xlu0 %v6729_v57 }
 0x401   : > { %v2949_v41 = vpop.f32.mrf.mxu1  ;;  %v3035_v14 = vpop.xlane.xlu1 %3034 }
 0x402   : > { %4746 = vpow2.f32 %v3224_v42  ;;  %v6734_v10 = vadd.f32 %v6455_v6, %v2949_v41  ;;  %v3147_v45 = vsub.f32 %v6546_v25, %v3035_v14 }
 0x403   : > { %v6737_v61 = vpop.eup %4740  ;;  %v2951_v20 = vpop.f32.mrf.mxu1 }
 0x404   : > { %v3226_v19 = vmul.f32 1.442695, %v3147_v45  ;;  %3346 = vadd.xlane.f32.xlu1 %v6737_v61  ;;  %3104 = vmax.xlane.f32.xlu0 %v6734_v10 }
 0x405   : > { %v2952_v13 = vpop.f32.mrf.mxu1  ;;  %v3037_v16 = vpop.xlane.xlu0 %3036 }
 0x406   : > { %4748 = vpow2.f32 %v3226_v19  ;;  %v6742_v43 = vadd.f32 %v6455_v6, %v2952_v13  ;;  %v3148_v21 = vsub.f32 %v6550_v26, %v3037_v16 }
 0x407   : > { %v6745_v48 = vpop.eup %4742  ;;  %v2954_v55 = vpop.f32.mrf.mxu1 }
 0x408   : > { %v3228_v25 = vmul.f32 1.442695, %v3148_v21  ;;  %3106 = vmax.xlane.f32.xlu1 %v6742_v43  ;;  %3348 = vadd.xlane.f32.xlu0 %v6745_v48 }
 0x409   : > { %v2957_v46 = vpop.f32.mrf.mxu1  ;;  %v3039_v24 = vpop.xlane.xlu1 %3038 }
 0x40a   : > { %4750 = vpow2.f32 %v3228_v25  ;;  %v6750_v18 = vadd.f32 %v6455_v6, %v2957_v46  ;;  %v3149_v42 = vsub.f32 %v6554_v0, %v3039_v24 }
 0x40b   : > { %v6753_v41 = vpop.eup %4744  ;;  %v2959_v14 = vpop.f32.mrf.mxu1 }
 0x40c   : > { %7216 = vst [vmem:[#allocation17_spill] sm:$0xff] %v6753_v41  ;;  %v3230_v26 = vmul.f32 1.442695, %v3149_v42  ;;  %3350 = vadd.xlane.f32.xlu1 %v6753_v41  ;;  %3108 = vmax.xlane.f32.xlu0 %v6750_v18 }
 0x40d   : > { %v2960_v45 = vpop.f32.mrf.mxu1  ;;  %v3041_v20 = vpop.xlane.xlu0 %3040 }
 0x40e   : > { %4752 = vpow2.f32 %v3230_v26  ;;  %v6758_v19 = vadd.f32 %v6455_v6, %v2960_v45  ;;  %v3150_v13 = vsub.f32 %v6558_v12, %v3041_v20 }
 0x40f   : > { %v6761_v16 = vpop.eup %4746  ;;  %v2962_v21 = vpop.f32.mrf.mxu1 }
 0x410   : > { %7217 = vst [vmem:[#allocation16_spill] sm:$0xff] %v6761_v16  ;;  %v3232_v0 = vmul.f32 1.442695, %v3150_v13  ;;  %3110 = vmax.xlane.f32.xlu1 %v6758_v19  ;;  %3352 = vadd.xlane.f32.xlu0 %v6761_v16 }
 0x411   : > { %v2965_v55 = vpop.f32.mrf.mxu1  ;;  %v3043_v25 = vpop.xlane.xlu1 %3042 }
 0x412   : > { %4754 = vpow2.f32 %v3232_v0  ;;  %v6766_v46 = vadd.f32 %v6455_v6, %v2965_v55  ;;  %v3151_v24 = vsub.f32 %v6562_v9, %v3043_v25 }
 0x413   : > { %v6769_v42 = vpop.eup %4748  ;;  %v2967_v14 = vpop.f32.mrf.mxu1 }
 0x414   : > { %7218 = vst [vmem:[#allocation18_spill] sm:$0xff] %v6769_v42  ;;  %v3234_v12 = vmul.f32 1.442695, %v3151_v24  ;;  %3354 = vadd.xlane.f32.xlu1 %v6769_v42  ;;  %3112 = vmax.xlane.f32.xlu0 %v6766_v46 }
 0x415   : > { %v2968_v26 = vpop.f32.mrf.mxu1 }
 0x416   : > { %4756 = vpow2.f32 %v3234_v12  ;;  %v6774_v45 = vadd.f32 %v6455_v6, %v2968_v26  ;;  %v3045_v12 = vpop.xlane.xlu0 %3044 }
 0x417   : > { %v6776_v20 = vpop.eup %4750  ;;  %v2970_v13 = vpop.f32.mrf.mxu1 }
 0x418   : > { %7219 = vst [vmem:[#allocation19_spill] sm:$0xff] %v6776_v20  ;;  %3114 = vmax.xlane.f32.xlu1 %v6774_v45  ;;  %3356 = vadd.xlane.f32.xlu0 %v6776_v20 }
 0x419   : > { %v2973_v9 = vpop.f32.mrf.mxu1 }
 0x41a   : > { %v6781_v21 = vadd.f32 %v6455_v6, %v2973_v9  ;;  %v3152_v9 = vsub.f32 %v6566_v2, %v3045_v12 }
 0x41b   : > { %v6783_v0 = vpop.eup %4752  ;;  %v2975_v55 = vpop.f32.mrf.mxu1 }
 0x41c   : > { %7220 = vst [vmem:[#allocation20_spill] sm:$0xff] %v6781_v21  ;;  %7221 = vst [vmem:[#allocation15_spill] sm:$0xff] %v6783_v0  ;;  %3358 = vadd.xlane.f32.xlu1 %v6783_v0  ;;  %3116 = vmax.xlane.f32.xlu0 %v6781_v21  ;;  %v3047_v55 = vpop.xlane.xlu1 %3046 }
 0x41d   : > { %v2976_v25 = vpop.f32.mrf.mxu1  ;;  %v3049_v42 = vpop.xlane.xlu0 %3048 }
 0x41e   : > { %v6788_v24 = vadd.f32 %v6455_v6, %v2976_v25 }
 0x41f   : > { %v6790_v14 = vpop.eup %4754  ;;  %v2978_v26 = vpop.f32.mrf.mxu1 }
 0x420   : > { %7222 = vst [vmem:[#allocation21_spill] sm:$0xff] %v6788_v24  ;;  %7223 = vst [vmem:[#allocation22_spill] sm:$0xff] %v6790_v14  ;;  %3118 = vmax.xlane.f32.xlu1 %v6788_v24  ;;  %3360 = vadd.xlane.f32.xlu0 %v6790_v14  ;;  %v3153_v26 = vsub.f32 %v6570_v1, %v3047_v55  ;;  %v3236_v24 = vmul.f32 1.442695, %v3152_v9  ;;  %v3154_v14 = vsub.f32 %v6574_v8, %v3049_v42 }
 0x421   : > { %v2981_v13 = vpop.f32.mrf.mxu1  ;;  %v3051_v21 = vpop.xlane.xlu1 %3050 }
 0x422   : > { %v6796_v0 = vadd.f32 %v6455_v6, %v2981_v13  ;;  %v3238_v41 = vmul.f32 1.442695, %v3153_v26  ;;  %4758 = vpow2.f32 %v3236_v24 }
 0x423   : > { %v6798_v20 = vpop.eup %4756  ;;  %v2983_v25 = vpop.f32.mrf.mxu1 }
 0x424   : > { %7224 = vst [vmem:[#allocation23_spill] sm:$0xff] %v6796_v0  ;;  %7225 = vst [vmem:[#allocation24_spill] sm:$0xff] %v6798_v20  ;;  %3362 = vadd.xlane.f32.xlu1 %v6798_v20  ;;  %3120 = vmax.xlane.f32.xlu0 %v6796_v0  ;;  %v3155_v25 = vsub.f32 %v6578_v28, %v3051_v21  ;;  %v3240_v0 = vmul.f32 1.442695, %v3154_v14  ;;  %4760 = vpow2.f32 %v3238_v41 }
 0x425   : > { %v2984_v16 = vpop.f32.mrf.mxu1  ;;  %v3053_v12 = vpop.xlane.xlu0 %3052 }
 0x426   : > { %v6805_v2 = vadd.f32 %v6455_v6, %v2984_v16  ;;  %v3156_v1 = vsub.f32 %v6582_v63, %v3053_v12  ;;  %v3242_v16 = vmul.f32 1.442695, %v3155_v25  ;;  %4762 = vpow2.f32 %v3240_v0 }
 0x427   : > { %v2986_v13 = vpop.f32.mrf.mxu1 }
 0x428   : > { %3122 = vmax.xlane.f32.xlu1 %v6805_v2  ;;  %v3244_v28 = vmul.f32 1.442695, %v3156_v1  ;;  %4764 = vpow2.f32 %v3242_v16 }
 0x429   : > { %v2989_v20 = vpop.f32.mrf.mxu1  ;;  %v3055_v8 = vpop.xlane.xlu1 %3054 }
 0x42a   : > { %v6811_v9 = vadd.f32 %v6455_v6, %v2989_v20  ;;  %v3157_v55 = vsub.f32 %v6586_v60, %v3055_v8  ;;  %4766 = vpow2.f32 %v3244_v28 }
 0x42b   : > { %v2991_v42 = vpop.f32.mrf.mxu1 }
 0x42c   : > { %3124 = vmax.xlane.f32.xlu0 %v6811_v9  ;;  %v3246_v20 = vmul.f32 1.442695, %v3157_v55  ;;  %v4974_v42 = vld [vmem:[%s7154_s6] ss:$0 sm:$0xff] }
 0x42d   : > { %v2992_v13 = vpop.f32.mrf.mxu1  ;;  %v3057_v26 = vpop.xlane.xlu0 %3056 }
 0x42e   : > { %v6816_v21 = vadd.f32 %v6455_v6, %v2992_v13  ;;  %v3158_v63 = vsub.f32 %v6590_v11, %v3057_v26  ;;  %4768 = vpow2.f32 %v3246_v20 }
 0x42f   : > { %v2994_v24 = vpop.f32.mrf.mxu1 }
 0x430   : > { %3126 = vmax.xlane.f32.xlu1 %v6816_v21  ;;  %v3248_v41 = vmul.f32 1.442695, %v3158_v63 }
 0x431   : > { %v2997_v14 = vpop.f32.mrf.mxu1  ;;  %v3059_v12 = vpop.xlane.xlu1 %3058 }
 0x432   : > { %v6821_v60 = vadd.f32 %v6455_v6, %v2997_v14  ;;  %v3159_v0 = vsub.f32 %v6594_v4, %v3059_v12  ;;  %4770 = vpow2.f32 %v3248_v41  ;;  %v6831_v6 = vpop.eup %4758 }
 0x433   : > { %v2999_v25 = vpop.f32.mrf.mxu1  ;;  %v6835_v28 = vpop.eup %4760 }
 0x434   : > { %3128 = vmax.xlane.f32.xlu0 %v6821_v60  ;;  %v3250_v1 = vmul.f32 1.442695, %v3159_v0  ;;  %v6838_v24 = vpop.eup %4762 }
 0x435   : > { %v3000_v11 = vpop.f32.mrf.mxu1  ;;  %v3061_v8 = vpop.xlane.xlu0 %3060 }
 0x436   : > { %v6828_v16 = vadd.f32 %v4974_v42, %v3000_v11  ;;  %v3160_v55 = vsub.f32 %v6598_v49, %v3061_v8  ;;  %4772 = vpow2.f32 %v3250_v1  ;;  %v6842_v14 = vpop.eup %4764 }
 0x437   : > { %v3002_v13 = vpop.f32.mrf.mxu1  ;;  %v6845_v41 = vpop.eup %4766 }
 0x438   : > { %v3252_v4 = vmul.f32 1.442695, %v3160_v55  ;;  %3130 = vmax.xlane.f32.xlu1 %v6828_v16  ;;  %3364 = vadd.xlane.f32.xlu0 %v6831_v6 }
 0x439   : > { %v3063_v26 = vpop.xlane.xlu1 %3062 }
 0x43a   : > { %4774 = vpow2.f32 %v3252_v4  ;;  %v3161_v63 = vsub.f32 %v6602_v38, %v3063_v26 }
 0x43b   : > { %v6849_v25 = vpop.eup %4768 }
 0x43c   : > { %v3254_v20 = vmul.f32 1.442695, %v3161_v63  ;;  %3366 = vadd.xlane.f32.xlu1 %v6835_v28  ;;  %3368 = vadd.xlane.f32.xlu0 %v6838_v24 }
 0x43d   : > { %v3065_v49 = vpop.xlane.xlu0 %3064 }
 0x43e   : > { %4776 = vpow2.f32 %v3254_v20  ;;  %v3162_v12 = vsub.f32 %v6606_v52, %v3065_v49 }
 0x43f   : > { %v6852_v11 = vpop.eup %4770 }
 0x440   : > { %v3256_v0 = vmul.f32 1.442695, %v3162_v12  ;;  %3370 = vadd.xlane.f32.xlu1 %v6842_v14  ;;  %3372 = vadd.xlane.f32.xlu0 %v6845_v41 }
 0x441   : > { %v3067_v38 = vpop.xlane.xlu1 %3066 }
 0x442   : > { %4778 = vpow2.f32 %v3256_v0  ;;  %v3163_v1 = vsub.f32 %v6610_v33, %v3067_v38 }
 0x443   : > { %v6856_v42 = vpop.eup %4772 }
 0x444   : > { %v3258_v8 = vmul.f32 1.442695, %v3163_v1  ;;  %3374 = vadd.xlane.f32.xlu1 %v6849_v25  ;;  %3376 = vadd.xlane.f32.xlu0 %v6852_v11 }
 0x445   : > { %v3069_v52 = vpop.xlane.xlu0 %3068 }
 0x446   : > { %4780 = vpow2.f32 %v3258_v8  ;;  %v3164_v55 = vsub.f32 %v6614_v50, %v3069_v52 }
 0x447   : > { %v6859_v13 = vpop.eup %4774 }
 0x448   : > { %v3260_v4 = vmul.f32 1.442695, %v3164_v55  ;;  %3378 = vadd.xlane.f32.xlu1 %v6856_v42  ;;  %3380 = vadd.xlane.f32.xlu0 %v6859_v13 }
 0x449   : > { %v3071_v33 = vpop.xlane.xlu1 %3070 }
 0x44a   : > { %4782 = vpow2.f32 %v3260_v4  ;;  %v3165_v26 = vsub.f32 %v6618_v58, %v3071_v33 }
 0x44b   : > { %v6864_v63 = vpop.eup %4776 }
 0x44c   : > { %v3262_v20 = vmul.f32 1.442695, %v3165_v26  ;;  %3382 = vadd.xlane.f32.xlu1 %v6864_v63 }
 0x44d   : > { %v3073_v49 = vpop.xlane.xlu0 %3072 }
 0x44e   : > { %4784 = vpow2.f32 %v3262_v20  ;;  %v3166_v50 = vsub.f32 %v6622_v51, %v3073_v49 }
 0x44f   : > { %v6868_v12 = vpop.eup %4778 }
 0x450   : > { %v3264_v0 = vmul.f32 1.442695, %v3166_v50  ;;  %3384 = vadd.xlane.f32.xlu0 %v6868_v12 }
 0x451   : > { %v3075_v38 = vpop.xlane.xlu1 %3074 }
 0x452   : > { %4786 = vpow2.f32 %v3264_v0  ;;  %v3167_v1 = vsub.f32 %v6626_v5, %v3075_v38 }
 0x453   : > { %v6872_v8 = vpop.eup %4780 }
 0x454   : > { %v3266_v58 = vmul.f32 1.442695, %v3167_v1  ;;  %3386 = vadd.xlane.f32.xlu1 %v6872_v8 }
 0x455   : > { %v3077_v52 = vpop.xlane.xlu0 %3076 }
 0x456   : > { %4788 = vpow2.f32 %v3266_v58  ;;  %v3168_v55 = vsub.f32 %v6631_v32, %v3077_v52 }
 0x457   : > { %v6876_v4 = vpop.eup %4782 }
 0x458   : > { %v3268_v51 = vmul.f32 1.442695, %v3168_v55  ;;  %3388 = vadd.xlane.f32.xlu0 %v6876_v4 }
 0x459   : > { %v3079_v33 = vpop.xlane.xlu1 %3078 }
 0x45a   : > { %4790 = vpow2.f32 %v3268_v51  ;;  %v3169_v26 = vsub.f32 %v6636_v7, %v3079_v33 }
 0x45b   : > { %v6880_v20 = vpop.eup %4784 }
 0x45c   : > { %v3270_v5 = vmul.f32 1.442695, %v3169_v26  ;;  %3390 = vadd.xlane.f32.xlu1 %v6880_v20 }
 0x45d   : > { %v3081_v49 = vpop.xlane.xlu0 %3080 }
 0x45e   : > { %4792 = vpow2.f32 %v3270_v5  ;;  %v3170_v50 = vsub.f32 %v6641_v44, %v3081_v49 }
 0x45f   : > { %v6884_v0 = vpop.eup %4786 }
 0x460   : > { %v3272_v32 = vmul.f32 1.442695, %v3170_v50  ;;  %3392 = vadd.xlane.f32.xlu0 %v6884_v0 }
 0x461   : > { %v3083_v38 = vpop.xlane.xlu1 %3082  ;;  %v3325_v1 = vpop.xlane.xlu0 %3324 }
 0x462   : > { %4794 = vpow2.f32 %v3272_v32  ;;  %v3171_v58 = vsub.f32 %v6646_v35, %v3083_v38 }
 0x463   : > { %v6888_v7 = vpop.eup %4788  ;;  %4796 = vrcp.f32 %v3325_v1 }
 0x464   : > { %v3274_v52 = vmul.f32 1.442695, %v3171_v58  ;;  %3394 = vadd.xlane.f32.xlu1 %v6888_v7 }
 0x465   : > { %v3327_v55 = vpop.xlane.xlu1 %3326  ;;  %v3085_v51 = vpop.xlane.xlu0 %3084 }
 0x466   : > { %4798 = vpow2.f32 %v3274_v52  ;;  %v3172_v44 = vsub.f32 %v6654_v34, %v3085_v51 }
 0x467   : > { %v6892_v33 = vpop.eup %4790  ;;  %4800 = vrcp.f32 %v3327_v55 }
 0x468   : > { %v3276_v26 = vmul.f32 1.442695, %v3172_v44  ;;  %3396 = vadd.xlane.f32.xlu0 %v6892_v33 }
 0x469   : > { %v3087_v5 = vpop.xlane.xlu1 %3086  ;;  %v3329_v49 = vpop.xlane.xlu0 %3328 }
 0x46a   : > { %4802 = vpow2.f32 %v3276_v26  ;;  %v3173_v35 = vsub.f32 %v6662_v40, %v3087_v5 }
 0x46b   : > { %v6896_v50 = vpop.eup %4792  ;;  %4804 = vrcp.f32 %v3329_v49 }
 0x46c   : > { %v3278_v32 = vmul.f32 1.442695, %v3173_v35  ;;  %3398 = vadd.xlane.f32.xlu1 %v6896_v50 }
 0x46d   : > { %v3331_v38 = vpop.xlane.xlu1 %3330  ;;  %v3089_v34 = vpop.xlane.xlu0 %3088 }
 0x46e   : > { %4806 = vpow2.f32 %v3278_v32  ;;  %v3174_v1 = vsub.f32 %v6670_v59, %v3089_v34 }
 0x46f   : > { %v6900_v58 = vpop.eup %4794  ;;  %4808 = vrcp.f32 %v3331_v38 }
 0x470   : > { %v3280_v52 = vmul.f32 1.442695, %v3174_v1  ;;  %3400 = vadd.xlane.f32.xlu0 %v6900_v58  ;;  %v4797_v51 = vpop.eup %4796 }
 0x471   : > { %v3091_v55 = vpop.xlane.xlu1 %3090  ;;  %v3333_v40 = vpop.xlane.xlu0 %3332  ;;  %v3516_v59 = vmul.f32 %v4797_v51, %v6649_v31 }
 0x472   : > { %4810 = vpow2.f32 %v3280_v52  ;;  %v3175_v44 = vsub.f32 %v6678_v29, %v3091_v55 }
 0x473   : > { %v6904_v26 = vpop.eup %4798  ;;  %4812 = vrcp.f32 %v3333_v40 }
 0x474   : > { %v4801_v5 = vpop.eup %4800  ;;  %v3282_v49 = vmul.f32 1.442695, %v3175_v44  ;;  %3402 = vadd.xlane.f32.xlu1 %v6904_v26 }
 0x475   : > { %v3517_v35 = vmul.f32 %v4801_v5, %v6657_v54  ;;  %v3335_v32 = vpop.xlane.xlu1 %3334  ;;  %v3093_v38 = vpop.xlane.xlu0 %3092 }
 0x476   : > { %4814 = vpow2.f32 %v3282_v49  ;;  %v3176_v34 = vsub.f32 %v6686_v53, %v3093_v38 }
 0x477   : > { %v6911_v1 = vpop.eup %4802  ;;  %v4284_v29 = vpack.c.bf16 %v3517_v35, %v3516_v59  ;;  %4816 = vrcp.f32 %v3335_v32 }
 0x478   : > { %v3284_v52 = vmul.f32 1.442695, %v3176_v34  ;;  %3404 = vadd.xlane.f32.xlu0 %v6911_v1  ;;  %v4805_v54 = vpop.eup %4804 }
 0x479   : > { %4285 = vst [vmem:[%s6914_s18] sm:$0xff] %v4284_v29   ;;  %v3095_v31 = vpop.xlane.xlu1 %3094  ;;  %v3337_v55 = vpop.xlane.xlu0 %3336  ;;  %v3518_v5 = vmul.f32 %v4805_v54, %v6665_v22 }
 0x47a   : > { %4818 = vpow2.f32 %v3284_v52  ;;  %v3177_v40 = vsub.f32 %v6694_v15, %v3095_v31 }
 0x47b   : > { %v6918_v51 = vpop.eup %4806  ;;  %4820 = vrcp.f32 %v3337_v55 }
 0x47c   : > { %v4809_v53 = vpop.eup %4808  ;;  %v3286_v44 = vmul.f32 1.442695, %v3177_v40  ;;  %3406 = vadd.xlane.f32.xlu1 %v6918_v51 }
 0x47d   : > { %v3519_v49 = vmul.f32 %v4809_v53, %v6673_v56  ;;  %v3339_v59 = vpop.xlane.xlu1 %3338  ;;  %v3097_v35 = vpop.xlane.xlu0 %3096 }
 0x47e   : > { %4822 = vpow2.f32 %v3286_v44  ;;  %v3178_v32 = vsub.f32 %v6702_v17, %v3097_v35 }
 0x47f   : > { %v6924_v38 = vpop.eup %4810  ;;  %v4289_v15 = vpack.c.bf16 %v3519_v49, %v3518_v5  ;;  %4824 = vrcp.f32 %v3339_v59 }
 0x480   : > { %v3288_v34 = vmul.f32 1.442695, %v3178_v32  ;;  %3408 = vadd.xlane.f32.xlu0 %v6924_v38  ;;  %v4813_v31 = vpop.eup %4812 }
 0x481   : > { %4441 = vst [vmem:[%s6914_s18 + $0x8] sm:$0xff] %v4289_v15   ;;  %v3099_v29 = vpop.xlane.xlu1 %3098  ;;  %v3341_v52 = vpop.xlane.xlu0 %3340  ;;  %v3520_v17 = vmul.f32 %v4813_v31, %v6681_v3 }
 0x482   : > { %4826 = vpow2.f32 %v3288_v34  ;;  %v3179_v22 = vsub.f32 %v6710_v30, %v3099_v29 }
 0x483   : > { %v6929_v56 = vpop.eup %4814  ;;  %4828 = vrcp.f32 %v3341_v52 }
 0x484   : > { %v4817_v55 = vpop.eup %4816  ;;  %v3290_v54 = vmul.f32 1.442695, %v3179_v22  ;;  %3410 = vadd.xlane.f32.xlu1 %v6929_v56 }
 0x485   : > { %v3521_v40 = vmul.f32 %v4817_v55, %v6689_v27  ;;  %v3343_v53 = vpop.xlane.xlu1 %3342  ;;  %v3101_v44 = vpop.xlane.xlu0 %3100 }
 0x486   : > { %4830 = vpow2.f32 %v3290_v54  ;;  %v3180_v5 = vsub.f32 %v6718_v37, %v3101_v44 }
 0x487   : > { %v6935_v49 = vpop.eup %4818  ;;  %v4294_v30 = vpack.c.bf16 %v3521_v40, %v3520_v17  ;;  %4832 = vrcp.f32 %v3343_v53 }
 0x488   : > { %v3292_v59 = vmul.f32 1.442695, %v3180_v5  ;;  %3412 = vadd.xlane.f32.xlu0 %v6935_v49  ;;  %v4821_v15 = vpop.eup %4820 }
 0x489   : > { %4442 = vst [vmem:[%s6914_s18 + $0x10] sm:$0xff] %v4294_v30   ;;  %v3103_v35 = vpop.xlane.xlu1 %3102  ;;  %v3345_v32 = vpop.xlane.xlu0 %3344  ;;  %v3522_v37 = vmul.f32 %v4821_v15, %v6697_v36 }
 0x48a   : > { %4834 = vpow2.f32 %v3292_v59  ;;  %v3181_v3 = vsub.f32 %v6726_v47, %v3103_v35 }
 0x48b   : > { %v6940_v27 = vpop.eup %4822  ;;  %4836 = vrcp.f32 %v3345_v32 }
 0x48c   : > { %v4825_v34 = vpop.eup %4824  ;;  %v3294_v29 = vmul.f32 1.442695, %v3181_v3  ;;  %3414 = vadd.xlane.f32.xlu1 %v6940_v27 }
 0x48d   : > { %v3523_v52 = vmul.f32 %v4825_v34, %v6705_v62  ;;  %v3347_v31 = vpop.xlane.xlu1 %3346  ;;  %v3105_v22 = vpop.xlane.xlu0 %3104 }
 0x48e   : > { %4838 = vpow2.f32 %v3294_v29  ;;  %v3182_v55 = vsub.f32 %v6734_v10, %v3105_v22 }
 0x48f   : > { %v6946_v54 = vpop.eup %4826  ;;  %v4299_v47 = vpack.c.bf16 %v3523_v52, %v3522_v37  ;;  %4840 = vrcp.f32 %v3347_v31 }
 0x490   : > { %v3296_v17 = vmul.f32 1.442695, %v3182_v55  ;;  %3416 = vadd.xlane.f32.xlu0 %v6946_v54  ;;  %v4829_v44 = vpop.eup %4828 }
 0x491   : > { %4443 = vst [vmem:[%s6914_s18 + $0x18] sm:$0xff] %v4299_v47   ;;  %v3107_v40 = vpop.xlane.xlu1 %3106  ;;  %v3349_v53 = vpop.xlane.xlu0 %3348  ;;  %v3524_v10 = vmul.f32 %v4829_v44, %v6713_v23 }
 0x492   : > { %4842 = vpow2.f32 %v3296_v17  ;;  %v3183_v36 = vsub.f32 %v6742_v43, %v3107_v40 }
 0x493   : > { %v6951_v62 = vpop.eup %4830  ;;  %4844 = vrcp.f32 %v3349_v53 }
 0x494   : > { %v4833_v5 = vpop.eup %4832  ;;  %v3298_v30 = vmul.f32 1.442695, %v3183_v36  ;;  %3418 = vadd.xlane.f32.xlu1 %v6951_v62 }
 0x495   : > { %v3525_v59 = vmul.f32 %v4833_v5, %v6721_v39  ;;  %v3351_v35 = vpop.xlane.xlu1 %3350  ;;  %v3109_v32 = vpop.xlane.xlu0 %3108 }
 0x496   : > { %4846 = vpow2.f32 %v3298_v30  ;;  %v3184_v15 = vsub.f32 %v6750_v18, %v3109_v32 }
 0x497   : > { %v6957_v3 = vpop.eup %4834  ;;  %v4304_v43 = vpack.c.bf16 %v3525_v59, %v3524_v10  ;;  %4848 = vrcp.f32 %v3351_v35  ;;  %v7226_v35 = vld [vmem:[#allocation17_spill] sm:$0xff] }
 0x498   : > { %v3300_v34 = vmul.f32 1.442695, %v3184_v15  ;;  %3420 = vadd.xlane.f32.xlu0 %v6957_v3  ;;  %v4837_v52 = vpop.eup %4836 }
 0x499   : > { %4444 = vst [vmem:[%s6914_s18 + $0x20] sm:$0xff] %v4304_v43   ;;  %v3111_v29 = vpop.xlane.xlu1 %3110  ;;  %v3353_v37 = vpop.xlane.xlu0 %3352  ;;  %v3526_v18 = vmul.f32 %v4837_v52, %v6729_v57 }
 0x49a   : > { %4850 = vpow2.f32 %v3300_v34  ;;  %v3185_v23 = vsub.f32 %v6758_v19, %v3111_v29  ;;  %v7227_v34 = vld [vmem:[#allocation20_spill] sm:$0xff] }
 0x49b   : > { %v6962_v39 = vpop.eup %4838  ;;  %4852 = vrcp.f32 %v3353_v37 }
 0x49c   : > { %v4841_v31 = vpop.eup %4840  ;;  %v3302_v22 = vmul.f32 1.442695, %v3185_v23  ;;  %3422 = vadd.xlane.f32.xlu1 %v6962_v39 }
 0x49d   : > { %v3527_v55 = vmul.f32 %v4841_v31, %v6737_v61  ;;  %v3355_v47 = vpop.xlane.xlu1 %3354  ;;  %v3113_v17 = vpop.xlane.xlu0 %3112 }
 0x49e   : > { %4854 = vpow2.f32 %v3302_v22  ;;  %v3186_v40 = vsub.f32 %v6766_v46, %v3113_v17 }
 0x49f   : > { %v6968_v53 = vpop.eup %4842  ;;  %v4309_v19 = vpack.c.bf16 %v3527_v55, %v3526_v18  ;;  %4856 = vrcp.f32 %v3355_v47 }
 0x4a0   : > { %v3304_v44 = vmul.f32 1.442695, %v3186_v40  ;;  %3424 = vadd.xlane.f32.xlu0 %v6968_v53  ;;  %v4845_v30 = vpop.eup %4844  ;;  %v7229_v40 = vld [vmem:[#allocation16_spill] sm:$0xff] }
 0x4a1   : > { %4445 = vst [vmem:[%s6914_s18 + $0x28] sm:$0xff] %v4309_v19   ;;  %v3115_v36 = vpop.xlane.xlu1 %3114  ;;  %v3357_v5 = vpop.xlane.xlu0 %3356  ;;  %v3528_v46 = vmul.f32 %v4845_v30, %v6745_v48  ;;  %v7228_v48 = vld [vmem:[#allocation21_spill] sm:$0xff] }
 0x4a2   : > { %4858 = vpow2.f32 %v3304_v44  ;;  %v3187_v57 = vsub.f32 %v6774_v45, %v3115_v36  ;;  %v7230_v44 = vld [vmem:[#allocation18_spill] sm:$0xff] }
 0x4a3   : > { %v6973_v61 = vpop.eup %4846  ;;  %4860 = vrcp.f32 %v3357_v5 }
 0x4a4   : > { %v4849_v10 = vpop.eup %4848  ;;  %v3306_v59 = vmul.f32 1.442695, %v3187_v57  ;;  %3426 = vadd.xlane.f32.xlu1 %v6973_v61  ;;  %v7231_v57 = vld [vmem:[#allocation23_spill] sm:$0xff] }
 0x4a5   : > { %v3529_v32 = vmul.f32 %v4849_v10, %v7226_v35  ;;  %v3359_v15 = vpop.xlane.xlu1 %3358  ;;  %v3117_v43 = vpop.xlane.xlu0 %3116 }
 0x4a6   : > { %4862 = vpow2.f32 %v3306_v59  ;;  %v3188_v29 = vsub.f32 %v7227_v34, %v3117_v43 }
 0x4a7   : > { %v6979_v37 = vpop.eup %4850  ;;  %v4314_v45 = vpack.c.bf16 %v3529_v32, %v3528_v46  ;;  %4864 = vrcp.f32 %v3359_v15 }
 0x4a8   : > { %v3308_v52 = vmul.f32 1.442695, %v3188_v29  ;;  %3428 = vadd.xlane.f32.xlu0 %v6979_v37  ;;  %v4853_v22 = vpop.eup %4852 }
 0x4a9   : > { %4446 = vst [vmem:[%s6914_s18 + $0x30] sm:$0xff] %v4314_v45   ;;  %v3119_v23 = vpop.xlane.xlu1 %3118  ;;  %v3361_v31 = vpop.xlane.xlu0 %3360  ;;  %v3530_v19 = vmul.f32 %v4853_v22, %v7229_v40 }
 0x4aa   : > { %4866 = vpow2.f32 %v3308_v52  ;;  %v3189_v18 = vsub.f32 %v7228_v48, %v3119_v23  ;;  %v7232_v52 = vld [vmem:[#allocation19_spill] sm:$0xff] }
 0x4ab   : > { %v6984_v55 = vpop.eup %4854  ;;  %4868 = vrcp.f32 %v3361_v31  ;;  %v7233_v31 = vld [vmem:[#allocation15_spill] sm:$0xff] }
 0x4ac   : > { %v4857_v47 = vpop.eup %4856  ;;  %v3310_v17 = vmul.f32 1.442695, %v3189_v18  ;;  %3430 = vadd.xlane.f32.xlu1 %v6984_v55 }
 0x4ad   : > { %v3531_v36 = vmul.f32 %v4857_v47, %v7230_v44  ;;  %v3363_v5 = vpop.xlane.xlu1 %3362  ;;  %v3121_v30 = vpop.xlane.xlu0 %3120 }
 0x4ae   : > { %4870 = vpow2.f32 %v3310_v17  ;;  %v3190_v10 = vsub.f32 %v7231_v57, %v3121_v30 }
 0x4af   : > { %v6990_v59 = vpop.eup %4858  ;;  %v4319_v46 = vpack.c.bf16 %v3531_v36, %v3530_v19  ;;  %4872 = vrcp.f32 %v3363_v5 }
 0x4b0   : > { %v3312_v35 = vmul.f32 1.442695, %v3190_v10  ;;  %3432 = vadd.xlane.f32.xlu0 %v6990_v59  ;;  %v4861_v15 = vpop.eup %4860  ;;  %v7235_v10 = vld [vmem:[#allocation24_spill] sm:$0xff] }
 0x4b1   : > { %4447 = vst [vmem:[%s6914_s18 + $0x38] sm:$0xff] %v4319_v46   ;;  %v3123_v32 = vpop.xlane.xlu1 %3122  ;;  %v3532_v23 = vmul.f32 %v4861_v15, %v7232_v52 }
 0x4b2   : > { %4874 = vpow2.f32 %v3312_v35  ;;  %v3191_v43 = vsub.f32 %v6805_v2, %v3123_v32 }
 0x4b3   : > { %v6995_v34 = vpop.eup %4862 }
 0x4b4   : > { %v4865_v29 = vpop.eup %4864  ;;  %v3314_v45 = vmul.f32 1.442695, %v3191_v43  ;;  %3434 = vadd.xlane.f32.xlu1 %v6995_v34 }
 0x4b5   : > { %v3533_v22 = vmul.f32 %v4865_v29, %v7233_v31  ;;  %v3125_v48 = vpop.xlane.xlu0 %3124 }
 0x4b6   : > { %4876 = vpow2.f32 %v3314_v45  ;;  %v3192_v18 = vsub.f32 %v6811_v9, %v3125_v48  ;;  %v7234_v9 = vld [vmem:[#allocation22_spill] sm:$0xff] }
 0x4b7   : > { %v7001_v47 = vpop.eup %4866  ;;  %v4324_v17 = vpack.c.bf16 %v3533_v22, %v3532_v23 }
 0x4b8   : > { %v3316_v40 = vmul.f32 1.442695, %v3192_v18  ;;  %3436 = vadd.xlane.f32.xlu0 %v7001_v47  ;;  %v4869_v19 = vpop.eup %4868 }
 0x4b9   : > { %4448 = vst [vmem:[%s6914_s18 + $0x40] sm:$0xff] %v4324_v17   ;;  %v3127_v2 = vpop.xlane.xlu1 %3126  ;;  %v3534_v57 = vmul.f32 %v4869_v19, %v7234_v9 }
 0x4ba   : > { %4878 = vpow2.f32 %v3316_v40  ;;  %v3193_v44 = vsub.f32 %v6816_v21, %v3127_v2 }
 0x4bb   : > { %v7006_v36 = vpop.eup %4870 }
 0x4bc   : > { %v4873_v5 = vpop.eup %4872  ;;  %v3318_v30 = vmul.f32 1.442695, %v3193_v44  ;;  %3438 = vadd.xlane.f32.xlu1 %v7006_v36 }
 0x4bd   : > { %v3535_v46 = vmul.f32 %v4873_v5, %v7235_v10  ;;  %v3129_v35 = vpop.xlane.xlu0 %3128 }
 0x4be   : > { %4880 = vpow2.f32 %v3318_v30  ;;  %v3194_v32 = vsub.f32 %v6821_v60, %v3129_v35 }
 0x4bf   : > { %v7012_v15 = vpop.eup %4874  ;;  %v4329_v43 = vpack.c.bf16 %v3535_v46, %v3534_v57 }
 0x4c0   : > { %v3320_v29 = vmul.f32 1.442695, %v3194_v32  ;;  %3440 = vadd.xlane.f32.xlu0 %v7012_v15 }
 0x4c1   : > { %4449 = vst [vmem:[%s6914_s18 + $0x48] sm:$0xff] %v4329_v43   ;;  %v3131_v21 = vpop.xlane.xlu1 %3130  ;;  %v3365_v45 = vpop.xlane.xlu0 %3364 }
 0x4c2   : > { %4882 = vpow2.f32 %v3320_v29  ;;  %v3195_v52 = vsub.f32 %v6828_v16, %v3131_v21 }
 0x4c3   : > { %v7017_v23 = vpop.eup %4876  ;;  %4884 = vrcp.f32 %v3365_v45 }
 0x4c4   : > { %v3322_v31 = vmul.f32 1.442695, %v3195_v52  ;;  %3442 = vadd.xlane.f32.xlu1 %v7017_v23 }
 0x4c5   : > { %v3367_v22 = vpop.xlane.xlu1 %3366  ;;  %v3369_v60 = vpop.xlane.xlu0 %3368 }
 0x4c6   : > { %4886 = vpow2.f32 %v3322_v31 }
 0x4c7   : > { %v7020_v48 = vpop.eup %4878  ;;  %4888 = vrcp.f32 %v3367_v22 }
 0x4c8   : > { %4890 = vrcp.f32 %v3369_v60  ;;  %3444 = vadd.xlane.f32.xlu0 %v7020_v48 }
 0x4c9   : > { %v3371_v18 = vpop.xlane.xlu1 %3370  ;;  %v3373_v17 = vpop.xlane.xlu0 %3372 }
 0x4ca   : > { %4892 = vrcp.f32 %v3371_v18 }
 0x4cb   : > { %v7023_v40 = vpop.eup %4880  ;;  %4894 = vrcp.f32 %v3373_v17 }
 0x4cc   : > { %3446 = vadd.xlane.f32.xlu1 %v7023_v40 }
 0x4cd   : > { %v3375_v16 = vpop.xlane.xlu1 %3374  ;;  %v3377_v2 = vpop.xlane.xlu0 %3376 }
 0x4ce   : > { %4896 = vrcp.f32 %v3375_v16 }
 0x4cf   : > { %v7026_v19 = vpop.eup %4882  ;;  %4898 = vrcp.f32 %v3377_v2 }
 0x4d0   : > { %3448 = vadd.xlane.f32.xlu0 %v7026_v19  ;;  %v4885_v30 = vpop.eup %4884 }
 0x4d1   : > { %v3379_v44 = vpop.xlane.xlu1 %3378  ;;  %v3381_v5 = vpop.xlane.xlu0 %3380  ;;  %v3536_v46 = vmul.f32 %v4885_v30, %v6831_v6 }
 0x4d2   : > { %4900 = vrcp.f32 %v3379_v44 }
 0x4d3   : > { %v7029_v9 = vpop.eup %4886  ;;  %4902 = vrcp.f32 %v3381_v5 }
 0x4d4   : > { %v4889_v57 = vpop.eup %4888  ;;  %3450 = vadd.xlane.f32.xlu1 %v7029_v9 }
 0x4d5   : > { %v4891_v10 = vpop.eup %4890  ;;  %v3537_v35 = vmul.f32 %v4889_v57, %v6835_v28  ;;  %v3383_v32 = vpop.xlane.xlu1 %3382 }
 0x4d6   : > { %4904 = vrcp.f32 %v3383_v32  ;;  %v3538_v21 = vmul.f32 %v4891_v10, %v6838_v24 }
 0x4d7   : > { %v4893_v43 = vpop.eup %4892  ;;  %v4334_v29 = vpack.c.bf16 %v3537_v35, %v3536_v46 }
 0x4d8   : > { %v3539_v45 = vmul.f32 %v4893_v43, %v6842_v14  ;;  %v4895_v52 = vpop.eup %4894 }
 0x4d9   : > { %4450 = vst [vmem:[%s6914_s18 + $0x50] sm:$0xff] %v4334_v29   ;;  %v3385_v31 = vpop.xlane.xlu0 %3384  ;;  %v3540_v6 = vmul.f32 %v4895_v52, %v6845_v41 }
 0x4da   : > { %v4339_v22 = vpack.c.bf16 %v3539_v45, %v3538_v21  ;;  %4906 = vrcp.f32 %v3385_v31 }
 0x4db   : > { %v4897_v60 = vpop.eup %4896 }
 0x4dc   : > { %4451 = vst [vmem:[%s6914_s18 + $0x58] sm:$0xff] %v4339_v22   ;;  %v3541_v28 = vmul.f32 %v4897_v60, %v6849_v25  ;;  %v4899_v18 = vpop.eup %4898 }
 0x4dd   : > { %v3387_v17 = vpop.xlane.xlu1 %3386  ;;  %v3542_v14 = vmul.f32 %v4899_v18, %v6852_v11 }
 0x4de   : > { %v4344_v16 = vpack.c.bf16 %v3541_v28, %v3540_v6  ;;  %4908 = vrcp.f32 %v3387_v17 }
 0x4df   : > { %v4901_v24 = vpop.eup %4900 }
 0x4e0   : > { %4452 = vst [vmem:[%s6914_s18 + $0x60] sm:$0xff] %v4344_v16   ;;  %v3543_v2 = vmul.f32 %v4901_v24, %v6856_v42  ;;  %v4903_v44 = vpop.eup %4902 }
 0x4e1   : > { %v3389_v5 = vpop.xlane.xlu0 %3388  ;;  %v3544_v41 = vmul.f32 %v4903_v44, %v6859_v13 }
 0x4e2   : > { %v4349_v30 = vpack.c.bf16 %v3543_v2, %v3542_v14  ;;  %4910 = vrcp.f32 %v3389_v5 }
 0x4e3   : > { %v4905_v57 = vpop.eup %4904 }
 0x4e4   : > { %4453 = vst [vmem:[%s6914_s18 + $0x68] sm:$0xff] %v4349_v30   ;;  %v3545_v25 = vmul.f32 %v4905_v57, %v6864_v63 }
 0x4e5   : > { %v3391_v10 = vpop.xlane.xlu1 %3390 }
 0x4e6   : > { %v4354_v46 = vpack.c.bf16 %v3545_v25, %v3544_v41  ;;  %4912 = vrcp.f32 %v3391_v10 }
 0x4e7   : > { %v4907_v35 = vpop.eup %4906 }
 0x4e8   : > { %4454 = vst [vmem:[%s6914_s18 + $0x70] sm:$0xff] %v4354_v46   ;;  %v3546_v42 = vmul.f32 %v4907_v35, %v6868_v12 }
 0x4e9   : > { %v3393_v32 = vpop.xlane.xlu0 %3392 }
 0x4ea   : > { %4914 = vrcp.f32 %v3393_v32 }
 0x4eb   : > { %v4909_v11 = vpop.eup %4908 }
 0x4ec   : > { %v3547_v43 = vmul.f32 %v4909_v11, %v6872_v8 }
 0x4ed   : > { %v3395_v29 = vpop.xlane.xlu1 %3394 }
 0x4ee   : > { %v4359_v21 = vpack.c.bf16 %v3547_v43, %v3546_v42  ;;  %4916 = vrcp.f32 %v3395_v29 }
 0x4ef   : > { %v4911_v13 = vpop.eup %4910 }
 0x4f0   : > { %4455 = vst [vmem:[%s6914_s18 + $0x78] sm:$0xff] %v4359_v21   ;;  %v3548_v52 = vmul.f32 %v4911_v13, %v6876_v4 }
 0x4f1   : > { %v3397_v63 = vpop.xlane.xlu0 %3396 }
 0x4f2   : > { %4918 = vrcp.f32 %v3397_v63 }
 0x4f3   : > { %v4913_v45 = vpop.eup %4912 }
 0x4f4   : > { %v3549_v31 = vmul.f32 %v4913_v45, %v6880_v20 }
 0x4f5   : > { %v3399_v22 = vpop.xlane.xlu1 %3398 }
 0x4f6   : > { %v4364_v60 = vpack.c.bf16 %v3549_v31, %v3548_v52  ;;  %4920 = vrcp.f32 %v3399_v22 }
 0x4f7   : > { %v4915_v12 = vpop.eup %4914 }
 0x4f8   : > { %4456 = vst [vmem:[%s6914_s18 + $0x80] sm:$0xff] %v4364_v60   ;;  %v3550_v28 = vmul.f32 %v4915_v12, %v6884_v0 }
 0x4f9   : > { %v3401_v8 = vpop.xlane.xlu0 %3400 }
 0x4fa   : > { %4922 = vrcp.f32 %v3401_v8 }
 0x4fb   : > { %v4917_v6 = vpop.eup %4916 }
 0x4fc   : > { %v3551_v18 = vmul.f32 %v4917_v6, %v6888_v7 }
 0x4fd   : > { %v3403_v17 = vpop.xlane.xlu1 %3402 }
 0x4fe   : > { %v4369_v16 = vpack.c.bf16 %v3551_v18, %v3550_v28  ;;  %4924 = vrcp.f32 %v3403_v17 }
 0x4ff   : > { %v4919_v4 = vpop.eup %4918 }
 0x500   : > { %4457 = vst [vmem:[%s6914_s18 + $0x88] sm:$0xff] %v4369_v16   ;;  %v3552_v14 = vmul.f32 %v4919_v4, %v6892_v33 }
 0x501   : > { %v3405_v20 = vpop.xlane.xlu0 %3404 }
 0x502   : > { %4926 = vrcp.f32 %v3405_v20 }
 0x503   : > { %v4921_v24 = vpop.eup %4920 }
 0x504   : > { %v3553_v2 = vmul.f32 %v4921_v24, %v6896_v50 }
 0x505   : > { %v3407_v44 = vpop.xlane.xlu1 %3406 }
 0x506   : > { %v4374_v5 = vpack.c.bf16 %v3553_v2, %v3552_v14  ;;  %4928 = vrcp.f32 %v3407_v44 }
 0x507   : > { %v4923_v0 = vpop.eup %4922 }
 0x508   : > { %4458 = vst [vmem:[%s6914_s18 + $0x90] sm:$0xff] %v4374_v5   ;;  %v3554_v57 = vmul.f32 %v4923_v0, %v6900_v58 }
 0x509   : > { %v3409_v7 = vpop.xlane.xlu0 %3408 }
 0x50a   : > { %4930 = vrcp.f32 %v3409_v7 }
 0x50b   : > { %v4925_v30 = vpop.eup %4924 }
 0x50c   : > { %v3555_v41 = vmul.f32 %v4925_v30, %v6904_v26 }
 0x50d   : > { %v3411_v25 = vpop.xlane.xlu1 %3410 }
 0x50e   : > { %v4379_v10 = vpack.c.bf16 %v3555_v41, %v3554_v57  ;;  %4932 = vrcp.f32 %v3411_v25 }
 0x50f   : > { %v4927_v33 = vpop.eup %4926 }
 0x510   : > { %4459 = vst [vmem:[%s6914_s18 + $0x98] sm:$0xff] %v4379_v10   ;;  %v3556_v35 = vmul.f32 %v4927_v33, %v6911_v1 }
 0x511   : > { %v3413_v50 = vpop.xlane.xlu0 %3412 }
 0x512   : > { %4934 = vrcp.f32 %v3413_v50 }
 0x513   : > { %v4929_v46 = vpop.eup %4928 }
 0x514   : > { %v3557_v32 = vmul.f32 %v4929_v46, %v6918_v51 }
 0x515   : > { %v3415_v11 = vpop.xlane.xlu1 %3414 }
 0x516   : > { %v4384_v42 = vpack.c.bf16 %v3557_v32, %v3556_v35  ;;  %4936 = vrcp.f32 %v3415_v11 }
 0x517   : > { %v4931_v58 = vpop.eup %4930 }
 0x518   : > { %4460 = vst [vmem:[%s6914_s18 + $0xa0] sm:$0xff] %v4384_v42   ;;  %v3558_v29 = vmul.f32 %v4931_v58, %v6924_v38 }
 0x519   : > { %v3417_v26 = vpop.xlane.xlu0 %3416 }
 0x51a   : > { %4938 = vrcp.f32 %v3417_v26 }
 0x51b   : > { %v4933_v43 = vpop.eup %4932 }
 0x51c   : > { %v3559_v21 = vmul.f32 %v4933_v43, %v6929_v56 }
 0x51d   : > { %v3419_v13 = vpop.xlane.xlu1 %3418 }
 0x51e   : > { %v4389_v63 = vpack.c.bf16 %v3559_v21, %v3558_v29  ;;  %4940 = vrcp.f32 %v3419_v13 }
 0x51f   : > { %v4935_v1 = vpop.eup %4934 }
 0x520   : > { %4461 = vst [vmem:[%s6914_s18 + $0xa8] sm:$0xff] %v4389_v63   ;;  %v3560_v52 = vmul.f32 %v4935_v1, %v6935_v49 }
 0x521   : > { %v3421_v51 = vpop.xlane.xlu0 %3420 }
 0x522   : > { %4942 = vrcp.f32 %v3421_v51 }
 0x523   : > { %v4937_v45 = vpop.eup %4936 }
 0x524   : > { %v3561_v31 = vmul.f32 %v4937_v45, %v6940_v27 }
 0x525   : > { %v3423_v22 = vpop.xlane.xlu1 %3422 }
 0x526   : > { %v4394_v60 = vpack.c.bf16 %v3561_v31, %v3560_v52  ;;  %4944 = vrcp.f32 %v3423_v22 }
 0x527   : > { %v4939_v38 = vpop.eup %4938 }
 0x528   : > { %4462 = vst [vmem:[%s6914_s18 + $0xb0] sm:$0xff] %v4394_v60   ;;  %v3562_v8 = vmul.f32 %v4939_v38, %v6946_v54 }
 0x529   : > { %v3425_v56 = vpop.xlane.xlu0 %3424 }
 0x52a   : > { %4946 = vrcp.f32 %v3425_v56 }
 0x52b   : > { %v4941_v12 = vpop.eup %4940 }
 0x52c   : > { %v3563_v6 = vmul.f32 %v4941_v12, %v6951_v62 }
 0x52d   : > { %v3427_v28 = vpop.xlane.xlu1 %3426 }
 0x52e   : > { %v4399_v18 = vpack.c.bf16 %v3563_v6, %v3562_v8  ;;  %4948 = vrcp.f32 %v3427_v28 }
 0x52f   : > { %v4943_v49 = vpop.eup %4942 }
 0x530   : > { %4463 = vst [vmem:[%s6914_s18 + $0xb8] sm:$0xff] %v4399_v18   ;;  %v3564_v16 = vmul.f32 %v4943_v49, %v6957_v3 }
 0x531   : > { %v3429_v27 = vpop.xlane.xlu0 %3428 }
 0x532   : > { %4950 = vrcp.f32 %v3429_v27 }
 0x533   : > { %v4945_v17 = vpop.eup %4944 }
 0x534   : > { %v3565_v4 = vmul.f32 %v4945_v17, %v6962_v39 }
 0x535   : > { %v3431_v20 = vpop.xlane.xlu1 %3430 }
 0x536   : > { %v4404_v24 = vpack.c.bf16 %v3565_v4, %v3564_v16  ;;  %4952 = vrcp.f32 %v3431_v20 }
 0x537   : > { %v4947_v54 = vpop.eup %4946 }
 0x538   : > { %4464 = vst [vmem:[%s6914_s18 + $0xc0] sm:$0xff] %v4404_v24   ;;  %v3566_v2 = vmul.f32 %v4947_v54, %v6968_v53 }
 0x539   : > { %v3433_v62 = vpop.xlane.xlu0 %3432 }
 0x53a   : > { %4954 = vrcp.f32 %v3433_v62 }
 0x53b   : > { %v4949_v14 = vpop.eup %4948 }
 0x53c   : > { %v3567_v44 = vmul.f32 %v4949_v14, %v6973_v61 }
 0x53d   : > { %v3435_v5 = vpop.xlane.xlu1 %3434 }
 0x53e   : > { %v4409_v0 = vpack.c.bf16 %v3567_v44, %v3566_v2  ;;  %4956 = vrcp.f32 %v3435_v5 }
 0x53f   : > { %v4951_v3 = vpop.eup %4950 }
 0x540   : > { %4465 = vst [vmem:[%s6914_s18 + $0xc8] sm:$0xff] %v4409_v0   ;;  %v3568_v30 = vmul.f32 %v4951_v3, %v6979_v37 }
 0x541   : > { %v3437_v39 = vpop.xlane.xlu0 %3436 }
 0x542   : > { %4958 = vrcp.f32 %v3437_v39 }
 0x543   : > { %v4953_v7 = vpop.eup %4952 }
 0x544   : > { %v3569_v57 = vmul.f32 %v4953_v7, %v6984_v55 }
 0x545   : > { %v3439_v41 = vpop.xlane.xlu1 %3438 }
 0x546   : > { %v4414_v25 = vpack.c.bf16 %v3569_v57, %v3568_v30  ;;  %4960 = vrcp.f32 %v3439_v41 }
 0x547   : > { %v4955_v53 = vpop.eup %4954 }
 0x548   : > { %4466 = vst [vmem:[%s6914_s18 + $0xd0] sm:$0xff] %v4414_v25   ;;  %v3570_v33 = vmul.f32 %v4955_v53, %v6990_v59 }
 0x549   : > { %v3441_v61 = vpop.xlane.xlu0 %3440 }
 0x54a   : > { %4962 = vrcp.f32 %v3441_v61 }
 0x54b   : > { %v4957_v10 = vpop.eup %4956 }
 0x54c   : > { %v3571_v50 = vmul.f32 %v4957_v10, %v6995_v34 }
 0x54d   : > { %v3443_v46 = vpop.xlane.xlu1 %3442 }
 0x54e   : > { %v4419_v35 = vpack.c.bf16 %v3571_v50, %v3570_v33  ;;  %4964 = vrcp.f32 %v3443_v46 }
 0x54f   : > { %v4959_v37 = vpop.eup %4958 }
 0x550   : > { %4467 = vst [vmem:[%s6914_s18 + $0xd8] sm:$0xff] %v4419_v35   ;;  %v3572_v11 = vmul.f32 %v4959_v37, %v7001_v47 }
 0x551   : > { %v3445_v55 = vpop.xlane.xlu0 %3444 }
 0x552   : > { %4966 = vrcp.f32 %v3445_v55 }
 0x553   : > { %v4961_v32 = vpop.eup %4960 }
 0x554   : > { %v3573_v42 = vmul.f32 %v4961_v32, %v7006_v36 }
 0x555   : > { %v3447_v58 = vpop.xlane.xlu1 %3446 }
 0x556   : > { %v4424_v26 = vpack.c.bf16 %v3573_v42, %v3572_v11  ;;  %4968 = vrcp.f32 %v3447_v58 }
 0x557   : > { %v4963_v59 = vpop.eup %4962 }
 0x558   : > { %4468 = vst [vmem:[%s6914_s18 + $0xe0] sm:$0xff] %v4424_v26   ;;  %v3574_v29 = vmul.f32 %v4963_v59, %v7012_v15 }
 0x559   : > { %v3449_v34 = vpop.xlane.xlu0 %3448 }
 0x55a   : > { %4970 = vrcp.f32 %v3449_v34 }
 0x55b   : > { %v4965_v43 = vpop.eup %4964 }
 0x55c   : > { %v3575_v21 = vmul.f32 %v4965_v43, %v7017_v23 }
 0x55d   : > { %v3451_v47 = vpop.xlane.xlu1 %3450 }
 0x55e   : > { %v4429_v13 = vpack.c.bf16 %v3575_v21, %v3574_v29  ;;  %4972 = vrcp.f32 %v3451_v47 }
 0x55f   : > { %v4967_v36 = vpop.eup %4966 }
 0x560   : > { %4469 = vst [vmem:[%s6914_s18 + $0xe8] sm:$0xff] %v4429_v13   ;;  %v3576_v1 = vmul.f32 %v4967_v36, %v7020_v48 }
 0x563   : > { %v4969_v63 = vpop.eup %4968 }
 0x564   : > { %v3577_v51 = vmul.f32 %v4969_v63, %v7023_v40 }
 0x566   : > { %v4434_v45 = vpack.c.bf16 %v3577_v51, %v3576_v1 }
 0x567   : > { %v4971_v52 = vpop.eup %4970 }
 0x568   : > { %4470 = vst [vmem:[%s6914_s18 + $0xf0] sm:$0xff] %v4434_v45   ;;  %v3578_v23 = vmul.f32 %v4971_v52, %v7026_v19 }
 0x56b   : > { %v4973_v15 = vpop.eup %4972 }
 0x56c   : > { %v3579_v31 = vmul.f32 %v4973_v15, %v7029_v9 }
 0x56e   : > { %v4439_v48 = vpack.c.bf16 %v3579_v31, %v3578_v23 }
 0x570   : > { %4471 = vst [vmem:[%s6914_s18 + $0xf8] sm:$0xff] %v4439_v48  }
 0x571   : > { %5094 = shalt.err (!%p5091_p9)
}
 0x572   : > { %s5095_s15 = scalar_lea.hbm %s7102_s30, 4096  ;;  %s5099_s19 = scalar_lea.hbm %s7155_s7, 8192 }
 0x573   : > { %p5096_p1 = scmp.ne.s32.totalorder %s7102_s30, %s5095_s15  ;;  %p5100_p11 = scmp.lt.s32.totalorder %s7102_s30, %s7155_s7 }
 0x574   : > { %p5101_p13 = scmp.lt.s32.totalorder %s5099_s19, %s5095_s15 }
 0x575   : > { %p5097_p8 = pnand %p5096_p1, %p7236_p6 }
 0x576   : > { %p5102_p2 = por %p5101_p13, %p5100_p11 }
 0x577   : > { %p5098_p10 = pneg %p5097_p8 }
 0x579   : > { %p5103_p4 = pnand %p5102_p2, %p5098_p10 }
 0x57b   : > { %5106 = shalt.err (!%p5103_p4)
}
 0x57c   : > { %s5167_s23 = smov 64   ;;  %s5168_s29 = smov 4  }
 0x57d   : > { %4486 = dma.vmem_to_hbm [thread:$0]  (%p7236_p6), %s7104_s1, 4096, %s7102_s30, %s3901_s9, %s5167_s23, %s5167_s23, %s5168_s29  }
 0x57e PF: > { %s3929_s28 = sand.u32 1, %s5141_s24   ;;  %p7237_p12 = scmp.ne.s32.totalorder %s7178_s8, 0 }
 0x57f   : > { %p7238_p0 = scmp.ge.s32.totalorder %s5153_s27, 2  ;;  %s3930_s10 = scalar_lea.sflag [#allocation4], %s3929_s28 }
 0x581   : > { %p4503_p5 = pnand %p7238_p0, %p7237_p12 }
 0x583   : > { %p4504_p3 = pneg %p4503_p5 }
 0x585   : > { %5136 = dma.done.wait (%p4504_p3), %s3930_s10, 4096  }
 0x586   : > { %5138 = vsyncadd (%p4504_p3), %s3930_s10, 4294963200  ;;  %p22_p7 = scmp.ge.s32.totalorder %s5289_s17, 4   ;;  %s7239_s24 = smov %s5145_s25 }
 0x587   : > { %s7240_s25 = smov %s5149_s26  ;;  %s7241_s26 = smov %s5299_s20 }
 0x588   : > { %s7242_s27 = smov %s5289_s17  ;;  %24 = sbr.rel (!%p22_p7) target bundleno = 9 (0x9), region = 105 }
 0x58d   :  { %3935 = vsyncpa [#allocation3], 1 }
 0x58e   :  { %3937 = vsyncpa [#allocation3 + $0x1], 1 }
 0x58f   :  { %3938 = vsyncpa [#allocation6], 1 }
 0x590   :  { %3939 = vsyncpa [#allocation9], 1 }
 0x591   :  { %3940 = vsyncpa [#allocation4], 1 }
 0x592   :  { %3942 = vsyncpa [#allocation4 + $0x1], 1 }

</bundles_post_ra>
